<compile_context>
chip_gen: v5e
topology: v5e:2x2
jax: 0.10.0
libtpu: 0.0.40
codegen_flags: <defaults>
</compile_context>

<pallas_src>
import functools

import jax
import jax.numpy as jnp
from jax.experimental import pallas as pl
from jax.experimental.pallas import tpu as pltpu

# MXU inputs and the kv_flat intermediate are bf16 (f32 accumulation via
# preferred_element_type); elementwise / softmax / residual math stays f32.
# Set to jnp.float32 to disable mixed precision.
MATMUL_DTYPE = jnp.bfloat16
_MAX_ROW_TILE = 2048          # hard cap on any row tile (multiple of 8)


def _dtype_bytes(dt):
    return jnp.dtype(dt).itemsize


def _mm(w):
    return w.astype(MATMUL_DTYPE)


def _vmem_budget_bytes():
    """~75% of physical VMEM (96 MiB on v5e/v6e, 48 MiB on v7x), with fallback."""
    try:
        cap = int(pltpu.get_tpu_info().vmem_capacity_bytes)
    except Exception:            # conservative (v7x-sized) default
        cap = 64 * 1024 * 1024
    return min((cap * 3) // 4, 100 * 1024 * 1024)


def _choose_row_tile(n_rows, io_bytes_per_row, scratch_bytes_per_row=0,
                     fixed_bytes=0, max_tile=_MAX_ROW_TILE):
    """Largest row tile whose footprint fits the VMEM budget.

    I/O blocks are double-buffered by the pipeline (x2); full-spec weights are
    also counted twice; in-kernel temporaries once.
    """
    budget = _vmem_budget_bytes() - 2 * int(fixed_bytes)
    per_row = 2 * int(io_bytes_per_row) + int(scratch_bytes_per_row)
    t = budget // max(per_row, 1)
    t = min(int(t), max_tile)
    t -= t % 8
    t = max(t, 8)
    return n_rows if n_rows <= t else t


def _cparams():
    return pltpu.CompilerParams(
        dimension_semantics=("parallel",),
        vmem_limit_bytes=_vmem_budget_bytes(),
    )


def _full_spec(shape):
    nd = len(shape)
    return pl.BlockSpec(tuple(shape), lambda i, _nd=nd: (0,) * _nd)


def _activation(x, name):
    if name == "relu":
        return jnp.maximum(x, 0.0)
    if name == "tanh":
        return jnp.tanh(x)
    if name == "leaky_relu":
        return jnp.where(x >= 0.0, x, 0.01 * x)
    if name == "elu":
        return jnp.where(x >= 0.0, x, jnp.exp(x) - 1.0)
    # TODO(synk): 'prelu' needs a learned per-channel slope parameter.
    raise NotImplementedError(f"hypernet activation '{name}'")


# ---------------------------------------------------------------------------- kernels
def _own_embed_kernel(x_ref, w_ref, b_ref, wqa_ref, bqa_ref, wqe_ref, bqe_ref,
                      own_ref, qa_ref, qe_ref):
    own = jnp.dot(x_ref[...].astype(w_ref.dtype), w_ref[...],
                  preferred_element_type=jnp.float32) + b_ref[...]
    own_ref[...] = own
    own_c = own.astype(wqa_ref.dtype)
    qa_ref[...] = jnp.dot(own_c, wqa_ref[...],
                          preferred_element_type=jnp.float32) + bqa_ref[...]
    qe_ref[...] = jnp.dot(own_c, wqe_ref[...],
                          preferred_element_type=jnp.float32) + bqe_ref[...]


def _hyper_branch_kernel(x_ref, w1_ref, b1_ref, w2_ref, b2_ref, wkv_ref, bkv_ref,
                         kv_ref, mask_ref, *, feat_dim, emb_dim, act):
    x = x_ref[...]                                                   # [TR, F] f32
    h = jnp.dot(x.astype(w1_ref.dtype), w1_ref[...],
                preferred_element_type=jnp.float32) + b1_ref[...]
    h = _activation(h, act)
    # hypernet-generated per-entity weights, resident in VMEM/vregs only:
    wf = jnp.dot(h.astype(w2_ref.dtype), w2_ref[...],
                 preferred_element_type=jnp.float32) + b2_ref[...]   # [TR, F*nh*D]
    # emb[r, k] = sum_f x[r, f] * wf[r, f*nh*D + k]  (== th.matmul(x.unsqueeze(1), W))
    # done as F broadcast-multiply-adds on the VPU (F is tiny).
    # NOTE: for best codegen the real model config should keep nh*D a multiple
    # of 128 so these lane slices stay (8,128)-tile aligned.
    emb = x[:, 0:1] * wf[:, :emb_dim]
    for fi in range(1, feat_dim):
        emb = emb + x[:, fi:fi + 1] * wf[:, fi * emb_dim:(fi + 1) * emb_dim]
    # fused K/V projection (block-diagonal kron(I_nh, [Wk|Wv])) — stored bf16.
    kv = jnp.dot(emb.astype(wkv_ref.dtype), wkv_ref[...],
                 preferred_element_type=jnp.float32) + bkv_ref[...]
    kv_ref[...] = kv.astype(kv_ref.dtype)
    # entity mask from the tile already resident in VMEM
    mask_ref[...] = (jnp.sum(jnp.abs(x), axis=-1, keepdims=True) != 0.0
                     ).astype(jnp.float32)


def _branch_attn_kernel(init_ref, q_ref, kv_ref, mask_ref, wo_ref, bo_ref, o_ref,
                        *, nh, n_att_heads, d):
    # init: [TB, D]  q: [TB, nh, D]  kv: [TB, L, 2*nh*D] (bf16)  mask: [TB, nh, L]
    # wo:  [nh, D, D] (pre-scaled by softmax(merger))  bo: [nh, 1, D] (pre-scaled)
    out = init_ref[...]                               # residual / running merge
    q_all = q_ref[...]
    mask_all = mask_ref[...]
    kv = kv_ref[...]
    wo = wo_ref[...]
    bo = bo_ref[...]
    dh = d // n_att_heads
    scale = jnp.float32(1.0 / (float(dh) ** 0.5))
    neg = jnp.float32(-1e9)
    lane = jax.lax.broadcasted_iota(jnp.int32, (1, 1, d), 2)
    for h in range(nh):                               # static hpn-head loop
        q = q_all[:, h, :]                            # [TB, D]
        valid = mask_all[:, h, :] > 0.0               # [TB, L]
        k = kv[:, :, h * d:(h + 1) * d].astype(jnp.float32)             # [TB, L, D]
        v = kv[:, :, (nh + h) * d:(nh + h + 1) * d].astype(jnp.float32)  # [TB, L, D]
        prod = q[:, None, :] * k                      # [TB, L, D] whole-width VPU
        p_full = jnp.zeros_like(k)
        for a in range(n_att_heads):                  # static attention-head loop
            sel = jnp.logical_and(lane >= a * dh, lane < (a + 1) * dh)   # [1,1,D]
            s = jnp.sum(jnp.where(sel, prod, 0.0), axis=-1) * scale      # [TB, L]
            s = jnp.where(valid, s, neg)
            s = s - jnp.max(s, axis=-1, keepdims=True)
            e = jnp.exp(s)
            p = e / jnp.sum(e, axis=-1, keepdims=True)                   # exact divide
            p_full = p_full + jnp.where(sel, p[:, :, None], 0.0)
        ctx = jnp.sum(p_full * v, axis=1)             # [TB, D] (all att heads at once)
        # fused output projection + merger weighting (wo/bo pre-scaled per head)
        out = out + (jnp.dot(ctx.astype(wo.dtype), wo[h],
                             preferred_element_type=jnp.float32) + bo[h])
    o_ref[...] = out                                  # single lane-dense store


# ---------------------------------------------------------------------------- wrappers
def own_embed(x, w, b, wqa, bqa, wqe, bqe):
    n, f = x.shape
    d = w.shape[1]
    io_row = f * 4 + 3 * d * 4
    scratch_row = 2 * d * 4
    fixed = sum(a.size * _dtype_bytes(a.dtype) for a in (w, b, wqa, bqa, wqe, bqe))
    tr = _choose_row_tile(n, io_row, scratch_row, fixed)
    return pl.pallas_call(
        _own_embed_kernel,
        grid=(pl.cdiv(n, tr),),
        in_specs=[
            pl.BlockSpec((tr, f), lambda i: (i, 0)),
            _full_spec(w.shape), _full_spec(b.shape),
            _full_spec(wqa.shape), _full_spec(bqa.shape),
            _full_spec(wqe.shape), _full_spec(bqe.shape),
        ],
        out_specs=(
            pl.BlockSpec((tr, d), lambda i: (i, 0)),
            pl.BlockSpec((tr, d), lambda i: (i, 0)),
            pl.BlockSpec((tr, d), lambda i: (i, 0)),
        ),
        out_shape=(
            jax.ShapeDtypeStruct((n, d), jnp.float32),
            jax.ShapeDtypeStruct((n, d), jnp.float32),
            jax.ShapeDtypeStruct((n, d), jnp.float32),
        ),
        compiler_params=_cparams(),
    )(x, w, b, wqa, bqa, wqe, bqe)


def hyper_branch(feats, w1, b1, w2, b2, wkv, bkv, act):
    n, f = feats.shape
    hdim = w1.shape[1]
    emb_dim = wkv.shape[0]            # nh * D
    kv_dim = wkv.shape[1]             # 2 * nh * D
    wf_dim = w2.shape[1]              # F * nh * D   (the big VMEM-resident intermediate)
    io_row = f * 4 + kv_dim * _dtype_bytes(MATMUL_DTYPE) + 4
    scratch_row = (hdim + wf_dim + emb_dim + kv_dim) * 4
    fixed = sum(a.size * _dtype_bytes(a.dtype) for a in (w1, b1, w2, b2, wkv, bkv))
    tr = _choose_row_tile(n, io_row, scratch_row, fixed)
    kernel = functools.partial(_hyper_branch_kernel, feat_dim=f, emb_dim=emb_dim,
                               act=act)
    return pl.pallas_call(
        kernel,
        grid=(pl.cdiv(n, tr),),
        in_specs=[
            pl.BlockSpec((tr, f), lambda i: (i, 0)),
            _full_spec(w1.shape), _full_spec(b1.shape),
            _full_spec(w2.shape), _full_spec(b2.shape),
            _full_spec(wkv.shape), _full_spec(bkv.shape),
        ],
        out_specs=(
            pl.BlockSpec((tr, kv_dim), lambda i: (i, 0)),
            pl.BlockSpec((tr, 1), lambda i: (i, 0)),
        ),
        out_shape=(
            jax.ShapeDtypeStruct((n, kv_dim), MATMUL_DTYPE),   # bf16 intermediate
            jax.ShapeDtypeStruct((n, 1), jnp.float32),
        ),
        compiler_params=_cparams(),
    )(feats, w1, b1, w2, b2, wkv, bkv)


def branch_attention(init, q_perm, kv3, mask_perm, wo_scaled, bo_scaled, n_att_heads):
    b, nh, d = q_perm.shape
    l = kv3.shape[1]
    kvw = kv3.shape[2]
    kv_b = _dtype_bytes(kv3.dtype)
    io_row = 2 * d * 4 + nh * d * 4 + l * kvw * kv_b + nh * l * 4
    scratch_row = 6 * l * d * 4                      # k/v/prod/p_full f32 + headroom
    fixed = sum(a.size * _dtype_bytes(a.dtype) for a in (wo_scaled, bo_scaled))
    tb = _choose_row_tile(b, io_row, scratch_row, fixed)
    kernel = functools.partial(_branch_attn_kernel, nh=nh,
                               n_att_heads=n_att_heads, d=d)
    return pl.pallas_call(
        kernel,
        grid=(pl.cdiv(b, tb),),
        in_specs=[
            pl.BlockSpec((tb, d), lambda i: (i, 0)),
            pl.BlockSpec((tb, nh, d), lambda i: (i, 0, 0)),
            pl.BlockSpec((tb, l, kvw), lambda i: (i, 0, 0)),
            pl.BlockSpec((tb, nh, l), lambda i: (i, 0, 0)),
            _full_spec(wo_scaled.shape), _full_spec(bo_scaled.shape),
        ],
        out_specs=pl.BlockSpec((tb, d), lambda i: (i, 0)),
        out_shape=jax.ShapeDtypeStruct((b, d), jnp.float32),
        compiler_params=_cparams(),
    )(init, q_perm, kv3, mask_perm, wo_scaled, bo_scaled)


# ---------------------------------------------------------------------------- params
def _init_linear_params(key, in_dim, out_dim):
    k1, k2 = jax.random.split(key)
    bound = 1.0 / (in_dim ** 0.5)
    w = jax.random.uniform(k1, (in_dim, out_dim), jnp.float32, -bound, bound)
    b = jax.random.uniform(k2, (1, out_dim), jnp.float32, -bound, bound)
    return w, b


def init_tree_encoder_params(key, cfg):
    d = cfg["entity_hidden_dim"]
    nh = cfg["hpn_head_num"]
    hyper = cfg["hpn_hyper_dim"]
    p = {}
    keys = jax.random.split(key, 16)
    p["fc1_own_w"], p["fc1_own_b"] = _init_linear_params(keys[0], cfg["own_feats_dim"], d)
    fa = cfg["ally_feats_dim"]
    p["hyp_ally_w1"], p["hyp_ally_b1"] = _init_linear_params(keys[1], fa, hyper)
    p["hyp_ally_w2"], p["hyp_ally_b2"] = _init_linear_params(keys[2], hyper, fa * d * nh)
    fe = cfg["enemy_feats_dim"]
    p["hyp_enemy_w1"], p["hyp_enemy_b1"] = _init_linear_params(keys[3], fe, hyper)
    p["hyp_enemy_w2"], p["hyp_enemy_b2"] = _init_linear_params(keys[4], hyper, fe * d * nh)
    for i, name in enumerate(["att_ally", "att_enemy"]):
        base = 5 + 4 * i
        for j, proj in enumerate(["q", "k", "v", "o"]):
            w, b = _init_linear_params(keys[base + j], d, d)
            p[f"{name}_{proj}_w"] = w
            p[f"{name}_{proj}_b"] = b
    # PyTorch Merger init: weight filled with 1.0
    p["merger_w"] = jnp.ones((nh, d), jnp.float32)
    return p


# ---------------------------------------------------------------------------- forward
def tree_encoder_forward(params, inputs, cfg):
    bs, own_feats, ally_feats, enemy_feats = inputs
    na = cfg["n_agents"]
    nh = cfg["hpn_head_num"]
    d = cfg["entity_hidden_dim"]
    att_heads = cfg["hpn_attention_head"]
    act = cfg["hpn_hyper_activation"]
    big_b = bs * na

    # 1) own embedding + both branches' attention-query projections (fused kernel)
    emb_own, q_ally, q_enemy = own_embed(
        own_feats, _mm(params["fc1_own_w"]), params["fc1_own_b"],
        _mm(params["att_ally_q_w"]), params["att_ally_q_b"],
        _mm(params["att_enemy_q_w"]), params["att_enemy_q_b"])

    # merger softmax: the weight is a parameter -> one softmax per forward,
    # folded into the attention output projection below.
    if nh > 1:
        smw = jax.nn.softmax(params["merger_w"], axis=0)              # [nh, D]
    else:
        smw = jnp.ones((nh, d), jnp.float32)

    # Reference pairs head-OUTER replicated q/mask with head-INNER k/v layout:
    # agent b / hpn head h uses the query & mask of agent (b*nh + h) % big_b.
    scram = (jnp.arange(big_b)[:, None] * nh + jnp.arange(nh)[None, :]) % big_b

    eye_nh = jnp.eye(nh, dtype=jnp.float32)

    def branch(entity_feats, n_entities, prefix, att_name, q_proj, init):
        # K/V projection folded into the hypernet kernel as a block-diagonal
        # matmul (same Wk/Wv applied to every hpn head's D-slice).
        wkv = jnp.concatenate(
            [jnp.kron(eye_nh, params[f"{att_name}_k_w"]),
             jnp.kron(eye_nh, params[f"{att_name}_v_w"])], axis=1)    # [nh*D, 2*nh*D]
        bkv = jnp.concatenate(
            [jnp.tile(params[f"{att_name}_k_b"], (1, nh)),
             jnp.tile(params[f"{att_name}_v_b"], (1, nh))], axis=1)   # [1, 2*nh*D]
        kv_flat, mask_flat = hyper_branch(
            entity_feats,
            _mm(params[f"{prefix}_w1"]), params[f"{prefix}_b1"],
            _mm(params[f"{prefix}_w2"]), params[f"{prefix}_b2"],
            _mm(wkv), bkv, act)
        # leading-dim splits only -> free reshapes (no transpose, no head tiling)
        kv3 = kv_flat.reshape(big_b, n_entities, 2 * nh * d)
        mask2 = mask_flat.reshape(big_b, n_entities)
        q_perm = q_proj[scram]                                        # [B, nh, D]
        mask_perm = mask2[scram]                                      # [B, nh, L]
        # merger weights folded into the attention output projection
        wo_scaled = _mm(params[f"{att_name}_o_w"][None, :, :] * smw[:, None, :])
        bo_scaled = params[f"{att_name}_o_b"][None, :, :] * smw[:, None, :]
        return branch_attention(init, q_perm, kv3, mask_perm, wo_scaled,
                                bo_scaled, att_heads)

    # Residual + Merger are fused into the branch kernels:
    #   out = emb_own + sum_h smw[h]*ally_h + sum_h smw[h]*enemy_h
    out = branch(ally_feats, cfg["n_allies"], "hyp_ally", "att_ally", q_ally, emb_own)
    out = branch(enemy_feats, cfg["n_enemies"], "hyp_enemy", "att_enemy", q_enemy, out)
    return out


# ---------------------------------------------------------------------------- demo
if __name__ == "__main__":
    cfg = dict(
        n_agents=2,
        n_allies=3,
        n_enemies=4,
        n_actions=5,
        hpn_head_num=2,
        hpn_attention_head=2,
        hpn_hyper_dim=16,
        hpn_hyper_activation="relu",
        entity_hidden_dim=8,
        own_feats_dim=6,
        ally_feats_dim=5,
        enemy_feats_dim=7,
    )
    bs = 2

    key = jax.random.PRNGKey(0)
    kp, k1, k2, k3 = jax.random.split(key, 4)
    params = init_tree_encoder_params(kp, cfg)

    own = jax.random.normal(k1, (bs * cfg["n_agents"], cfg["own_feats_dim"]), jnp.float32)
    ally = jax.random.normal(
        k2, (bs * cfg["n_agents"] * cfg["n_allies"], cfg["ally_feats_dim"]), jnp.float32)
    enemy = jax.random.normal(
        k3, (bs * cfg["n_agents"] * cfg["n_enemies"], cfg["enemy_feats_dim"]), jnp.float32)
    # zero a couple of entity rows so the attention masks are exercised
    ally = ally.at[1].set(0.0)
    enemy = enemy.at[2].set(0.0)

    fwd = jax.jit(lambda o, a, e: tree_encoder_forward(params, (bs, o, a, e), cfg))
    out = jax.block_until_ready(fwd(own, ally, enemy))
    assert out.shape == (bs * cfg["n_agents"], cfg["entity_hidden_dim"])
    assert bool(jnp.all(jnp.isfinite(out)))
    print("KERNEL_OK")
</pallas_src>

<mosaic_0001>
module attributes {stable_mosaic.version = 11 : i64} {
  func.func @_hyper_branch_kernel(%arg0: i32, %arg1: memref<12x5xf32, #tpu.memory_space<vmem>>, %arg2: memref<5x16xbf16, #tpu.memory_space<vmem>>, %arg3: memref<1x16xf32, #tpu.memory_space<vmem>>, %arg4: memref<16x80xbf16, #tpu.memory_space<vmem>>, %arg5: memref<1x80xf32, #tpu.memory_space<vmem>>, %arg6: memref<16x32xbf16, #tpu.memory_space<vmem>>, %arg7: memref<1x32xf32, #tpu.memory_space<vmem>>, %arg8: memref<12x32xbf16, #tpu.memory_space<vmem>>, %arg9: memref<12x1xf32, #tpu.memory_space<vmem>>) attributes {dimension_semantics = [#tpu.dimension_semantics<parallel>], iteration_bounds = array<i64: 1>, scalar_prefetch = 0 : i64, scratch_operands = 0 : i64, tpu.core_type = #tpu.core_type<tc>, window_params = [{transform_indices = @transform_0, window_bounds = array<i64: 12, 5>}, {pipeline_mode = #tpu.pipeline_mode<synchronous>, transform_indices = @transform_1, window_bounds = array<i64: 5, 16>}, {pipeline_mode = #tpu.pipeline_mode<synchronous>, transform_indices = @transform_2, window_bounds = array<i64: 1, 16>}, {pipeline_mode = #tpu.pipeline_mode<synchronous>, transform_indices = @transform_3, window_bounds = array<i64: 16, 80>}, {pipeline_mode = #tpu.pipeline_mode<synchronous>, transform_indices = @transform_4, window_bounds = array<i64: 1, 80>}, {pipeline_mode = #tpu.pipeline_mode<synchronous>, transform_indices = @transform_5, window_bounds = array<i64: 16, 32>}, {pipeline_mode = #tpu.pipeline_mode<synchronous>, transform_indices = @transform_6, window_bounds = array<i64: 1, 32>}, {transform_indices = @transform_7, window_bounds = array<i64: 12, 32>}, {transform_indices = @transform_8, window_bounds = array<i64: 12, 1>}]} {
    %c0 = arith.constant 0 : index
    %c0_0 = arith.constant 0 : index
    %0 = vector.load %arg1[%c0, %c0_0] : memref<12x5xf32, #tpu.memory_space<vmem>>, vector<12x5xf32>
    %1 = arith.truncf %0 : vector<12x5xf32> to vector<12x5xbf16>
    %c0_1 = arith.constant 0 : index
    %c0_2 = arith.constant 0 : index
    %2 = vector.load %arg2[%c0_1, %c0_2] : memref<5x16xbf16, #tpu.memory_space<vmem>>, vector<5x16xbf16>
    %cst = arith.constant dense<0.000000e+00> : vector<12x16xf32>
    %3 = tpu.matmul %1, %2, %cst {dimension_numbers = #tpu.dot_dimension_numbers<[1], [0], [0], [1], [0, 0, 1, 1], [], []>} : vector<12x5xbf16>, vector<5x16xbf16>, vector<12x16xf32> -> vector<12x16xf32>
    %c0_3 = arith.constant 0 : index
    %c0_4 = arith.constant 0 : index
    %4 = vector.load %arg3[%c0_3, %c0_4] : memref<1x16xf32, #tpu.memory_space<vmem>>, vector<1x16xf32>
    %5 = vector.broadcast %4 : vector<1x16xf32> to vector<12x16xf32>
    %6 = arith.addf %3, %5 : vector<12x16xf32>
    %cst_5 = arith.constant 0.000000e+00 : f32
    %7 = vector.broadcast %cst_5 : f32 to vector<12x16xf32>
    %8 = arith.maximumf %6, %7 : vector<12x16xf32>
    %9 = arith.truncf %8 : vector<12x16xf32> to vector<12x16xbf16>
    %c0_6 = arith.constant 0 : index
    %c0_7 = arith.constant 0 : index
    %10 = vector.load %arg4[%c0_6, %c0_7] : memref<16x80xbf16, #tpu.memory_space<vmem>>, vector<16x80xbf16>
    %cst_8 = arith.constant dense<0.000000e+00> : vector<12x80xf32>
    %11 = tpu.matmul %9, %10, %cst_8 {dimension_numbers = #tpu.dot_dimension_numbers<[1], [0], [0], [1], [0, 0, 1, 1], [], []>} : vector<12x16xbf16>, vector<16x80xbf16>, vector<12x80xf32> -> vector<12x80xf32>
    %c0_9 = arith.constant 0 : index
    %c0_10 = arith.constant 0 : index
    %12 = vector.load %arg5[%c0_9, %c0_10] : memref<1x80xf32, #tpu.memory_space<vmem>>, vector<1x80xf32>
    %13 = vector.broadcast %12 : vector<1x80xf32> to vector<12x80xf32>
    %14 = arith.addf %11, %13 : vector<12x80xf32>
    %15 = vector.extract_strided_slice %0 {offsets = [0, 0], sizes = [12, 1], strides = [1, 1]} : vector<12x5xf32> to vector<12x1xf32>
    %16 = vector.extract_strided_slice %14 {offsets = [0, 0], sizes = [12, 16], strides = [1, 1]} : vector<12x80xf32> to vector<12x16xf32>
    %17 = vector.broadcast %15 : vector<12x1xf32> to vector<12x16xf32>
    %18 = arith.mulf %17, %16 : vector<12x16xf32>
    %19 = vector.extract_strided_slice %0 {offsets = [0, 1], sizes = [12, 1], strides = [1, 1]} : vector<12x5xf32> to vector<12x1xf32>
    %20 = vector.extract_strided_slice %14 {offsets = [0, 16], sizes = [12, 16], strides = [1, 1]} : vector<12x80xf32> to vector<12x16xf32>
    %21 = vector.broadcast %19 : vector<12x1xf32> to vector<12x16xf32>
    %22 = arith.mulf %21, %20 : vector<12x16xf32>
    %23 = arith.addf %18, %22 : vector<12x16xf32>
    %24 = vector.extract_strided_slice %0 {offsets = [0, 2], sizes = [12, 1], strides = [1, 1]} : vector<12x5xf32> to vector<12x1xf32>
    %25 = vector.extract_strided_slice %14 {offsets = [0, 32], sizes = [12, 16], strides = [1, 1]} : vector<12x80xf32> to vector<12x16xf32>
    %26 = vector.broadcast %24 : vector<12x1xf32> to vector<12x16xf32>
    %27 = arith.mulf %26, %25 : vector<12x16xf32>
    %28 = arith.addf %23, %27 : vector<12x16xf32>
    %29 = vector.extract_strided_slice %0 {offsets = [0, 3], sizes = [12, 1], strides = [1, 1]} : vector<12x5xf32> to vector<12x1xf32>
    %30 = vector.extract_strided_slice %14 {offsets = [0, 48], sizes = [12, 16], strides = [1, 1]} : vector<12x80xf32> to vector<12x16xf32>
    %31 = vector.broadcast %29 : vector<12x1xf32> to vector<12x16xf32>
    %32 = arith.mulf %31, %30 : vector<12x16xf32>
    %33 = arith.addf %28, %32 : vector<12x16xf32>
    %34 = vector.extract_strided_slice %0 {offsets = [0, 4], sizes = [12, 1], strides = [1, 1]} : vector<12x5xf32> to vector<12x1xf32>
    %35 = vector.extract_strided_slice %14 {offsets = [0, 64], sizes = [12, 16], strides = [1, 1]} : vector<12x80xf32> to vector<12x16xf32>
    %36 = vector.broadcast %34 : vector<12x1xf32> to vector<12x16xf32>
    %37 = arith.mulf %36, %35 : vector<12x16xf32>
    %38 = arith.addf %33, %37 : vector<12x16xf32>
    %39 = arith.truncf %38 : vector<12x16xf32> to vector<12x16xbf16>
    %c0_11 = arith.constant 0 : index
    %c0_12 = arith.constant 0 : index
    %40 = vector.load %arg6[%c0_11, %c0_12] : memref<16x32xbf16, #tpu.memory_space<vmem>>, vector<16x32xbf16>
    %cst_13 = arith.constant dense<0.000000e+00> : vector<12x32xf32>
    %41 = tpu.matmul %39, %40, %cst_13 {dimension_numbers = #tpu.dot_dimension_numbers<[1], [0], [0], [1], [0, 0, 1, 1], [], []>} : vector<12x16xbf16>, vector<16x32xbf16>, vector<12x32xf32> -> vector<12x32xf32>
    %c0_14 = arith.constant 0 : index
    %c0_15 = arith.constant 0 : index
    %42 = vector.load %arg7[%c0_14, %c0_15] : memref<1x32xf32, #tpu.memory_space<vmem>>, vector<1x32xf32>
    %43 = vector.broadcast %42 : vector<1x32xf32> to vector<12x32xf32>
    %44 = arith.addf %41, %43 : vector<12x32xf32>
    %45 = arith.truncf %44 : vector<12x32xf32> to vector<12x32xbf16>
    %c0_16 = arith.constant 0 : index
    %c0_17 = arith.constant 0 : index
    %46 = vector.load %arg8[%c0_16, %c0_17] : memref<12x32xbf16, #tpu.memory_space<vmem>>, vector<12x32xbf16>
    tpu.vector_store %arg8[%c0_16, %c0_17], %45 {strides = array<i32>} : memref<12x32xbf16, #tpu.memory_space<vmem>>, vector<12x32xbf16>,
    %47 = math.absf %0 : vector<12x5xf32>
    %cst_18 = arith.constant dense<0.000000e+00> : vector<12xf32>
    %48 = vector.multi_reduction <add>, %47, %cst_18 [1] : vector<12x5xf32> to vector<12xf32>
    %49 = vector.shape_cast %48 : vector<12xf32> to vector<12x1xf32>
    %cst_19 = arith.constant 0.000000e+00 : f32
    %50 = vector.broadcast %cst_19 : f32 to vector<12x1xf32>
    %51 = arith.cmpf one, %49, %50 : vector<12x1xf32>
    %52 = arith.extui %51 : vector<12x1xi1> to vector<12x1xi32>
    %53 = arith.sitofp %52 : vector<12x1xi32> to vector<12x1xf32>
    %c0_20 = arith.constant 0 : index
    %c0_21 = arith.constant 0 : index
    %54 = vector.load %arg9[%c0_20, %c0_21] : memref<12x1xf32, #tpu.memory_space<vmem>>, vector<12x1xf32>
    tpu.vector_store %arg9[%c0_20, %c0_21], %53 {strides = array<i32>} : memref<12x1xf32, #tpu.memory_space<vmem>>, vector<12x1xf32>,
    return
  }
  func.func @transform_0(%arg0: i32) -> (i32, i32) {
    %c0_i32 = arith.constant 0 : i32
    %c0_i32_0 = arith.constant 0 : i32
    return %arg0, %c0_i32 : i32, i32
  }
  func.func @transform_1(%arg0: i32) -> (i32, i32) {
    %c0_i32 = arith.constant 0 : i32
    %c0_i32_0 = arith.constant 0 : i32
    %c0_i32_1 = arith.constant 0 : i32
    return %c0_i32, %c0_i32_0 : i32, i32
  }
  func.func @transform_2(%arg0: i32) -> (i32, i32) {
    %c0_i32 = arith.constant 0 : i32
    %c0_i32_0 = arith.constant 0 : i32
    %c0_i32_1 = arith.constant 0 : i32
    return %c0_i32, %c0_i32_0 : i32, i32
  }
  func.func @transform_3(%arg0: i32) -> (i32, i32) {
    %c0_i32 = arith.constant 0 : i32
    %c0_i32_0 = arith.constant 0 : i32
    %c0_i32_1 = arith.constant 0 : i32
    return %c0_i32, %c0_i32_0 : i32, i32
  }
  func.func @transform_4(%arg0: i32) -> (i32, i32) {
    %c0_i32 = arith.constant 0 : i32
    %c0_i32_0 = arith.constant 0 : i32
    %c0_i32_1 = arith.constant 0 : i32
    return %c0_i32, %c0_i32_0 : i32, i32
  }
  func.func @transform_5(%arg0: i32) -> (i32, i32) {
    %c0_i32 = arith.constant 0 : i32
    %c0_i32_0 = arith.constant 0 : i32
    %c0_i32_1 = arith.constant 0 : i32
    return %c0_i32, %c0_i32_0 : i32, i32
  }
  func.func @transform_6(%arg0: i32) -> (i32, i32) {
    %c0_i32 = arith.constant 0 : i32
    %c0_i32_0 = arith.constant 0 : i32
    %c0_i32_1 = arith.constant 0 : i32
    return %c0_i32, %c0_i32_0 : i32, i32
  }
  func.func @transform_7(%arg0: i32) -> (i32, i32) {
    %c0_i32 = arith.constant 0 : i32
    %c0_i32_0 = arith.constant 0 : i32
    return %arg0, %c0_i32 : i32, i32
  }
  func.func @transform_8(%arg0: i32) -> (i32, i32) {
    %c0_i32 = arith.constant 0 : i32
    %c0_i32_0 = arith.constant 0 : i32
    return %arg0, %c0_i32 : i32, i32
  }
}

module attributes {stable_mosaic.version = 11 : i64} {
  func.func @_own_embed_kernel(%arg0: i32, %arg1: memref<4x6xf32, #tpu.memory_space<vmem>>, %arg2: memref<6x8xbf16, #tpu.memory_space<vmem>>, %arg3: memref<1x8xf32, #tpu.memory_space<vmem>>, %arg4: memref<8x8xbf16, #tpu.memory_space<vmem>>, %arg5: memref<1x8xf32, #tpu.memory_space<vmem>>, %arg6: memref<8x8xbf16, #tpu.memory_space<vmem>>, %arg7: memref<1x8xf32, #tpu.memory_space<vmem>>, %arg8: memref<4x8xf32, #tpu.memory_space<vmem>>, %arg9: memref<4x8xf32, #tpu.memory_space<vmem>>, %arg10: memref<4x8xf32, #tpu.memory_space<vmem>>) attributes {dimension_semantics = [#tpu.dimension_semantics<parallel>], iteration_bounds = array<i64: 1>, scalar_prefetch = 0 : i64, scratch_operands = 0 : i64, tpu.core_type = #tpu.core_type<tc>, window_params = [{transform_indices = @transform_0, window_bounds = array<i64: 4, 6>}, {pipeline_mode = #tpu.pipeline_mode<synchronous>, transform_indices = @transform_1, window_bounds = array<i64: 6, 8>}, {pipeline_mode = #tpu.pipeline_mode<synchronous>, transform_indices = @transform_2, window_bounds = array<i64: 1, 8>}, {pipeline_mode = #tpu.pipeline_mode<synchronous>, transform_indices = @transform_3, window_bounds = array<i64: 8, 8>}, {pipeline_mode = #tpu.pipeline_mode<synchronous>, transform_indices = @transform_4, window_bounds = array<i64: 1, 8>}, {pipeline_mode = #tpu.pipeline_mode<synchronous>, transform_indices = @transform_5, window_bounds = array<i64: 8, 8>}, {pipeline_mode = #tpu.pipeline_mode<synchronous>, transform_indices = @transform_6, window_bounds = array<i64: 1, 8>}, {transform_indices = @transform_7, window_bounds = array<i64: 4, 8>}, {transform_indices = @transform_8, window_bounds = array<i64: 4, 8>}, {transform_indices = @transform_9, window_bounds = array<i64: 4, 8>}]} {
    %c0 = arith.constant 0 : index
    %c0_0 = arith.constant 0 : index
    %0 = vector.load %arg1[%c0, %c0_0] : memref<4x6xf32, #tpu.memory_space<vmem>>, vector<4x6xf32>
    %1 = arith.truncf %0 : vector<4x6xf32> to vector<4x6xbf16>
    %c0_1 = arith.constant 0 : index
    %c0_2 = arith.constant 0 : index
    %2 = vector.load %arg2[%c0_1, %c0_2] : memref<6x8xbf16, #tpu.memory_space<vmem>>, vector<6x8xbf16>
    %cst = arith.constant dense<0.000000e+00> : vector<4x8xf32>
    %3 = tpu.matmul %1, %2, %cst {dimension_numbers = #tpu.dot_dimension_numbers<[1], [0], [0], [1], [0, 0, 1, 1], [], []>} : vector<4x6xbf16>, vector<6x8xbf16>, vector<4x8xf32> -> vector<4x8xf32>
    %c0_3 = arith.constant 0 : index
    %c0_4 = arith.constant 0 : index
    %4 = vector.load %arg3[%c0_3, %c0_4] : memref<1x8xf32, #tpu.memory_space<vmem>>, vector<1x8xf32>
    %5 = vector.broadcast %4 : vector<1x8xf32> to vector<4x8xf32>
    %6 = arith.addf %3, %5 : vector<4x8xf32>
    %c0_5 = arith.constant 0 : index
    %c0_6 = arith.constant 0 : index
    %7 = vector.load %arg8[%c0_5, %c0_6] : memref<4x8xf32, #tpu.memory_space<vmem>>, vector<4x8xf32>
    tpu.vector_store %arg8[%c0_5, %c0_6], %6 {strides = array<i32>} : memref<4x8xf32, #tpu.memory_space<vmem>>, vector<4x8xf32>,
    %8 = arith.truncf %6 : vector<4x8xf32> to vector<4x8xbf16>
    %c0_7 = arith.constant 0 : index
    %c0_8 = arith.constant 0 : index
    %9 = vector.load %arg4[%c0_7, %c0_8] : memref<8x8xbf16, #tpu.memory_space<vmem>>, vector<8x8xbf16>
    %cst_9 = arith.constant dense<0.000000e+00> : vector<4x8xf32>
    %10 = tpu.matmul %8, %9, %cst_9 {dimension_numbers = #tpu.dot_dimension_numbers<[1], [0], [0], [1], [0, 0, 1, 1], [], []>} : vector<4x8xbf16>, vector<8x8xbf16>, vector<4x8xf32> -> vector<4x8xf32>
    %c0_10 = arith.constant 0 : index
    %c0_11 = arith.constant 0 : index
    %11 = vector.load %arg5[%c0_10, %c0_11] : memref<1x8xf32, #tpu.memory_space<vmem>>, vector<1x8xf32>
    %12 = vector.broadcast %11 : vector<1x8xf32> to vector<4x8xf32>
    %13 = arith.addf %10, %12 : vector<4x8xf32>
    %c0_12 = arith.constant 0 : index
    %c0_13 = arith.constant 0 : index
    %14 = vector.load %arg9[%c0_12, %c0_13] : memref<4x8xf32, #tpu.memory_space<vmem>>, vector<4x8xf32>
    tpu.vector_store %arg9[%c0_12, %c0_13], %13 {strides = array<i32>} : memref<4x8xf32, #tpu.memory_space<vmem>>, vector<4x8xf32>,
    %c0_14 = arith.constant 0 : index
    %c0_15 = arith.constant 0 : index
    %15 = vector.load %arg6[%c0_14, %c0_15] : memref<8x8xbf16, #tpu.memory_space<vmem>>, vector<8x8xbf16>
    %cst_16 = arith.constant dense<0.000000e+00> : vector<4x8xf32>
    %16 = tpu.matmul %8, %15, %cst_16 {dimension_numbers = #tpu.dot_dimension_numbers<[1], [0], [0], [1], [0, 0, 1, 1], [], []>} : vector<4x8xbf16>, vector<8x8xbf16>, vector<4x8xf32> -> vector<4x8xf32>
    %c0_17 = arith.constant 0 : index
    %c0_18 = arith.constant 0 : index
    %17 = vector.load %arg7[%c0_17, %c0_18] : memref<1x8xf32, #tpu.memory_space<vmem>>, vector<1x8xf32>
    %18 = vector.broadcast %17 : vector<1x8xf32> to vector<4x8xf32>
    %19 = arith.addf %16, %18 : vector<4x8xf32>
    %c0_19 = arith.constant 0 : index
    %c0_20 = arith.constant 0 : index
    %20 = vector.load %arg10[%c0_19, %c0_20] : memref<4x8xf32, #tpu.memory_space<vmem>>, vector<4x8xf32>
    tpu.vector_store %arg10[%c0_19, %c0_20], %19 {strides = array<i32>} : memref<4x8xf32, #tpu.memory_space<vmem>>, vector<4x8xf32>,
    return
  }
  func.func @transform_0(%arg0: i32) -> (i32, i32) {
    %c0_i32 = arith.constant 0 : i32
    %c0_i32_0 = arith.constant 0 : i32
    return %arg0, %c0_i32 : i32, i32
  }
  func.func @transform_1(%arg0: i32) -> (i32, i32) {
    %c0_i32 = arith.constant 0 : i32
    %c0_i32_0 = arith.constant 0 : i32
    %c0_i32_1 = arith.constant 0 : i32
    return %c0_i32, %c0_i32_0 : i32, i32
  }
  func.func @transform_2(%arg0: i32) -> (i32, i32) {
    %c0_i32 = arith.constant 0 : i32
    %c0_i32_0 = arith.constant 0 : i32
    %c0_i32_1 = arith.constant 0 : i32
    return %c0_i32, %c0_i32_0 : i32, i32
  }
  func.func @transform_3(%arg0: i32) -> (i32, i32) {
    %c0_i32 = arith.constant 0 : i32
    %c0_i32_0 = arith.constant 0 : i32
    %c0_i32_1 = arith.constant 0 : i32
    return %c0_i32, %c0_i32_0 : i32, i32
  }
  func.func @transform_4(%arg0: i32) -> (i32, i32) {
    %c0_i32 = arith.constant 0 : i32
    %c0_i32_0 = arith.constant 0 : i32
    %c0_i32_1 = arith.constant 0 : i32
    return %c0_i32, %c0_i32_0 : i32, i32
  }
  func.func @transform_5(%arg0: i32) -> (i32, i32) {
    %c0_i32 = arith.constant 0 : i32
    %c0_i32_0 = arith.constant 0 : i32
    %c0_i32_1 = arith.constant 0 : i32
    return %c0_i32, %c0_i32_0 : i32, i32
  }
  func.func @transform_6(%arg0: i32) -> (i32, i32) {
    %c0_i32 = arith.constant 0 : i32
    %c0_i32_0 = arith.constant 0 : i32
    %c0_i32_1 = arith.constant 0 : i32
    return %c0_i32, %c0_i32_0 : i32, i32
  }
  func.func @transform_7(%arg0: i32) -> (i32, i32) {
    %c0_i32 = arith.constant 0 : i32
    %c0_i32_0 = arith.constant 0 : i32
    return %arg0, %c0_i32 : i32, i32
  }
  func.func @transform_8(%arg0: i32) -> (i32, i32) {
    %c0_i32 = arith.constant 0 : i32
    %c0_i32_0 = arith.constant 0 : i32
    return %arg0, %c0_i32 : i32, i32
  }
  func.func @transform_9(%arg0: i32) -> (i32, i32) {
    %c0_i32 = arith.constant 0 : i32
    %c0_i32_0 = arith.constant 0 : i32
    return %arg0, %c0_i32 : i32, i32
  }
}

module attributes {stable_mosaic.version = 11 : i64} {
  func.func @_branch_attn_kernel(%arg0: i32, %arg1: memref<4x8xf32, #tpu.memory_space<vmem>>, %arg2: memref<4x2x8xf32, #tpu.memory_space<vmem>>, %arg3: memref<4x3x32xbf16, #tpu.memory_space<vmem>>, %arg4: memref<4x2x3xf32, #tpu.memory_space<vmem>>, %arg5: memref<2x8x8xbf16, #tpu.memory_space<vmem>>, %arg6: memref<2x1x8xf32, #tpu.memory_space<vmem>>, %arg7: memref<4x8xf32, #tpu.memory_space<vmem>>) attributes {dimension_semantics = [#tpu.dimension_semantics<parallel>], iteration_bounds = array<i64: 1>, scalar_prefetch = 0 : i64, scratch_operands = 0 : i64, tpu.core_type = #tpu.core_type<tc>, window_params = [{transform_indices = @transform_0, window_bounds = array<i64: 4, 8>}, {transform_indices = @transform_1, window_bounds = array<i64: 4, 2, 8>}, {transform_indices = @transform_2, window_bounds = array<i64: 4, 3, 32>}, {transform_indices = @transform_3, window_bounds = array<i64: 4, 2, 3>}, {pipeline_mode = #tpu.pipeline_mode<synchronous>, transform_indices = @transform_4, window_bounds = array<i64: 2, 8, 8>}, {pipeline_mode = #tpu.pipeline_mode<synchronous>, transform_indices = @transform_5, window_bounds = array<i64: 2, 1, 8>}, {transform_indices = @transform_6, window_bounds = array<i64: 4, 8>}]} {
    %c0 = arith.constant 0 : index
    %c0_0 = arith.constant 0 : index
    %0 = vector.load %arg1[%c0, %c0_0] : memref<4x8xf32, #tpu.memory_space<vmem>>, vector<4x8xf32>
    %c0_1 = arith.constant 0 : index
    %c0_2 = arith.constant 0 : index
    %c0_3 = arith.constant 0 : index
    %1 = vector.load %arg2[%c0_1, %c0_2, %c0_3] : memref<4x2x8xf32, #tpu.memory_space<vmem>>, vector<4x2x8xf32>
    %c0_4 = arith.constant 0 : index
    %c0_5 = arith.constant 0 : index
    %c0_6 = arith.constant 0 : index
    %2 = vector.load %arg4[%c0_4, %c0_5, %c0_6] : memref<4x2x3xf32, #tpu.memory_space<vmem>>, vector<4x2x3xf32>
    %c0_7 = arith.constant 0 : index
    %c0_8 = arith.constant 0 : index
    %c0_9 = arith.constant 0 : index
    %3 = vector.load %arg3[%c0_7, %c0_8, %c0_9] : memref<4x3x32xbf16, #tpu.memory_space<vmem>>, vector<4x3x32xbf16>
    %c0_10 = arith.constant 0 : index
    %c0_11 = arith.constant 0 : index
    %c0_12 = arith.constant 0 : index
    %4 = vector.load %arg5[%c0_10, %c0_11, %c0_12] : memref<2x8x8xbf16, #tpu.memory_space<vmem>>, vector<2x8x8xbf16>
    %c0_13 = arith.constant 0 : index
    %c0_14 = arith.constant 0 : index
    %c0_15 = arith.constant 0 : index
    %5 = vector.load %arg6[%c0_13, %c0_14, %c0_15] : memref<2x1x8xf32, #tpu.memory_space<vmem>>, vector<2x1x8xf32>
    %6 = tpu.iota {dimensions = array<i32: 2>} : vector<1x1x8xi32>
    %7 = vector.extract_strided_slice %1 {offsets = [0, 0, 0], sizes = [4, 1, 8], strides = [1, 1, 1]} : vector<4x2x8xf32> to vector<4x1x8xf32>
    %8 = vector.shape_cast %7 : vector<4x1x8xf32> to vector<4x8xf32>
    %9 = vector.extract_strided_slice %2 {offsets = [0, 0, 0], sizes = [4, 1, 3], strides = [1, 1, 1]} : vector<4x2x3xf32> to vector<4x1x3xf32>
    %10 = vector.shape_cast %9 : vector<4x1x3xf32> to vector<4x3xf32>
    %cst = arith.constant 0.000000e+00 : f32
    %11 = vector.broadcast %cst : f32 to vector<4x3xf32>
    %12 = arith.cmpf ogt, %10, %11 : vector<4x3xf32>
    %13 = vector.extract_strided_slice %3 {offsets = [0, 0, 0], sizes = [4, 3, 8], strides = [1, 1, 1]} : vector<4x3x32xbf16> to vector<4x3x8xbf16>
    %14 = arith.extf %13 : vector<4x3x8xbf16> to vector<4x3x8xf32>
    %15 = vector.extract_strided_slice %3 {offsets = [0, 0, 16], sizes = [4, 3, 8], strides = [1, 1, 1]} : vector<4x3x32xbf16> to vector<4x3x8xbf16>
    %16 = arith.extf %15 : vector<4x3x8xbf16> to vector<4x3x8xf32>
    %17 = vector.shape_cast %8 : vector<4x8xf32> to vector<4x1x8xf32>
    %18 = vector.broadcast %17 : vector<4x1x8xf32> to vector<4x3x8xf32>
    %19 = arith.mulf %18, %14 : vector<4x3x8xf32>
    %cst_16 = arith.constant 0.000000e+00 : f32
    %20 = vector.broadcast %cst_16 : f32 to vector<4x3x8xf32>
    %c0_i32 = arith.constant 0 : i32
    %21 = vector.broadcast %c0_i32 : i32 to vector<1x1x8xi32>
    %22 = arith.cmpi sge, %6, %21 : vector<1x1x8xi32>
    %c4_i32 = arith.constant 4 : i32
    %23 = vector.broadcast %c4_i32 : i32 to vector<1x1x8xi32>
    %24 = arith.cmpi slt, %6, %23 : vector<1x1x8xi32>
    %25 = arith.andi %22, %24 : vector<1x1x8xi1>
    %cst_17 = arith.constant 0.000000e+00 : f32
    %26 = vector.shape_cast %25 : vector<1x1x8xi1> to vector<1x1x8xi1>
    %27 = vector.broadcast %26 : vector<1x1x8xi1> to vector<4x3x8xi1>
    %28 = vector.broadcast %cst_17 : f32 to vector<4x3x8xf32>
    %29 = arith.select %27, %19, %28 : vector<4x3x8xi1>, vector<4x3x8xf32>
    %cst_18 = arith.constant dense<0.000000e+00> : vector<4x3xf32>
    %30 = vector.multi_reduction <add>, %29, %cst_18 [2] : vector<4x3x8xf32> to vector<4x3xf32>
    %cst_19 = arith.constant 5.000000e-01 : f32
    %31 = vector.broadcast %cst_19 : f32 to vector<4x3xf32>
    %32 = arith.mulf %30, %31 : vector<4x3xf32>
    %cst_20 = arith.constant -1.000000e+09 : f32
    %33 = vector.broadcast %cst_20 : f32 to vector<4x3xf32>
    %34 = arith.select %12, %32, %33 : vector<4x3xi1>, vector<4x3xf32>
    %cst_21 = arith.constant dense<0xFF800000> : vector<4xf32>
    %35 = vector.multi_reduction <maximumf>, %34, %cst_21 [1] : vector<4x3xf32> to vector<4xf32>
    %36 = vector.shape_cast %35 : vector<4xf32> to vector<4x1xf32>
    %37 = vector.broadcast %36 : vector<4x1xf32> to vector<4x3xf32>
    %38 = arith.subf %34, %37 : vector<4x3xf32>
    %39 = math.exp %38 : vector<4x3xf32>
    %cst_22 = arith.constant dense<0.000000e+00> : vector<4xf32>
    %40 = vector.multi_reduction <add>, %39, %cst_22 [1] : vector<4x3xf32> to vector<4xf32>
    %41 = vector.shape_cast %40 : vector<4xf32> to vector<4x1xf32>
    %42 = vector.broadcast %41 : vector<4x1xf32> to vector<4x3xf32>
    %43 = arith.divf %39, %42 : vector<4x3xf32>
    %44 = vector.shape_cast %43 : vector<4x3xf32> to vector<4x3x1xf32>
    %cst_23 = arith.constant 0.000000e+00 : f32
    %45 = vector.shape_cast %25 : vector<1x1x8xi1> to vector<1x1x8xi1>
    %46 = vector.broadcast %45 : vector<1x1x8xi1> to vector<4x3x8xi1>
    %47 = vector.shape_cast %44 : vector<4x3x1xf32> to vector<4x3x1xf32>
    %48 = vector.broadcast %47 : vector<4x3x1xf32> to vector<4x3x8xf32>
    %49 = vector.broadcast %cst_23 : f32 to vector<4x3x8xf32>
    %50 = arith.select %46, %48, %49 : vector<4x3x8xi1>, vector<4x3x8xf32>
    %51 = arith.addf %20, %50 : vector<4x3x8xf32>
    %c4_i32_24 = arith.constant 4 : i32
    %52 = vector.broadcast %c4_i32_24 : i32 to vector<1x1x8xi32>
    %53 = arith.cmpi sge, %6, %52 : vector<1x1x8xi32>
    %c8_i32 = arith.constant 8 : i32
    %54 = vector.broadcast %c8_i32 : i32 to vector<1x1x8xi32>
    %55 = arith.cmpi slt, %6, %54 : vector<1x1x8xi32>
    %56 = arith.andi %53, %55 : vector<1x1x8xi1>
    %cst_25 = arith.constant 0.000000e+00 : f32
    %57 = vector.shape_cast %56 : vector<1x1x8xi1> to vector<1x1x8xi1>
    %58 = vector.broadcast %57 : vector<1x1x8xi1> to vector<4x3x8xi1>
    %59 = vector.broadcast %cst_25 : f32 to vector<4x3x8xf32>
    %60 = arith.select %58, %19, %59 : vector<4x3x8xi1>, vector<4x3x8xf32>
    %cst_26 = arith.constant dense<0.000000e+00> : vector<4x3xf32>
    %61 = vector.multi_reduction <add>, %60, %cst_26 [2] : vector<4x3x8xf32> to vector<4x3xf32>
    %cst_27 = arith.constant 5.000000e-01 : f32
    %62 = vector.broadcast %cst_27 : f32 to vector<4x3xf32>
    %63 = arith.mulf %61, %62 : vector<4x3xf32>
    %cst_28 = arith.constant -1.000000e+09 : f32
    %64 = vector.broadcast %cst_28 : f32 to vector<4x3xf32>
    %65 = arith.select %12, %63, %64 : vector<4x3xi1>, vector<4x3xf32>
    %cst_29 = arith.constant dense<0xFF800000> : vector<4xf32>
    %66 = vector.multi_reduction <maximumf>, %65, %cst_29 [1] : vector<4x3xf32> to vector<4xf32>
    %67 = vector.shape_cast %66 : vector<4xf32> to vector<4x1xf32>
    %68 = vector.broadcast %67 : vector<4x1xf32> to vector<4x3xf32>
    %69 = arith.subf %65, %68 : vector<4x3xf32>
    %70 = math.exp %69 : vector<4x3xf32>
    %cst_30 = arith.constant dense<0.000000e+00> : vector<4xf32>
    %71 = vector.multi_reduction <add>, %70, %cst_30 [1] : vector<4x3xf32> to vector<4xf32>
    %72 = vector.shape_cast %71 : vector<4xf32> to vector<4x1xf32>
    %73 = vector.broadcast %72 : vector<4x1xf32> to vector<4x3xf32>
    %74 = arith.divf %70, %73 : vector<4x3xf32>
    %75 = vector.shape_cast %74 : vector<4x3xf32> to vector<4x3x1xf32>
    %cst_31 = arith.constant 0.000000e+00 : f32
    %76 = vector.shape_cast %56 : vector<1x1x8xi1> to vector<1x1x8xi1>
    %77 = vector.broadcast %76 : vector<1x1x8xi1> to vector<4x3x8xi1>
    %78 = vector.shape_cast %75 : vector<4x3x1xf32> to vector<4x3x1xf32>
    %79 = vector.broadcast %78 : vector<4x3x1xf32> to vector<4x3x8xf32>
    %80 = vector.broadcast %cst_31 : f32 to vector<4x3x8xf32>
    %81 = arith.select %77, %79, %80 : vector<4x3x8xi1>, vector<4x3x8xf32>
    %82 = arith.addf %51, %81 : vector<4x3x8xf32>
    %83 = arith.mulf %82, %16 : vector<4x3x8xf32>
    %cst_32 = arith.constant dense<0.000000e+00> : vector<4x8xf32>
    %84 = vector.multi_reduction <add>, %83, %cst_32 [1] : vector<4x3x8xf32> to vector<4x8xf32>
    %85 = arith.truncf %84 : vector<4x8xf32> to vector<4x8xbf16>
    %86 = vector.extract_strided_slice %4 {offsets = [0, 0, 0], sizes = [1, 8, 8], strides = [1, 1, 1]} : vector<2x8x8xbf16> to vector<1x8x8xbf16>
    %87 = vector.shape_cast %86 : vector<1x8x8xbf16> to vector<8x8xbf16>
    %cst_33 = arith.constant dense<0.000000e+00> : vector<4x8xf32>
    %88 = tpu.matmul %85, %87, %cst_33 {dimension_numbers = #tpu.dot_dimension_numbers<[1], [0], [0], [1], [0, 0, 1, 1], [], []>} : vector<4x8xbf16>, vector<8x8xbf16>, vector<4x8xf32> -> vector<4x8xf32>
    %89 = vector.extract_strided_slice %5 {offsets = [0, 0, 0], sizes = [1, 1, 8], strides = [1, 1, 1]} : vector<2x1x8xf32> to vector<1x1x8xf32>
    %90 = vector.shape_cast %89 : vector<1x1x8xf32> to vector<1x8xf32>
    %91 = vector.broadcast %90 : vector<1x8xf32> to vector<4x8xf32>
    %92 = arith.addf %88, %91 : vector<4x8xf32>
    %93 = arith.addf %0, %92 : vector<4x8xf32>
    %94 = vector.extract_strided_slice %1 {offsets = [0, 1, 0], sizes = [4, 1, 8], strides = [1, 1, 1]} : vector<4x2x8xf32> to vector<4x1x8xf32>
    %95 = vector.shape_cast %94 : vector<4x1x8xf32> to vector<4x8xf32>
    %96 = vector.extract_strided_slice %2 {offsets = [0, 1, 0], sizes = [4, 1, 3], strides = [1, 1, 1]} : vector<4x2x3xf32> to vector<4x1x3xf32>
    %97 = vector.shape_cast %96 : vector<4x1x3xf32> to vector<4x3xf32>
    %cst_34 = arith.constant 0.000000e+00 : f32
    %98 = vector.broadcast %cst_34 : f32 to vector<4x3xf32>
    %99 = arith.cmpf ogt, %97, %98 : vector<4x3xf32>
    %100 = vector.extract_strided_slice %3 {offsets = [0, 0, 8], sizes = [4, 3, 8], strides = [1, 1, 1]} : vector<4x3x32xbf16> to vector<4x3x8xbf16>
    %101 = arith.extf %100 : vector<4x3x8xbf16> to vector<4x3x8xf32>
    %102 = vector.extract_strided_slice %3 {offsets = [0, 0, 24], sizes = [4, 3, 8], strides = [1, 1, 1]} : vector<4x3x32xbf16> to vector<4x3x8xbf16>
    %103 = arith.extf %102 : vector<4x3x8xbf16> to vector<4x3x8xf32>
    %104 = vector.shape_cast %95 : vector<4x8xf32> to vector<4x1x8xf32>
    %105 = vector.broadcast %104 : vector<4x1x8xf32> to vector<4x3x8xf32>
    %106 = arith.mulf %105, %101 : vector<4x3x8xf32>
    %cst_35 = arith.constant 0.000000e+00 : f32
    %107 = vector.broadcast %cst_35 : f32 to vector<4x3x8xf32>
    %c0_i32_36 = arith.constant 0 : i32
    %108 = vector.broadcast %c0_i32_36 : i32 to vector<1x1x8xi32>
    %109 = arith.cmpi sge, %6, %108 : vector<1x1x8xi32>
    %c4_i32_37 = arith.constant 4 : i32
    %110 = vector.broadcast %c4_i32_37 : i32 to vector<1x1x8xi32>
    %111 = arith.cmpi slt, %6, %110 : vector<1x1x8xi32>
    %112 = arith.andi %109, %111 : vector<1x1x8xi1>
    %cst_38 = arith.constant 0.000000e+00 : f32
    %113 = vector.shape_cast %112 : vector<1x1x8xi1> to vector<1x1x8xi1>
    %114 = vector.broadcast %113 : vector<1x1x8xi1> to vector<4x3x8xi1>
    %115 = vector.broadcast %cst_38 : f32 to vector<4x3x8xf32>
    %116 = arith.select %114, %106, %115 : vector<4x3x8xi1>, vector<4x3x8xf32>
    %cst_39 = arith.constant dense<0.000000e+00> : vector<4x3xf32>
    %117 = vector.multi_reduction <add>, %116, %cst_39 [2] : vector<4x3x8xf32> to vector<4x3xf32>
    %cst_40 = arith.constant 5.000000e-01 : f32
    %118 = vector.broadcast %cst_40 : f32 to vector<4x3xf32>
    %119 = arith.mulf %117, %118 : vector<4x3xf32>
    %cst_41 = arith.constant -1.000000e+09 : f32
    %120 = vector.broadcast %cst_41 : f32 to vector<4x3xf32>
    %121 = arith.select %99, %119, %120 : vector<4x3xi1>, vector<4x3xf32>
    %cst_42 = arith.constant dense<0xFF800000> : vector<4xf32>
    %122 = vector.multi_reduction <maximumf>, %121, %cst_42 [1] : vector<4x3xf32> to vector<4xf32>
    %123 = vector.shape_cast %122 : vector<4xf32> to vector<4x1xf32>
    %124 = vector.broadcast %123 : vector<4x1xf32> to vector<4x3xf32>
    %125 = arith.subf %121, %124 : vector<4x3xf32>
    %126 = math.exp %125 : vector<4x3xf32>
    %cst_43 = arith.constant dense<0.000000e+00> : vector<4xf32>
    %127 = vector.multi_reduction <add>, %126, %cst_43 [1] : vector<4x3xf32> to vector<4xf32>
    %128 = vector.shape_cast %127 : vector<4xf32> to vector<4x1xf32>
    %129 = vector.broadcast %128 : vector<4x1xf32> to vector<4x3xf32>
    %130 = arith.divf %126, %129 : vector<4x3xf32>
    %131 = vector.shape_cast %130 : vector<4x3xf32> to vector<4x3x1xf32>
    %cst_44 = arith.constant 0.000000e+00 : f32
    %132 = vector.shape_cast %112 : vector<1x1x8xi1> to vector<1x1x8xi1>
    %133 = vector.broadcast %132 : vector<1x1x8xi1> to vector<4x3x8xi1>
    %134 = vector.shape_cast %131 : vector<4x3x1xf32> to vector<4x3x1xf32>
    %135 = vector.broadcast %134 : vector<4x3x1xf32> to vector<4x3x8xf32>
    %136 = vector.broadcast %cst_44 : f32 to vector<4x3x8xf32>
    %137 = arith.select %133, %135, %136 : vector<4x3x8xi1>, vector<4x3x8xf32>
    %138 = arith.addf %107, %137 : vector<4x3x8xf32>
    %c4_i32_45 = arith.constant 4 : i32
    %139 = vector.broadcast %c4_i32_45 : i32 to vector<1x1x8xi32>
    %140 = arith.cmpi sge, %6, %139 : vector<1x1x8xi32>
    %c8_i32_46 = arith.constant 8 : i32
    %141 = vector.broadcast %c8_i32_46 : i32 to vector<1x1x8xi32>
    %142 = arith.cmpi slt, %6, %141 : vector<1x1x8xi32>
    %143 = arith.andi %140, %142 : vector<1x1x8xi1>
    %cst_47 = arith.constant 0.000000e+00 : f32
    %144 = vector.shape_cast %143 : vector<1x1x8xi1> to vector<1x1x8xi1>
    %145 = vector.broadcast %144 : vector<1x1x8xi1> to vector<4x3x8xi1>
    %146 = vector.broadcast %cst_47 : f32 to vector<4x3x8xf32>
    %147 = arith.select %145, %106, %146 : vector<4x3x8xi1>, vector<4x3x8xf32>
    %cst_48 = arith.constant dense<0.000000e+00> : vector<4x3xf32>
    %148 = vector.multi_reduction <add>, %147, %cst_48 [2] : vector<4x3x8xf32> to vector<4x3xf32>
    %cst_49 = arith.constant 5.000000e-01 : f32
    %149 = vector.broadcast %cst_49 : f32 to vector<4x3xf32>
    %150 = arith.mulf %148, %149 : vector<4x3xf32>
    %cst_50 = arith.constant -1.000000e+09 : f32
    %151 = vector.broadcast %cst_50 : f32 to vector<4x3xf32>
    %152 = arith.select %99, %150, %151 : vector<4x3xi1>, vector<4x3xf32>
    %cst_51 = arith.constant dense<0xFF800000> : vector<4xf32>
    %153 = vector.multi_reduction <maximumf>, %152, %cst_51 [1] : vector<4x3xf32> to vector<4xf32>
    %154 = vector.shape_cast %153 : vector<4xf32> to vector<4x1xf32>
    %155 = vector.broadcast %154 : vector<4x1xf32> to vector<4x3xf32>
    %156 = arith.subf %152, %155 : vector<4x3xf32>
    %157 = math.exp %156 : vector<4x3xf32>
    %cst_52 = arith.constant dense<0.000000e+00> : vector<4xf32>
    %158 = vector.multi_reduction <add>, %157, %cst_52 [1] : vector<4x3xf32> to vector<4xf32>
    %159 = vector.shape_cast %158 : vector<4xf32> to vector<4x1xf32>
    %160 = vector.broadcast %159 : vector<4x1xf32> to vector<4x3xf32>
    %161 = arith.divf %157, %160 : vector<4x3xf32>
    %162 = vector.shape_cast %161 : vector<4x3xf32> to vector<4x3x1xf32>
    %cst_53 = arith.constant 0.000000e+00 : f32
    %163 = vector.shape_cast %143 : vector<1x1x8xi1> to vector<1x1x8xi1>
    %164 = vector.broadcast %163 : vector<1x1x8xi1> to vector<4x3x8xi1>
    %165 = vector.shape_cast %162 : vector<4x3x1xf32> to vector<4x3x1xf32>
    %166 = vector.broadcast %165 : vector<4x3x1xf32> to vector<4x3x8xf32>
    %167 = vector.broadcast %cst_53 : f32 to vector<4x3x8xf32>
    %168 = arith.select %164, %166, %167 : vector<4x3x8xi1>, vector<4x3x8xf32>
    %169 = arith.addf %138, %168 : vector<4x3x8xf32>
    %170 = arith.mulf %169, %103 : vector<4x3x8xf32>
    %cst_54 = arith.constant dense<0.000000e+00> : vector<4x8xf32>
    %171 = vector.multi_reduction <add>, %170, %cst_54 [1] : vector<4x3x8xf32> to vector<4x8xf32>
    %172 = arith.truncf %171 : vector<4x8xf32> to vector<4x8xbf16>
    %173 = vector.extract_strided_slice %4 {offsets = [1, 0, 0], sizes = [1, 8, 8], strides = [1, 1, 1]} : vector<2x8x8xbf16> to vector<1x8x8xbf16>
    %174 = vector.shape_cast %173 : vector<1x8x8xbf16> to vector<8x8xbf16>
    %cst_55 = arith.constant dense<0.000000e+00> : vector<4x8xf32>
    %175 = tpu.matmul %172, %174, %cst_55 {dimension_numbers = #tpu.dot_dimension_numbers<[1], [0], [0], [1], [0, 0, 1, 1], [], []>} : vector<4x8xbf16>, vector<8x8xbf16>, vector<4x8xf32> -> vector<4x8xf32>
    %176 = vector.extract_strided_slice %5 {offsets = [1, 0, 0], sizes = [1, 1, 8], strides = [1, 1, 1]} : vector<2x1x8xf32> to vector<1x1x8xf32>
    %177 = vector.shape_cast %176 : vector<1x1x8xf32> to vector<1x8xf32>
    %178 = vector.broadcast %177 : vector<1x8xf32> to vector<4x8xf32>
    %179 = arith.addf %175, %178 : vector<4x8xf32>
    %180 = arith.addf %93, %179 : vector<4x8xf32>
    %c0_56 = arith.constant 0 : index
    %c0_57 = arith.constant 0 : index
    %181 = vector.load %arg7[%c0_56, %c0_57] : memref<4x8xf32, #tpu.memory_space<vmem>>, vector<4x8xf32>
    tpu.vector_store %arg7[%c0_56, %c0_57], %180 {strides = array<i32>} : memref<4x8xf32, #tpu.memory_space<vmem>>, vector<4x8xf32>,
    return
  }
  func.func @transform_0(%arg0: i32) -> (i32, i32) {
    %c0_i32 = arith.constant 0 : i32
    %c0_i32_0 = arith.constant 0 : i32
    return %arg0, %c0_i32 : i32, i32
  }
  func.func @transform_1(%arg0: i32) -> (i32, i32, i32) {
    %c0_i32 = arith.constant 0 : i32
    %c0_i32_0 = arith.constant 0 : i32
    %c0_i32_1 = arith.constant 0 : i32
    return %arg0, %c0_i32, %c0_i32_0 : i32, i32, i32
  }
  func.func @transform_2(%arg0: i32) -> (i32, i32, i32) {
    %c0_i32 = arith.constant 0 : i32
    %c0_i32_0 = arith.constant 0 : i32
    %c0_i32_1 = arith.constant 0 : i32
    return %arg0, %c0_i32, %c0_i32_0 : i32, i32, i32
  }
  func.func @transform_3(%arg0: i32) -> (i32, i32, i32) {
    %c0_i32 = arith.constant 0 : i32
    %c0_i32_0 = arith.constant 0 : i32
    %c0_i32_1 = arith.constant 0 : i32
    return %arg0, %c0_i32, %c0_i32_0 : i32, i32, i32
  }
  func.func @transform_4(%arg0: i32) -> (i32, i32, i32) {
    %c0_i32 = arith.constant 0 : i32
    %c0_i32_0 = arith.constant 0 : i32
    %c0_i32_1 = arith.constant 0 : i32
    %c0_i32_2 = arith.constant 0 : i32
    return %c0_i32, %c0_i32_0, %c0_i32_1 : i32, i32, i32
  }
  func.func @transform_5(%arg0: i32) -> (i32, i32, i32) {
    %c0_i32 = arith.constant 0 : i32
    %c0_i32_0 = arith.constant 0 : i32
    %c0_i32_1 = arith.constant 0 : i32
    %c0_i32_2 = arith.constant 0 : i32
    return %c0_i32, %c0_i32_0, %c0_i32_1 : i32, i32, i32
  }
  func.func @transform_6(%arg0: i32) -> (i32, i32) {
    %c0_i32 = arith.constant 0 : i32
    %c0_i32_0 = arith.constant 0 : i32
    return %arg0, %c0_i32 : i32, i32
  }
}

module attributes {stable_mosaic.version = 11 : i64} {
  func.func @_hyper_branch_kernel(%arg0: i32, %arg1: memref<16x7xf32, #tpu.memory_space<vmem>>, %arg2: memref<7x16xbf16, #tpu.memory_space<vmem>>, %arg3: memref<1x16xf32, #tpu.memory_space<vmem>>, %arg4: memref<16x112xbf16, #tpu.memory_space<vmem>>, %arg5: memref<1x112xf32, #tpu.memory_space<vmem>>, %arg6: memref<16x32xbf16, #tpu.memory_space<vmem>>, %arg7: memref<1x32xf32, #tpu.memory_space<vmem>>, %arg8: memref<16x32xbf16, #tpu.memory_space<vmem>>, %arg9: memref<16x1xf32, #tpu.memory_space<vmem>>) attributes {dimension_semantics = [#tpu.dimension_semantics<parallel>], iteration_bounds = array<i64: 1>, scalar_prefetch = 0 : i64, scratch_operands = 0 : i64, tpu.core_type = #tpu.core_type<tc>, window_params = [{transform_indices = @transform_0, window_bounds = array<i64: 16, 7>}, {pipeline_mode = #tpu.pipeline_mode<synchronous>, transform_indices = @transform_1, window_bounds = array<i64: 7, 16>}, {pipeline_mode = #tpu.pipeline_mode<synchronous>, transform_indices = @transform_2, window_bounds = array<i64: 1, 16>}, {pipeline_mode = #tpu.pipeline_mode<synchronous>, transform_indices = @transform_3, window_bounds = array<i64: 16, 112>}, {pipeline_mode = #tpu.pipeline_mode<synchronous>, transform_indices = @transform_4, window_bounds = array<i64: 1, 112>}, {pipeline_mode = #tpu.pipeline_mode<synchronous>, transform_indices = @transform_5, window_bounds = array<i64: 16, 32>}, {pipeline_mode = #tpu.pipeline_mode<synchronous>, transform_indices = @transform_6, window_bounds = array<i64: 1, 32>}, {transform_indices = @transform_7, window_bounds = array<i64: 16, 32>}, {transform_indices = @transform_8, window_bounds = array<i64: 16, 1>}]} {
    %c0 = arith.constant 0 : index
    %c0_0 = arith.constant 0 : index
    %0 = vector.load %arg1[%c0, %c0_0] : memref<16x7xf32, #tpu.memory_space<vmem>>, vector<16x7xf32>
    %1 = arith.truncf %0 : vector<16x7xf32> to vector<16x7xbf16>
    %c0_1 = arith.constant 0 : index
    %c0_2 = arith.constant 0 : index
    %2 = vector.load %arg2[%c0_1, %c0_2] : memref<7x16xbf16, #tpu.memory_space<vmem>>, vector<7x16xbf16>
    %cst = arith.constant dense<0.000000e+00> : vector<16x16xf32>
    %3 = tpu.matmul %1, %2, %cst {dimension_numbers = #tpu.dot_dimension_numbers<[1], [0], [0], [1], [0, 0, 1, 1], [], []>} : vector<16x7xbf16>, vector<7x16xbf16>, vector<16x16xf32> -> vector<16x16xf32>
    %c0_3 = arith.constant 0 : index
    %c0_4 = arith.constant 0 : index
    %4 = vector.load %arg3[%c0_3, %c0_4] : memref<1x16xf32, #tpu.memory_space<vmem>>, vector<1x16xf32>
    %5 = vector.broadcast %4 : vector<1x16xf32> to vector<16x16xf32>
    %6 = arith.addf %3, %5 : vector<16x16xf32>
    %cst_5 = arith.constant 0.000000e+00 : f32
    %7 = vector.broadcast %cst_5 : f32 to vector<16x16xf32>
    %8 = arith.maximumf %6, %7 : vector<16x16xf32>
    %9 = arith.truncf %8 : vector<16x16xf32> to vector<16x16xbf16>
    %c0_6 = arith.constant 0 : index
    %c0_7 = arith.constant 0 : index
    %10 = vector.load %arg4[%c0_6, %c0_7] : memref<16x112xbf16, #tpu.memory_space<vmem>>, vector<16x112xbf16>
    %cst_8 = arith.constant dense<0.000000e+00> : vector<16x112xf32>
    %11 = tpu.matmul %9, %10, %cst_8 {dimension_numbers = #tpu.dot_dimension_numbers<[1], [0], [0], [1], [0, 0, 1, 1], [], []>} : vector<16x16xbf16>, vector<16x112xbf16>, vector<16x112xf32> -> vector<16x112xf32>
    %c0_9 = arith.constant 0 : index
    %c0_10 = arith.constant 0 : index
    %12 = vector.load %arg5[%c0_9, %c0_10] : memref<1x112xf32, #tpu.memory_space<vmem>>, vector<1x112xf32>
    %13 = vector.broadcast %12 : vector<1x112xf32> to vector<16x112xf32>
    %14 = arith.addf %11, %13 : vector<16x112xf32>
    %15 = vector.extract_strided_slice %0 {offsets = [0, 0], sizes = [16, 1], strides = [1, 1]} : vector<16x7xf32> to vector<16x1xf32>
    %16 = vector.extract_strided_slice %14 {offsets = [0, 0], sizes = [16, 16], strides = [1, 1]} : vector<16x112xf32> to vector<16x16xf32>
    %17 = vector.broadcast %15 : vector<16x1xf32> to vector<16x16xf32>
    %18 = arith.mulf %17, %16 : vector<16x16xf32>
    %19 = vector.extract_strided_slice %0 {offsets = [0, 1], sizes = [16, 1], strides = [1, 1]} : vector<16x7xf32> to vector<16x1xf32>
    %20 = vector.extract_strided_slice %14 {offsets = [0, 16], sizes = [16, 16], strides = [1, 1]} : vector<16x112xf32> to vector<16x16xf32>
    %21 = vector.broadcast %19 : vector<16x1xf32> to vector<16x16xf32>
    %22 = arith.mulf %21, %20 : vector<16x16xf32>
    %23 = arith.addf %18, %22 : vector<16x16xf32>
    %24 = vector.extract_strided_slice %0 {offsets = [0, 2], sizes = [16, 1], strides = [1, 1]} : vector<16x7xf32> to vector<16x1xf32>
    %25 = vector.extract_strided_slice %14 {offsets = [0, 32], sizes = [16, 16], strides = [1, 1]} : vector<16x112xf32> to vector<16x16xf32>
    %26 = vector.broadcast %24 : vector<16x1xf32> to vector<16x16xf32>
    %27 = arith.mulf %26, %25 : vector<16x16xf32>
    %28 = arith.addf %23, %27 : vector<16x16xf32>
    %29 = vector.extract_strided_slice %0 {offsets = [0, 3], sizes = [16, 1], strides = [1, 1]} : vector<16x7xf32> to vector<16x1xf32>
    %30 = vector.extract_strided_slice %14 {offsets = [0, 48], sizes = [16, 16], strides = [1, 1]} : vector<16x112xf32> to vector<16x16xf32>
    %31 = vector.broadcast %29 : vector<16x1xf32> to vector<16x16xf32>
    %32 = arith.mulf %31, %30 : vector<16x16xf32>
    %33 = arith.addf %28, %32 : vector<16x16xf32>
    %34 = vector.extract_strided_slice %0 {offsets = [0, 4], sizes = [16, 1], strides = [1, 1]} : vector<16x7xf32> to vector<16x1xf32>
    %35 = vector.extract_strided_slice %14 {offsets = [0, 64], sizes = [16, 16], strides = [1, 1]} : vector<16x112xf32> to vector<16x16xf32>
    %36 = vector.broadcast %34 : vector<16x1xf32> to vector<16x16xf32>
    %37 = arith.mulf %36, %35 : vector<16x16xf32>
    %38 = arith.addf %33, %37 : vector<16x16xf32>
    %39 = vector.extract_strided_slice %0 {offsets = [0, 5], sizes = [16, 1], strides = [1, 1]} : vector<16x7xf32> to vector<16x1xf32>
    %40 = vector.extract_strided_slice %14 {offsets = [0, 80], sizes = [16, 16], strides = [1, 1]} : vector<16x112xf32> to vector<16x16xf32>
    %41 = vector.broadcast %39 : vector<16x1xf32> to vector<16x16xf32>
    %42 = arith.mulf %41, %40 : vector<16x16xf32>
    %43 = arith.addf %38, %42 : vector<16x16xf32>
    %44 = vector.extract_strided_slice %0 {offsets = [0, 6], sizes = [16, 1], strides = [1, 1]} : vector<16x7xf32> to vector<16x1xf32>
    %45 = vector.extract_strided_slice %14 {offsets = [0, 96], sizes = [16, 16], strides = [1, 1]} : vector<16x112xf32> to vector<16x16xf32>
    %46 = vector.broadcast %44 : vector<16x1xf32> to vector<16x16xf32>
    %47 = arith.mulf %46, %45 : vector<16x16xf32>
    %48 = arith.addf %43, %47 : vector<16x16xf32>
    %49 = arith.truncf %48 : vector<16x16xf32> to vector<16x16xbf16>
    %c0_11 = arith.constant 0 : index
    %c0_12 = arith.constant 0 : index
    %50 = vector.load %arg6[%c0_11, %c0_12] : memref<16x32xbf16, #tpu.memory_space<vmem>>, vector<16x32xbf16>
    %cst_13 = arith.constant dense<0.000000e+00> : vector<16x32xf32>
    %51 = tpu.matmul %49, %50, %cst_13 {dimension_numbers = #tpu.dot_dimension_numbers<[1], [0], [0], [1], [0, 0, 1, 1], [], []>} : vector<16x16xbf16>, vector<16x32xbf16>, vector<16x32xf32> -> vector<16x32xf32>
    %c0_14 = arith.constant 0 : index
    %c0_15 = arith.constant 0 : index
    %52 = vector.load %arg7[%c0_14, %c0_15] : memref<1x32xf32, #tpu.memory_space<vmem>>, vector<1x32xf32>
    %53 = vector.broadcast %52 : vector<1x32xf32> to vector<16x32xf32>
    %54 = arith.addf %51, %53 : vector<16x32xf32>
    %55 = arith.truncf %54 : vector<16x32xf32> to vector<16x32xbf16>
    %c0_16 = arith.constant 0 : index
    %c0_17 = arith.constant 0 : index
    %56 = vector.load %arg8[%c0_16, %c0_17] : memref<16x32xbf16, #tpu.memory_space<vmem>>, vector<16x32xbf16>
    tpu.vector_store %arg8[%c0_16, %c0_17], %55 {strides = array<i32>} : memref<16x32xbf16, #tpu.memory_space<vmem>>, vector<16x32xbf16>,
    %57 = math.absf %0 : vector<16x7xf32>
    %cst_18 = arith.constant dense<0.000000e+00> : vector<16xf32>
    %58 = vector.multi_reduction <add>, %57, %cst_18 [1] : vector<16x7xf32> to vector<16xf32>
    %59 = vector.shape_cast %58 : vector<16xf32> to vector<16x1xf32>
    %cst_19 = arith.constant 0.000000e+00 : f32
    %60 = vector.broadcast %cst_19 : f32 to vector<16x1xf32>
    %61 = arith.cmpf one, %59, %60 : vector<16x1xf32>
    %62 = arith.extui %61 : vector<16x1xi1> to vector<16x1xi32>
    %63 = arith.sitofp %62 : vector<16x1xi32> to vector<16x1xf32>
    %c0_20 = arith.constant 0 : index
    %c0_21 = arith.constant 0 : index
    %64 = vector.load %arg9[%c0_20, %c0_21] : memref<16x1xf32, #tpu.memory_space<vmem>>, vector<16x1xf32>
    tpu.vector_store %arg9[%c0_20, %c0_21], %63 {strides = array<i32>} : memref<16x1xf32, #tpu.memory_space<vmem>>, vector<16x1xf32>,
    return
  }
  func.func @transform_0(%arg0: i32) -> (i32, i32) {
    %c0_i32 = arith.constant 0 : i32
    %c0_i32_0 = arith.constant 0 : i32
    return %arg0, %c0_i32 : i32, i32
  }
  func.func @transform_1(%arg0: i32) -> (i32, i32) {
    %c0_i32 = arith.constant 0 : i32
    %c0_i32_0 = arith.constant 0 : i32
    %c0_i32_1 = arith.constant 0 : i32
    return %c0_i32, %c0_i32_0 : i32, i32
  }
  func.func @transform_2(%arg0: i32) -> (i32, i32) {
    %c0_i32 = arith.constant 0 : i32
    %c0_i32_0 = arith.constant 0 : i32
    %c0_i32_1 = arith.constant 0 : i32
    return %c0_i32, %c0_i32_0 : i32, i32
  }
  func.func @transform_3(%arg0: i32) -> (i32, i32) {
    %c0_i32 = arith.constant 0 : i32
    %c0_i32_0 = arith.constant 0 : i32
    %c0_i32_1 = arith.constant 0 : i32
    return %c0_i32, %c0_i32_0 : i32, i32
  }
  func.func @transform_4(%arg0: i32) -> (i32, i32) {
    %c0_i32 = arith.constant 0 : i32
    %c0_i32_0 = arith.constant 0 : i32
    %c0_i32_1 = arith.constant 0 : i32
    return %c0_i32, %c0_i32_0 : i32, i32
  }
  func.func @transform_5(%arg0: i32) -> (i32, i32) {
    %c0_i32 = arith.constant 0 : i32
    %c0_i32_0 = arith.constant 0 : i32
    %c0_i32_1 = arith.constant 0 : i32
    return %c0_i32, %c0_i32_0 : i32, i32
  }
  func.func @transform_6(%arg0: i32) -> (i32, i32) {
    %c0_i32 = arith.constant 0 : i32
    %c0_i32_0 = arith.constant 0 : i32
    %c0_i32_1 = arith.constant 0 : i32
    return %c0_i32, %c0_i32_0 : i32, i32
  }
  func.func @transform_7(%arg0: i32) -> (i32, i32) {
    %c0_i32 = arith.constant 0 : i32
    %c0_i32_0 = arith.constant 0 : i32
    return %arg0, %c0_i32 : i32, i32
  }
  func.func @transform_8(%arg0: i32) -> (i32, i32) {
    %c0_i32 = arith.constant 0 : i32
    %c0_i32_0 = arith.constant 0 : i32
    return %arg0, %c0_i32 : i32, i32
  }
}

module attributes {stable_mosaic.version = 11 : i64} {
  func.func @_branch_attn_kernel(%arg0: i32, %arg1: memref<4x8xf32, #tpu.memory_space<vmem>>, %arg2: memref<4x2x8xf32, #tpu.memory_space<vmem>>, %arg3: memref<4x4x32xbf16, #tpu.memory_space<vmem>>, %arg4: memref<4x2x4xf32, #tpu.memory_space<vmem>>, %arg5: memref<2x8x8xbf16, #tpu.memory_space<vmem>>, %arg6: memref<2x1x8xf32, #tpu.memory_space<vmem>>, %arg7: memref<4x8xf32, #tpu.memory_space<vmem>>) attributes {dimension_semantics = [#tpu.dimension_semantics<parallel>], iteration_bounds = array<i64: 1>, scalar_prefetch = 0 : i64, scratch_operands = 0 : i64, tpu.core_type = #tpu.core_type<tc>, window_params = [{transform_indices = @transform_0, window_bounds = array<i64: 4, 8>}, {transform_indices = @transform_1, window_bounds = array<i64: 4, 2, 8>}, {transform_indices = @transform_2, window_bounds = array<i64: 4, 4, 32>}, {transform_indices = @transform_3, window_bounds = array<i64: 4, 2, 4>}, {pipeline_mode = #tpu.pipeline_mode<synchronous>, transform_indices = @transform_4, window_bounds = array<i64: 2, 8, 8>}, {pipeline_mode = #tpu.pipeline_mode<synchronous>, transform_indices = @transform_5, window_bounds = array<i64: 2, 1, 8>}, {transform_indices = @transform_6, window_bounds = array<i64: 4, 8>}]} {
    %c0 = arith.constant 0 : index
    %c0_0 = arith.constant 0 : index
    %0 = vector.load %arg1[%c0, %c0_0] : memref<4x8xf32, #tpu.memory_space<vmem>>, vector<4x8xf32>
    %c0_1 = arith.constant 0 : index
    %c0_2 = arith.constant 0 : index
    %c0_3 = arith.constant 0 : index
    %1 = vector.load %arg2[%c0_1, %c0_2, %c0_3] : memref<4x2x8xf32, #tpu.memory_space<vmem>>, vector<4x2x8xf32>
    %c0_4 = arith.constant 0 : index
    %c0_5 = arith.constant 0 : index
    %c0_6 = arith.constant 0 : index
    %2 = vector.load %arg4[%c0_4, %c0_5, %c0_6] : memref<4x2x4xf32, #tpu.memory_space<vmem>>, vector<4x2x4xf32>
    %c0_7 = arith.constant 0 : index
    %c0_8 = arith.constant 0 : index
    %c0_9 = arith.constant 0 : index
    %3 = vector.load %arg3[%c0_7, %c0_8, %c0_9] : memref<4x4x32xbf16, #tpu.memory_space<vmem>>, vector<4x4x32xbf16>
    %c0_10 = arith.constant 0 : index
    %c0_11 = arith.constant 0 : index
    %c0_12 = arith.constant 0 : index
    %4 = vector.load %arg5[%c0_10, %c0_11, %c0_12] : memref<2x8x8xbf16, #tpu.memory_space<vmem>>, vector<2x8x8xbf16>
    %c0_13 = arith.constant 0 : index
    %c0_14 = arith.constant 0 : index
    %c0_15 = arith.constant 0 : index
    %5 = vector.load %arg6[%c0_13, %c0_14, %c0_15] : memref<2x1x8xf32, #tpu.memory_space<vmem>>, vector<2x1x8xf32>
    %6 = tpu.iota {dimensions = array<i32: 2>} : vector<1x1x8xi32>
    %7 = vector.extract_strided_slice %1 {offsets = [0, 0, 0], sizes = [4, 1, 8], strides = [1, 1, 1]} : vector<4x2x8xf32> to vector<4x1x8xf32>
    %8 = vector.shape_cast %7 : vector<4x1x8xf32> to vector<4x8xf32>
    %9 = vector.extract_strided_slice %2 {offsets = [0, 0, 0], sizes = [4, 1, 4], strides = [1, 1, 1]} : vector<4x2x4xf32> to vector<4x1x4xf32>
    %10 = vector.shape_cast %9 : vector<4x1x4xf32> to vector<4x4xf32>
    %cst = arith.constant 0.000000e+00 : f32
    %11 = vector.broadcast %cst : f32 to vector<4x4xf32>
    %12 = arith.cmpf ogt, %10, %11 : vector<4x4xf32>
    %13 = vector.extract_strided_slice %3 {offsets = [0, 0, 0], sizes = [4, 4, 8], strides = [1, 1, 1]} : vector<4x4x32xbf16> to vector<4x4x8xbf16>
    %14 = arith.extf %13 : vector<4x4x8xbf16> to vector<4x4x8xf32>
    %15 = vector.extract_strided_slice %3 {offsets = [0, 0, 16], sizes = [4, 4, 8], strides = [1, 1, 1]} : vector<4x4x32xbf16> to vector<4x4x8xbf16>
    %16 = arith.extf %15 : vector<4x4x8xbf16> to vector<4x4x8xf32>
    %17 = vector.shape_cast %8 : vector<4x8xf32> to vector<4x1x8xf32>
    %18 = vector.broadcast %17 : vector<4x1x8xf32> to vector<4x4x8xf32>
    %19 = arith.mulf %18, %14 : vector<4x4x8xf32>
    %cst_16 = arith.constant 0.000000e+00 : f32
    %20 = vector.broadcast %cst_16 : f32 to vector<4x4x8xf32>
    %c0_i32 = arith.constant 0 : i32
    %21 = vector.broadcast %c0_i32 : i32 to vector<1x1x8xi32>
    %22 = arith.cmpi sge, %6, %21 : vector<1x1x8xi32>
    %c4_i32 = arith.constant 4 : i32
    %23 = vector.broadcast %c4_i32 : i32 to vector<1x1x8xi32>
    %24 = arith.cmpi slt, %6, %23 : vector<1x1x8xi32>
    %25 = arith.andi %22, %24 : vector<1x1x8xi1>
    %cst_17 = arith.constant 0.000000e+00 : f32
    %26 = vector.shape_cast %25 : vector<1x1x8xi1> to vector<1x1x8xi1>
    %27 = vector.broadcast %26 : vector<1x1x8xi1> to vector<4x4x8xi1>
    %28 = vector.broadcast %cst_17 : f32 to vector<4x4x8xf32>
    %29 = arith.select %27, %19, %28 : vector<4x4x8xi1>, vector<4x4x8xf32>
    %cst_18 = arith.constant dense<0.000000e+00> : vector<4x4xf32>
    %30 = vector.multi_reduction <add>, %29, %cst_18 [2] : vector<4x4x8xf32> to vector<4x4xf32>
    %cst_19 = arith.constant 5.000000e-01 : f32
    %31 = vector.broadcast %cst_19 : f32 to vector<4x4xf32>
    %32 = arith.mulf %30, %31 : vector<4x4xf32>
    %cst_20 = arith.constant -1.000000e+09 : f32
    %33 = vector.broadcast %cst_20 : f32 to vector<4x4xf32>
    %34 = arith.select %12, %32, %33 : vector<4x4xi1>, vector<4x4xf32>
    %cst_21 = arith.constant dense<0xFF800000> : vector<4xf32>
    %35 = vector.multi_reduction <maximumf>, %34, %cst_21 [1] : vector<4x4xf32> to vector<4xf32>
    %36 = vector.shape_cast %35 : vector<4xf32> to vector<4x1xf32>
    %37 = vector.broadcast %36 : vector<4x1xf32> to vector<4x4xf32>
    %38 = arith.subf %34, %37 : vector<4x4xf32>
    %39 = math.exp %38 : vector<4x4xf32>
    %cst_22 = arith.constant dense<0.000000e+00> : vector<4xf32>
    %40 = vector.multi_reduction <add>, %39, %cst_22 [1] : vector<4x4xf32> to vector<4xf32>
    %41 = vector.shape_cast %40 : vector<4xf32> to vector<4x1xf32>
    %42 = vector.broadcast %41 : vector<4x1xf32> to vector<4x4xf32>
    %43 = arith.divf %39, %42 : vector<4x4xf32>
    %44 = vector.shape_cast %43 : vector<4x4xf32> to vector<4x4x1xf32>
    %cst_23 = arith.constant 0.000000e+00 : f32
    %45 = vector.shape_cast %25 : vector<1x1x8xi1> to vector<1x1x8xi1>
    %46 = vector.broadcast %45 : vector<1x1x8xi1> to vector<4x4x8xi1>
    %47 = vector.shape_cast %44 : vector<4x4x1xf32> to vector<4x4x1xf32>
    %48 = vector.broadcast %47 : vector<4x4x1xf32> to vector<4x4x8xf32>
    %49 = vector.broadcast %cst_23 : f32 to vector<4x4x8xf32>
    %50 = arith.select %46, %48, %49 : vector<4x4x8xi1>, vector<4x4x8xf32>
    %51 = arith.addf %20, %50 : vector<4x4x8xf32>
    %c4_i32_24 = arith.constant 4 : i32
    %52 = vector.broadcast %c4_i32_24 : i32 to vector<1x1x8xi32>
    %53 = arith.cmpi sge, %6, %52 : vector<1x1x8xi32>
    %c8_i32 = arith.constant 8 : i32
    %54 = vector.broadcast %c8_i32 : i32 to vector<1x1x8xi32>
    %55 = arith.cmpi slt, %6, %54 : vector<1x1x8xi32>
    %56 = arith.andi %53, %55 : vector<1x1x8xi1>
    %cst_25 = arith.constant 0.000000e+00 : f32
    %57 = vector.shape_cast %56 : vector<1x1x8xi1> to vector<1x1x8xi1>
    %58 = vector.broadcast %57 : vector<1x1x8xi1> to vector<4x4x8xi1>
    %59 = vector.broadcast %cst_25 : f32 to vector<4x4x8xf32>
    %60 = arith.select %58, %19, %59 : vector<4x4x8xi1>, vector<4x4x8xf32>
    %cst_26 = arith.constant dense<0.000000e+00> : vector<4x4xf32>
    %61 = vector.multi_reduction <add>, %60, %cst_26 [2] : vector<4x4x8xf32> to vector<4x4xf32>
    %cst_27 = arith.constant 5.000000e-01 : f32
    %62 = vector.broadcast %cst_27 : f32 to vector<4x4xf32>
    %63 = arith.mulf %61, %62 : vector<4x4xf32>
    %cst_28 = arith.constant -1.000000e+09 : f32
    %64 = vector.broadcast %cst_28 : f32 to vector<4x4xf32>
    %65 = arith.select %12, %63, %64 : vector<4x4xi1>, vector<4x4xf32>
    %cst_29 = arith.constant dense<0xFF800000> : vector<4xf32>
    %66 = vector.multi_reduction <maximumf>, %65, %cst_29 [1] : vector<4x4xf32> to vector<4xf32>
    %67 = vector.shape_cast %66 : vector<4xf32> to vector<4x1xf32>
    %68 = vector.broadcast %67 : vector<4x1xf32> to vector<4x4xf32>
    %69 = arith.subf %65, %68 : vector<4x4xf32>
    %70 = math.exp %69 : vector<4x4xf32>
    %cst_30 = arith.constant dense<0.000000e+00> : vector<4xf32>
    %71 = vector.multi_reduction <add>, %70, %cst_30 [1] : vector<4x4xf32> to vector<4xf32>
    %72 = vector.shape_cast %71 : vector<4xf32> to vector<4x1xf32>
    %73 = vector.broadcast %72 : vector<4x1xf32> to vector<4x4xf32>
    %74 = arith.divf %70, %73 : vector<4x4xf32>
    %75 = vector.shape_cast %74 : vector<4x4xf32> to vector<4x4x1xf32>
    %cst_31 = arith.constant 0.000000e+00 : f32
    %76 = vector.shape_cast %56 : vector<1x1x8xi1> to vector<1x1x8xi1>
    %77 = vector.broadcast %76 : vector<1x1x8xi1> to vector<4x4x8xi1>
    %78 = vector.shape_cast %75 : vector<4x4x1xf32> to vector<4x4x1xf32>
    %79 = vector.broadcast %78 : vector<4x4x1xf32> to vector<4x4x8xf32>
    %80 = vector.broadcast %cst_31 : f32 to vector<4x4x8xf32>
    %81 = arith.select %77, %79, %80 : vector<4x4x8xi1>, vector<4x4x8xf32>
    %82 = arith.addf %51, %81 : vector<4x4x8xf32>
    %83 = arith.mulf %82, %16 : vector<4x4x8xf32>
    %cst_32 = arith.constant dense<0.000000e+00> : vector<4x8xf32>
    %84 = vector.multi_reduction <add>, %83, %cst_32 [1] : vector<4x4x8xf32> to vector<4x8xf32>
    %85 = arith.truncf %84 : vector<4x8xf32> to vector<4x8xbf16>
    %86 = vector.extract_strided_slice %4 {offsets = [0, 0, 0], sizes = [1, 8, 8], strides = [1, 1, 1]} : vector<2x8x8xbf16> to vector<1x8x8xbf16>
    %87 = vector.shape_cast %86 : vector<1x8x8xbf16> to vector<8x8xbf16>
    %cst_33 = arith.constant dense<0.000000e+00> : vector<4x8xf32>
    %88 = tpu.matmul %85, %87, %cst_33 {dimension_numbers = #tpu.dot_dimension_numbers<[1], [0], [0], [1], [0, 0, 1, 1], [], []>} : vector<4x8xbf16>, vector<8x8xbf16>, vector<4x8xf32> -> vector<4x8xf32>
    %89 = vector.extract_strided_slice %5 {offsets = [0, 0, 0], sizes = [1, 1, 8], strides = [1, 1, 1]} : vector<2x1x8xf32> to vector<1x1x8xf32>
    %90 = vector.shape_cast %89 : vector<1x1x8xf32> to vector<1x8xf32>
    %91 = vector.broadcast %90 : vector<1x8xf32> to vector<4x8xf32>
    %92 = arith.addf %88, %91 : vector<4x8xf32>
    %93 = arith.addf %0, %92 : vector<4x8xf32>
    %94 = vector.extract_strided_slice %1 {offsets = [0, 1, 0], sizes = [4, 1, 8], strides = [1, 1, 1]} : vector<4x2x8xf32> to vector<4x1x8xf32>
    %95 = vector.shape_cast %94 : vector<4x1x8xf32> to vector<4x8xf32>
    %96 = vector.extract_strided_slice %2 {offsets = [0, 1, 0], sizes = [4, 1, 4], strides = [1, 1, 1]} : vector<4x2x4xf32> to vector<4x1x4xf32>
    %97 = vector.shape_cast %96 : vector<4x1x4xf32> to vector<4x4xf32>
    %cst_34 = arith.constant 0.000000e+00 : f32
    %98 = vector.broadcast %cst_34 : f32 to vector<4x4xf32>
    %99 = arith.cmpf ogt, %97, %98 : vector<4x4xf32>
    %100 = vector.extract_strided_slice %3 {offsets = [0, 0, 8], sizes = [4, 4, 8], strides = [1, 1, 1]} : vector<4x4x32xbf16> to vector<4x4x8xbf16>
    %101 = arith.extf %100 : vector<4x4x8xbf16> to vector<4x4x8xf32>
    %102 = vector.extract_strided_slice %3 {offsets = [0, 0, 24], sizes = [4, 4, 8], strides = [1, 1, 1]} : vector<4x4x32xbf16> to vector<4x4x8xbf16>
    %103 = arith.extf %102 : vector<4x4x8xbf16> to vector<4x4x8xf32>
    %104 = vector.shape_cast %95 : vector<4x8xf32> to vector<4x1x8xf32>
    %105 = vector.broadcast %104 : vector<4x1x8xf32> to vector<4x4x8xf32>
    %106 = arith.mulf %105, %101 : vector<4x4x8xf32>
    %cst_35 = arith.constant 0.000000e+00 : f32
    %107 = vector.broadcast %cst_35 : f32 to vector<4x4x8xf32>
    %c0_i32_36 = arith.constant 0 : i32
    %108 = vector.broadcast %c0_i32_36 : i32 to vector<1x1x8xi32>
    %109 = arith.cmpi sge, %6, %108 : vector<1x1x8xi32>
    %c4_i32_37 = arith.constant 4 : i32
    %110 = vector.broadcast %c4_i32_37 : i32 to vector<1x1x8xi32>
    %111 = arith.cmpi slt, %6, %110 : vector<1x1x8xi32>
    %112 = arith.andi %109, %111 : vector<1x1x8xi1>
    %cst_38 = arith.constant 0.000000e+00 : f32
    %113 = vector.shape_cast %112 : vector<1x1x8xi1> to vector<1x1x8xi1>
    %114 = vector.broadcast %113 : vector<1x1x8xi1> to vector<4x4x8xi1>
    %115 = vector.broadcast %cst_38 : f32 to vector<4x4x8xf32>
    %116 = arith.select %114, %106, %115 : vector<4x4x8xi1>, vector<4x4x8xf32>
    %cst_39 = arith.constant dense<0.000000e+00> : vector<4x4xf32>
    %117 = vector.multi_reduction <add>, %116, %cst_39 [2] : vector<4x4x8xf32> to vector<4x4xf32>
    %cst_40 = arith.constant 5.000000e-01 : f32
    %118 = vector.broadcast %cst_40 : f32 to vector<4x4xf32>
    %119 = arith.mulf %117, %118 : vector<4x4xf32>
    %cst_41 = arith.constant -1.000000e+09 : f32
    %120 = vector.broadcast %cst_41 : f32 to vector<4x4xf32>
    %121 = arith.select %99, %119, %120 : vector<4x4xi1>, vector<4x4xf32>
    %cst_42 = arith.constant dense<0xFF800000> : vector<4xf32>
    %122 = vector.multi_reduction <maximumf>, %121, %cst_42 [1] : vector<4x4xf32> to vector<4xf32>
    %123 = vector.shape_cast %122 : vector<4xf32> to vector<4x1xf32>
    %124 = vector.broadcast %123 : vector<4x1xf32> to vector<4x4xf32>
    %125 = arith.subf %121, %124 : vector<4x4xf32>
    %126 = math.exp %125 : vector<4x4xf32>
    %cst_43 = arith.constant dense<0.000000e+00> : vector<4xf32>
    %127 = vector.multi_reduction <add>, %126, %cst_43 [1] : vector<4x4xf32> to vector<4xf32>
    %128 = vector.shape_cast %127 : vector<4xf32> to vector<4x1xf32>
    %129 = vector.broadcast %128 : vector<4x1xf32> to vector<4x4xf32>
    %130 = arith.divf %126, %129 : vector<4x4xf32>
    %131 = vector.shape_cast %130 : vector<4x4xf32> to vector<4x4x1xf32>
    %cst_44 = arith.constant 0.000000e+00 : f32
    %132 = vector.shape_cast %112 : vector<1x1x8xi1> to vector<1x1x8xi1>
    %133 = vector.broadcast %132 : vector<1x1x8xi1> to vector<4x4x8xi1>
    %134 = vector.shape_cast %131 : vector<4x4x1xf32> to vector<4x4x1xf32>
    %135 = vector.broadcast %134 : vector<4x4x1xf32> to vector<4x4x8xf32>
    %136 = vector.broadcast %cst_44 : f32 to vector<4x4x8xf32>
    %137 = arith.select %133, %135, %136 : vector<4x4x8xi1>, vector<4x4x8xf32>
    %138 = arith.addf %107, %137 : vector<4x4x8xf32>
    %c4_i32_45 = arith.constant 4 : i32
    %139 = vector.broadcast %c4_i32_45 : i32 to vector<1x1x8xi32>
    %140 = arith.cmpi sge, %6, %139 : vector<1x1x8xi32>
    %c8_i32_46 = arith.constant 8 : i32
    %141 = vector.broadcast %c8_i32_46 : i32 to vector<1x1x8xi32>
    %142 = arith.cmpi slt, %6, %141 : vector<1x1x8xi32>
    %143 = arith.andi %140, %142 : vector<1x1x8xi1>
    %cst_47 = arith.constant 0.000000e+00 : f32
    %144 = vector.shape_cast %143 : vector<1x1x8xi1> to vector<1x1x8xi1>
    %145 = vector.broadcast %144 : vector<1x1x8xi1> to vector<4x4x8xi1>
    %146 = vector.broadcast %cst_47 : f32 to vector<4x4x8xf32>
    %147 = arith.select %145, %106, %146 : vector<4x4x8xi1>, vector<4x4x8xf32>
    %cst_48 = arith.constant dense<0.000000e+00> : vector<4x4xf32>
    %148 = vector.multi_reduction <add>, %147, %cst_48 [2] : vector<4x4x8xf32> to vector<4x4xf32>
    %cst_49 = arith.constant 5.000000e-01 : f32
    %149 = vector.broadcast %cst_49 : f32 to vector<4x4xf32>
    %150 = arith.mulf %148, %149 : vector<4x4xf32>
    %cst_50 = arith.constant -1.000000e+09 : f32
    %151 = vector.broadcast %cst_50 : f32 to vector<4x4xf32>
    %152 = arith.select %99, %150, %151 : vector<4x4xi1>, vector<4x4xf32>
    %cst_51 = arith.constant dense<0xFF800000> : vector<4xf32>
    %153 = vector.multi_reduction <maximumf>, %152, %cst_51 [1] : vector<4x4xf32> to vector<4xf32>
    %154 = vector.shape_cast %153 : vector<4xf32> to vector<4x1xf32>
    %155 = vector.broadcast %154 : vector<4x1xf32> to vector<4x4xf32>
    %156 = arith.subf %152, %155 : vector<4x4xf32>
    %157 = math.exp %156 : vector<4x4xf32>
    %cst_52 = arith.constant dense<0.000000e+00> : vector<4xf32>
    %158 = vector.multi_reduction <add>, %157, %cst_52 [1] : vector<4x4xf32> to vector<4xf32>
    %159 = vector.shape_cast %158 : vector<4xf32> to vector<4x1xf32>
    %160 = vector.broadcast %159 : vector<4x1xf32> to vector<4x4xf32>
    %161 = arith.divf %157, %160 : vector<4x4xf32>
    %162 = vector.shape_cast %161 : vector<4x4xf32> to vector<4x4x1xf32>
    %cst_53 = arith.constant 0.000000e+00 : f32
    %163 = vector.shape_cast %143 : vector<1x1x8xi1> to vector<1x1x8xi1>
    %164 = vector.broadcast %163 : vector<1x1x8xi1> to vector<4x4x8xi1>
    %165 = vector.shape_cast %162 : vector<4x4x1xf32> to vector<4x4x1xf32>
    %166 = vector.broadcast %165 : vector<4x4x1xf32> to vector<4x4x8xf32>
    %167 = vector.broadcast %cst_53 : f32 to vector<4x4x8xf32>
    %168 = arith.select %164, %166, %167 : vector<4x4x8xi1>, vector<4x4x8xf32>
    %169 = arith.addf %138, %168 : vector<4x4x8xf32>
    %170 = arith.mulf %169, %103 : vector<4x4x8xf32>
    %cst_54 = arith.constant dense<0.000000e+00> : vector<4x8xf32>
    %171 = vector.multi_reduction <add>, %170, %cst_54 [1] : vector<4x4x8xf32> to vector<4x8xf32>
    %172 = arith.truncf %171 : vector<4x8xf32> to vector<4x8xbf16>
    %173 = vector.extract_strided_slice %4 {offsets = [1, 0, 0], sizes = [1, 8, 8], strides = [1, 1, 1]} : vector<2x8x8xbf16> to vector<1x8x8xbf16>
    %174 = vector.shape_cast %173 : vector<1x8x8xbf16> to vector<8x8xbf16>
    %cst_55 = arith.constant dense<0.000000e+00> : vector<4x8xf32>
    %175 = tpu.matmul %172, %174, %cst_55 {dimension_numbers = #tpu.dot_dimension_numbers<[1], [0], [0], [1], [0, 0, 1, 1], [], []>} : vector<4x8xbf16>, vector<8x8xbf16>, vector<4x8xf32> -> vector<4x8xf32>
    %176 = vector.extract_strided_slice %5 {offsets = [1, 0, 0], sizes = [1, 1, 8], strides = [1, 1, 1]} : vector<2x1x8xf32> to vector<1x1x8xf32>
    %177 = vector.shape_cast %176 : vector<1x1x8xf32> to vector<1x8xf32>
    %178 = vector.broadcast %177 : vector<1x8xf32> to vector<4x8xf32>
    %179 = arith.addf %175, %178 : vector<4x8xf32>
    %180 = arith.addf %93, %179 : vector<4x8xf32>
    %c0_56 = arith.constant 0 : index
    %c0_57 = arith.constant 0 : index
    %181 = vector.load %arg7[%c0_56, %c0_57] : memref<4x8xf32, #tpu.memory_space<vmem>>, vector<4x8xf32>
    tpu.vector_store %arg7[%c0_56, %c0_57], %180 {strides = array<i32>} : memref<4x8xf32, #tpu.memory_space<vmem>>, vector<4x8xf32>,
    return
  }
  func.func @transform_0(%arg0: i32) -> (i32, i32) {
    %c0_i32 = arith.constant 0 : i32
    %c0_i32_0 = arith.constant 0 : i32
    return %arg0, %c0_i32 : i32, i32
  }
  func.func @transform_1(%arg0: i32) -> (i32, i32, i32) {
    %c0_i32 = arith.constant 0 : i32
    %c0_i32_0 = arith.constant 0 : i32
    %c0_i32_1 = arith.constant 0 : i32
    return %arg0, %c0_i32, %c0_i32_0 : i32, i32, i32
  }
  func.func @transform_2(%arg0: i32) -> (i32, i32, i32) {
    %c0_i32 = arith.constant 0 : i32
    %c0_i32_0 = arith.constant 0 : i32
    %c0_i32_1 = arith.constant 0 : i32
    return %arg0, %c0_i32, %c0_i32_0 : i32, i32, i32
  }
  func.func @transform_3(%arg0: i32) -> (i32, i32, i32) {
    %c0_i32 = arith.constant 0 : i32
    %c0_i32_0 = arith.constant 0 : i32
    %c0_i32_1 = arith.constant 0 : i32
    return %arg0, %c0_i32, %c0_i32_0 : i32, i32, i32
  }
  func.func @transform_4(%arg0: i32) -> (i32, i32, i32) {
    %c0_i32 = arith.constant 0 : i32
    %c0_i32_0 = arith.constant 0 : i32
    %c0_i32_1 = arith.constant 0 : i32
    %c0_i32_2 = arith.constant 0 : i32
    return %c0_i32, %c0_i32_0, %c0_i32_1 : i32, i32, i32
  }
  func.func @transform_5(%arg0: i32) -> (i32, i32, i32) {
    %c0_i32 = arith.constant 0 : i32
    %c0_i32_0 = arith.constant 0 : i32
    %c0_i32_1 = arith.constant 0 : i32
    %c0_i32_2 = arith.constant 0 : i32
    return %c0_i32, %c0_i32_0, %c0_i32_1 : i32, i32, i32
  }
  func.func @transform_6(%arg0: i32) -> (i32, i32) {
    %c0_i32 = arith.constant 0 : i32
    %c0_i32_0 = arith.constant 0 : i32
    return %arg0, %c0_i32 : i32, i32
  }
}

</mosaic_0001>

<bundles_post_ra>
// kernel: _lambda_.5
= control target key start
LH: loop header
LB: loop body
LE: loop exit
PB: predicated region body
PF: predicated region fallthrough
CT: control target
= control target key end

     0   :  { %vm41_vm0 = vcmask 1042432   ;;  %vm37_vm1 = vcmask 48128   ;;  %vm70_vm2 = vcmask 1043456   ;;  %vm58_vm3 = vcmask 60416   ;;  %s211_s1 = inlined_call_operand.vmem [shape: bf16[6,8], index: 1, kind: input, shape index: {}]   ;;  %s212_s0 = inlined_call_operand.vmem [shape: f32[4,6], index: 0, kind: input, shape index: {}]   ;;  %s213_s2 = inlined_call_operand.vmem [shape: f32[1,8], index: 2, kind: input, shape index: {}]   ;;  %s214_s4 = inlined_call_operand.vmem [shape: f32[1,8], index: 4, kind: input, shape index: {}]   ;;  %s215_s3 = inlined_call_operand.vmem [shape: bf16[8,8], index: 3, kind: input, shape index: {}]   ;;  %s216_s5 = inlined_call_operand.vmem [shape: bf16[8,8], index: 5, kind: input, shape index: {}]   ;;  %s217_s7 = inlined_call_operand.vmem [shape: f32[4,8], index: 7, kind: output, shape index: {0}]   ;;  %s218_s6 = inlined_call_operand.vmem [shape: f32[1,8], index: 6, kind: input, shape index: {}]   ;;  %s219_s8 = inlined_call_operand.vmem [shape: f32[4,8], index: 8, kind: output, shape index: {1}]   ;;  %s220_s9 = inlined_call_operand.vmem [shape: f32[4,8], index: 9, kind: output, shape index: {2}]  }
   0x1   :  { %v32_v0 = vld [vmem:[%s211_s1] sm:$0x7]  ;;  %vm66_vm4 = vcmask 64512  }
   0x2   :  { %v30_v1 = vld [vmem:[%s212_s0] sm:$0xf]  ;;  %v43_v2 = vsel %vm41_vm0, %v32_v0, 0 }
   0x3   :  { %v31_v3 = vpack.c.bf16 %v30_v1, %v30_v1  ;;  %52 = vmatpush.bf16.msra.mxu0 %v43_v2  ;;  %v61_v4 = vld [vmem:[%s215_s3] sm:$0xf] }
   0x4   :  { %v88_v5 = vld [vmem:[%s216_s5] sm:$0xf]  ;;  %v72_v6 = vsel %vm70_vm2, %v61_v4, 0 }
   0x5   :  { %v94_v7 = vsel %vm70_vm2, %v88_v5, 0  ;;  %81 = vmatpush.bf16.msra.mxu1 %v72_v6  ;;  %v125_v8 = vld [vmem:[%s213_s2] ss:$0 sm:$0xff] }
   0x6   :  { %122 = vmatmul.msk.bf16.vlgmr.msra.gmra.mxu0 %vm37_vm1, %v31_v3  ;;  %103 = vmatpush.bf16.msra.mxu2 %v94_v7  ;;  %v126_v13 = vld [vmem:[%s214_s4] ss:$0 sm:$0xff] }
   0x7   :  { %v127_v16 = vld [vmem:[%s218_s6] ss:$0 sm:$0xff] }
  0x83   :  { %v54_v9 = vpop.f32.mrf.mxu0 }
  0x84   :  { %v55_v10 = vadd.f32 %v125_v8, %v54_v9 }
  0x86   :  { %59 = vst.msk [vmem:[%s217_s7] sm:$0xf] %vm58_vm3, %v55_v10  ;;  %v60_v11 = vpack.c.bf16 %v55_v10, %v55_v10 }
  0x88   :  { %123 = vmatmul.msk.bf16.vlgmr.msra.gmra.mxu1 %vm66_vm4, %v60_v11  ;;  %124 = vmatmul.msk.bf16.vlgmr.msra.gmra.mxu2 %vm66_vm4, %v60_v11 }
  0x8b   :  { %v56_v12 = vpop.f32.mrf.mxu0 }
 0x105   :  { %v83_v14 = vpop.f32.mrf.mxu1 }
 0x106   :  { %v84_v15 = vadd.f32 %v126_v13, %v83_v14 }
 0x108   :  { %87 = vst.msk [vmem:[%s219_s8] sm:$0xf] %vm58_vm3, %v84_v15 }
 0x10b   :  { %v105_v17 = vpop.f32.mrf.mxu2 }
 0x10c   :  { %v106_v18 = vadd.f32 %v127_v16, %v105_v17 }
 0x10d   :  { %v85_v19 = vpop.f32.mrf.mxu1 }
 0x10e   :  { %109 = vst.msk [vmem:[%s220_s9] sm:$0xf] %vm58_vm3, %v106_v18 }
 0x113   :  { %v107_v20 = vpop.f32.mrf.mxu2 }

// kernel: _lambda_.6
= control target key start
LH: loop header
LB: loop body
LE: loop exit
PB: predicated region body
PF: predicated region fallthrough
CT: control target
= control target key end

     0   :  { %vm41_vm0 = vcmask 1041408   ;;  %vm42_vm1 = vcmask 1042432   ;;  %v286_v1 = vmov 65535   ;;  %vm37_vm2 = vcmask 39936   ;;  %s293_s14 = smov 96   ;;  %s294_s15 = smov 112   ;;  %s400_s1 = inlined_call_operand.vmem [shape: bf16[5,16], index: 1, kind: input, shape index: {}]   ;;  %s401_s0 = inlined_call_operand.vmem [shape: f32[12,5], index: 0, kind: input, shape index: {}]   ;;  %s402_s2 = inlined_call_operand.vmem [shape: f32[1,16], index: 2, kind: input, shape index: {}]   ;;  %s403_s4 = inlined_call_operand.vmem [shape: f32[1,80], index: 4, kind: input, shape index: {}]   ;;  %s404_s3 = inlined_call_operand.vmem [shape: bf16[16,80], index: 3, kind: input, shape index: {}]   ;;  %s405_s6 = inlined_call_operand.vmem [shape: f32[1,32], index: 6, kind: input, shape index: {}]   ;;  %s406_s5 = inlined_call_operand.vmem [shape: bf16[16,32], index: 5, kind: input, shape index: {}]   ;;  %s407_s8 = inlined_call_operand.vmem [shape: f32[12,1], index: 8, kind: output, shape index: {1}]   ;;  %s408_s7 = inlined_call_operand.vmem [shape: bf16[12,32], index: 7, kind: output, shape index: {0}]  }
   0x1   :  { %v32_v0 = vld [vmem:[%s400_s1] sm:$0x7]  ;;  %v43_v2 = vsel %vm41_vm0, 4294967295, %v286_v1  ;;  %v353_v4 = vld [vmem:[%s401_s0 + $0x8] sm:$0xf]  ;;  %v287_v8 = vmov 2  }
   0x2   :  { %v348_v3 = vld [vmem:[%s401_s0] sm:$0xff]  ;;  %v44_v5 = vsel %vm42_vm1, %v43_v2, 0  ;;  %277 = vset.pattern.permute.xlu1 %v287_v8  ;;  %v288_v9 = vmov 1   ;;  %v289_v11 = vmov 3   ;;  %v290_v12 = vmov 4  }
   0x3   :  { %v46_v6 = vand.u32 %v44_v5, %v32_v0  ;;  %v31_v7 = vpack.c.bf16 %v353_v4, %v348_v3  ;;  %276 = vset.pattern.permute.xlu0 %v288_v9  ;;  %128 = vperm.xlu1 %277, %v348_v3   ;;  %v263_v10 = vld [vmem:[%s404_s3] sm:$0xff]  ;;  %v291_v14 = vmov 0   ;;  %vm77_vm3 = vcmask 130048  }
   0x4   :  { %108 = vperm.xlu0 %276, %v348_v3   ;;  %88 = vmatpush.bf16.msra.mxu1 %v263_v10  ;;  %v283_v15 = vld [vmem:[%s402_s2] ss:$0 sm:$0xff]  ;;  %s292_s2 = smov 80   ;;  %v223_v45 = vand.u32 2147483647, %v348_v3  ;;  %vm228_vm4 = vcmask 35840  }
   0x5   :  { %55 = vmatpush.bf16.msra.mxu0 %v46_v6  ;;  %278 = vset.pattern.permute.xlu2 %v289_v11  ;;  %v284_v23 = vld [vmem:[%s403_s4] ss:$0 sm:$0xff]  ;;  %s295_s4 = smov 64   ;;  %v224_v46 = vand.u32 2147483647, %v353_v4  ;;  %vm238_vm7 = vcmask 7168  }
   0x6   :  { %148 = vperm.xlu2 %278, %v348_v3   ;;  %v264_v43 = vld [vmem:[%s406_s5] sm:$0xff]  ;;  %v225_v47 = vsel %vm37_vm2, %v223_v45, 0.0  ;;  %vm240_vm8 = vcmask 3072   ;;  %vm219_vm9 = vcmask 257024   ;;  %vm221_vm10 = vcmask 254976  }
   0x7   :  { %210 = vmatpush.bf16.msra.mxu2 %v264_v43  ;;  %v229_v48 = vsel %vm228_vm4, %v224_v46, 0.0  ;;  %v285_v10 = vld [vmem:[%s405_s6] ss:$0 sm:$0xff] }
   0x8   :  { %250 = vmatmul.msk.bf16.vlgmr.msra.gmra.mxu0 %vm37_vm2, %v31_v7  ;;  %v296_v7 = vmov 0.0  }
   0xb   :  { %132 = vperm.xlu1 %277, %v353_v4  }
   0xc   :  { %112 = vperm.xlu0 %276, %v353_v4  }
   0xe   :  { %152 = vperm.xlu2 %278, %v353_v4  }
  0x13   :  { %280 = vset.pattern.permute.xlu1 %v290_v12 }
  0x14   :  { %172 = vperm.xlu1 %280, %v353_v4   ;;  %279 = vset.pattern.permute.xlu0 %v290_v12 }
  0x15   :  { %168 = vperm.xlu0 %279, %v348_v3  }
  0x16   :  { %281 = vset.pattern.permute.xlu2 %v291_v14 }
  0x17   :  { %97 = vperm.xlu2 %281, %v348_v3  }
  0x1c   :  { %282 = vset.pattern.permute.xlu1 %v291_v14 }
  0x1d   :  { %102 = vperm.xlu1 %282, %v353_v4  }
  0x60   :  { %v149_v25 = vpop.permute.xlu2 %148 }
  0x68   :  { %v153_v35 = vpop.permute.xlu2 %152 }
  0x71   :  { %v98_v44 = vpop.permute.xlu2 %97 }
  0x75   :  { %v129_v24 = vpop.permute.xlu1 %128 }
  0x76   :  { %v109_v22 = vpop.permute.xlu0 %108 }
  0x7d   :  { %v133_v32 = vpop.permute.xlu1 %132 }
  0x7e   :  { %v113_v31 = vpop.permute.xlu0 %112 }
  0x85   :  { %v57_v13 = vpop.f32.mrf.mxu0 }
  0x86   :  { %v58_v16 = vadd.f32 %v283_v15, %v57_v13  ;;  %v173_v40 = vpop.permute.xlu1 %172 }
  0x87   :  { %v169_v39 = vpop.permute.xlu0 %168 }
  0x88   :  { %v62_v19 = vmax.f32 %v58_v16, 0.0 }
  0x8d   :  { %v59_v17 = vpop.f32.mrf.mxu0 }
  0x8e   :  { %v60_v18 = vadd.f32 %v283_v15, %v59_v17 }
  0x8f   :  { %v103_v49 = vpop.permute.xlu1 %102 }
  0x90   :  { %v63_v20 = vmax.f32 %v60_v18, 0.0 }
  0x92   :  { %v64_v21 = vpack.c.bf16 %v63_v20, %v62_v19 }
  0x94   :  { %255 = vmatmul.msk.bf16.vlgmr.msra.gmra.mxu1 %vm77_vm3, %v64_v21 }
 0x111   :  { %v90_v26 = vpop.f32.mrf.mxu1 }
 0x112   :  { %v91_v27 = vadd.f32 %v284_v23, %v90_v26 }
 0x114   :  { %v155_v28 = vmul.f32 %v149_v25, %v91_v27  ;;  %v135_v29 = vmul.f32 %v129_v24, %v91_v27  ;;  %v115_v30 = vmul.f32 %v109_v22, %v91_v27  ;;  %v175_v42 = vmul.f32 %v169_v39, %v91_v27 }
 0x115   :  { %v105_v53 = vmul.f32 %v98_v44, %v91_v27 }
 0x116   :  { %159 = vrot.lane.b32.xlu0 %v155_v28, %s292_s2  ;;  %139 = vrot.lane.b32.xlu1 %v135_v29, %s293_s14 }
 0x117   :  { %119 = vrot.lane.b32.xlu2 %v115_v30, %s294_s15 }
 0x119   :  { %v92_v33 = vpop.f32.mrf.mxu1 }
 0x11a   :  { %v93_v34 = vadd.f32 %v284_v23, %v92_v33 }
 0x11c   :  { %v116_v36 = vmul.f32 %v113_v31, %v93_v34  ;;  %v156_v37 = vmul.f32 %v153_v35, %v93_v34  ;;  %v136_v38 = vmul.f32 %v133_v32, %v93_v34  ;;  %v176_v41 = vmul.f32 %v173_v40, %v93_v34 }
 0x11d   :  { %v106_v55 = vmul.f32 %v103_v49, %v93_v34 }
 0x11e   :  { %121 = vrot.lane.b32.xlu0 %v116_v36, %s294_s15  ;;  %161 = vrot.lane.b32.xlu1 %v156_v37, %s292_s2 }
 0x11f   :  { %141 = vrot.lane.b32.xlu2 %v136_v38, %s293_s14 }
 0x126   :  { %181 = vrot.lane.b32.xlu0 %v176_v41, %s295_s4 }
 0x127   :  { %179 = vrot.lane.b32.xlu2 %v175_v42, %s295_s4 }
 0x148   :  { %226 = vadd.xlane.f32.xlu1 %v225_v47 }
 0x150   :  { %230 = vadd.xlane.f32.xlu2 %v229_v48 }
 0x171   :  { %v120_v50 = vpop.permute.xlu2 %119 }
 0x172   :  { %v125_v56 = vadd.f32 %v120_v50, %v105_v53 }
 0x179   :  { %v142_v54 = vpop.permute.xlu2 %141 }
 0x181   :  { %v180_v0 = vpop.permute.xlu2 %179 }
 0x188   :  { %v160_v51 = vpop.permute.xlu0 %159  ;;  %v140_v52 = vpop.permute.xlu1 %139 }
 0x189   :  { %v145_v58 = vadd.f32 %v140_v52, %v125_v56 }
 0x18b   :  { %v165_v61 = vadd.f32 %v160_v51, %v145_v58 }
 0x18d   :  { %v185_v2 = vadd.f32 %v180_v0, %v165_v61 }
 0x190   :  { %v122_v57 = vpop.permute.xlu0 %121  ;;  %v162_v62 = vpop.permute.xlu1 %161 }
 0x191   :  { %v126_v59 = vadd.f32 %v122_v57, %v106_v55 }
 0x193   :  { %v146_v60 = vadd.f32 %v142_v54, %v126_v59 }
 0x195   :  { %v166_v63 = vadd.f32 %v162_v62, %v146_v60 }
 0x198   :  { %v182_v1 = vpop.permute.xlu0 %181 }
 0x199   :  { %v186_v3 = vadd.f32 %v182_v1, %v166_v63 }
 0x19b   :  { %v187_v4 = vpack.c.bf16 %v186_v3, %v185_v2 }
 0x19d   :  { %260 = vmatmul.msk.bf16.vlgmr.msra.gmra.mxu2 %vm77_vm3, %v187_v4 }
 0x1bb   :  { %v227_v5 = vpop.xlane.xlu1 %226 }
 0x1bc   :  { %vm232_vm5 = vcmp.ne.f32.partialorder %v227_v5, 0.0 }
 0x1bd   :  { %v261_v8 = vsel %vm232_vm5, 1.0, %v296_v7 }
 0x1be   :  { %239 = vst.msk [vmem:[%s407_s8] sm:$0xff] %vm238_vm7, %v261_v8 }
 0x1c3   :  { %v231_v6 = vpop.xlane.xlu2 %230 }
 0x1c4   :  { %vm233_vm6 = vcmp.ne.f32.partialorder %v231_v6, 0.0 }
 0x1c5   :  { %v262_v9 = vsel %vm233_vm6, 1.0, %v296_v7 }
 0x1c6   :  { %241 = vst.msk [vmem:[%s407_s8 + $0x8] sm:$0xf] %vm240_vm8, %v262_v9 }
 0x220   :  { %v212_v11 = vpop.f32.mrf.mxu2 }
 0x221   :  { %v213_v12 = vadd.f32 %v285_v10, %v212_v11 }
 0x223   :  { %v217_v13 = vpack.c.bf16 %v213_v12, %v213_v12 }
 0x225   :  { %220 = vst.msk [vmem:[%s408_s7] sm:$0xf] %vm219_vm9, %v217_v13 }
 0x228   :  { %v214_v14 = vpop.f32.mrf.mxu2 }
 0x229   :  { %v215_v15 = vadd.f32 %v285_v10, %v214_v14 }
 0x22b   :  { %v218_v16 = vpack.c.bf16 %v215_v15, %v215_v15 }
 0x22d   :  { %222 = vst.msk [vmem:[%s408_s7 + $0x4] sm:$0x3] %vm221_vm10, %v218_v16 }

// kernel: _lambda_.8
= control target key start
LH: loop header
LB: loop body
LE: loop exit
PB: predicated region body
PF: predicated region fallthrough
CT: control target
= control target key end

     0   :  { %vm41_vm0 = vcmask 1042432   ;;  %vm42_vm1 = vcmask 1043456   ;;  %v331_v1 = vmov 65535   ;;  %v332_v6 = vmov 2   ;;  %s339_s13 = smov 80   ;;  %s340_s14 = smov 96   ;;  %s454_s1 = inlined_call_operand.vmem [shape: bf16[7,16], index: 1, kind: input, shape index: {}]   ;;  %s455_s0 = inlined_call_operand.vmem [shape: f32[16,7], index: 0, kind: input, shape index: {}]   ;;  %s456_s2 = inlined_call_operand.vmem [shape: f32[1,16], index: 2, kind: input, shape index: {}]   ;;  %s457_s4 = inlined_call_operand.vmem [shape: f32[1,112], index: 4, kind: input, shape index: {}]   ;;  %s458_s3 = inlined_call_operand.vmem [shape: bf16[16,112], index: 3, kind: input, shape index: {}]   ;;  %s459_s6 = inlined_call_operand.vmem [shape: f32[1,32], index: 6, kind: input, shape index: {}]   ;;  %s460_s5 = inlined_call_operand.vmem [shape: bf16[16,32], index: 5, kind: input, shape index: {}]   ;;  %s461_s8 = inlined_call_operand.vmem [shape: f32[16,1], index: 8, kind: output, shape index: {1}]   ;;  %s462_s7 = inlined_call_operand.vmem [shape: bf16[16,32], index: 7, kind: output, shape index: {0}]  }
   0x1   :  { %v32_v0 = vld [vmem:[%s454_s1] sm:$0xf]  ;;  %v43_v2 = vsel %vm41_vm0, 4294967295, %v331_v1  ;;  %v402_v4 = vld [vmem:[%s455_s0 + $0x8] sm:$0xff]  ;;  %318 = vset.pattern.permute.xlu1 %v332_v6  ;;  %vm37_vm2 = vcmask 56320   ;;  %v333_v9 = vmov 1  }
   0x2   :  { %v397_v3 = vld [vmem:[%s455_s0] sm:$0xff]  ;;  %v44_v5 = vsel %vm42_vm1, %v43_v2, 0  ;;  %317 = vset.pattern.permute.xlu0 %v333_v9  ;;  %v334_v10 = vmov 4   ;;  %v335_v12 = vmov 3   ;;  %v336_v13 = vmov 5   ;;  %s341_s15 = smov 112  }
   0x3   :  { %v46_v7 = vand.u32 %v44_v5, %v32_v0  ;;  %128 = vperm.xlu1 %318, %v397_v3   ;;  %v31_v8 = vpack.c.bf16 %v402_v4, %v397_v3  ;;  %108 = vperm.xlu0 %317, %v397_v3   ;;  %v300_v11 = vld [vmem:[%s458_s3] sm:$0xff]  ;;  %v337_v14 = vmov 0   ;;  %v338_v17 = vmov 6   ;;  %s343_s16 = smov 64   ;;  %s344_s17 = smov 32  }
   0x4   :  { %88 = vmatpush.bf16.msra.mxu1 %v300_v11  ;;  %319 = vset.pattern.permute.xlu2 %v335_v12  ;;  %v328_v16 = vld [vmem:[%s456_s2] ss:$0 sm:$0xff]  ;;  %vm77_vm3 = vcmask 130048   ;;  %v263_v57 = vand.u32 2147483647, %v402_v4  ;;  %vm276_vm6 = vcmask 7168  }
   0x5   :  { %55 = vmatpush.bf16.msra.mxu0 %v46_v7  ;;  %148 = vperm.xlu2 %319, %v397_v3   ;;  %v329_v27 = vld [vmem:[%s457_s4] ss:$0 sm:$0xff]  ;;  %s342_s4 = smov 48   ;;  %v262_v58 = vand.u32 2147483647, %v397_v3  ;;  %vm259_vm7 = vcmask 257024  }
   0x6   :  { %v301_v55 = vld [vmem:[%s460_s5] sm:$0xff]  ;;  %v267_v61 = vsel %vm37_vm2, %v263_v57, 0.0 }
   0x7   :  { %250 = vmatpush.bf16.msra.mxu2 %v301_v55  ;;  %v264_v62 = vsel %vm37_vm2, %v262_v58, 0.0 }
   0x8   :  { %287 = vmatmul.msk.bf16.vlgmr.msra.gmra.mxu0 %vm37_vm2, %v31_v8 }
   0xb   :  { %132 = vperm.xlu1 %318, %v402_v4   ;;  %112 = vperm.xlu0 %317, %v402_v4  }
   0xd   :  { %152 = vperm.xlu2 %319, %v402_v4  }
  0x13   :  { %321 = vset.pattern.permute.xlu1 %v334_v10  ;;  %320 = vset.pattern.permute.xlu0 %v334_v10 }
  0x14   :  { %172 = vperm.xlu1 %321, %v402_v4   ;;  %168 = vperm.xlu0 %320, %v397_v3  }
  0x15   :  { %322 = vset.pattern.permute.xlu2 %v336_v13 }
  0x16   :  { %188 = vperm.xlu2 %322, %v397_v3  }
  0x1c   :  { %323 = vset.pattern.permute.xlu1 %v336_v13  ;;  %325 = vset.pattern.permute.xlu0 %v338_v17 }
  0x1d   :  { %192 = vperm.xlu1 %323, %v402_v4   ;;  %212 = vperm.xlu0 %325, %v402_v4  }
  0x1e   :  { %324 = vset.pattern.permute.xlu2 %v338_v17 }
  0x1f   :  { %208 = vperm.xlu2 %324, %v397_v3  }
  0x25   :  { %326 = vset.pattern.permute.xlu1 %v337_v14 }
  0x26   :  { %97 = vperm.xlu1 %326, %v397_v3  }
  0x27   :  { %327 = vset.pattern.permute.xlu2 %v337_v14 }
  0x28   :  { %102 = vperm.xlu2 %327, %v402_v4  }
  0x5f   :  { %v149_v25 = vpop.permute.xlu2 %148 }
  0x67   :  { %v153_v30 = vpop.permute.xlu2 %152 }
  0x70   :  { %v189_v39 = vpop.permute.xlu2 %188 }
  0x75   :  { %v109_v24 = vpop.permute.xlu0 %108  ;;  %v129_v26 = vpop.permute.xlu1 %128 }
  0x79   :  { %v209_v47 = vpop.permute.xlu2 %208 }
  0x7d   :  { %v113_v28 = vpop.permute.xlu0 %112  ;;  %v133_v35 = vpop.permute.xlu1 %132 }
  0x82   :  { %v103_v53 = vpop.permute.xlu2 %102 }
  0x85   :  { %v57_v15 = vpop.f32.mrf.mxu0 }
  0x86   :  { %v58_v18 = vadd.f32 %v328_v16, %v57_v15  ;;  %v169_v37 = vpop.permute.xlu0 %168  ;;  %v173_v43 = vpop.permute.xlu1 %172 }
  0x88   :  { %v62_v21 = vmax.f32 %v58_v18, 0.0 }
  0x8d   :  { %v59_v19 = vpop.f32.mrf.mxu0 }
  0x8e   :  { %v60_v20 = vadd.f32 %v328_v16, %v59_v19 }
  0x8f   :  { %v213_v48 = vpop.permute.xlu0 %212  ;;  %v193_v49 = vpop.permute.xlu1 %192 }
  0x90   :  { %v63_v22 = vmax.f32 %v60_v20, 0.0 }
  0x92   :  { %v64_v23 = vpack.c.bf16 %v63_v22, %v62_v21 }
  0x94   :  { %292 = vmatmul.msk.bf16.vlgmr.msra.gmra.mxu1 %vm77_vm3, %v64_v23 }
  0x98   :  { %v98_v54 = vpop.permute.xlu1 %97 }
 0x111   :  { %v90_v29 = vpop.f32.mrf.mxu1 }
 0x112   :  { %v91_v31 = vadd.f32 %v329_v27, %v90_v29 }
 0x114   :  { %v155_v32 = vmul.f32 %v149_v25, %v91_v31  ;;  %v135_v33 = vmul.f32 %v129_v26, %v91_v31  ;;  %v115_v34 = vmul.f32 %v109_v24, %v91_v31  ;;  %v175_v41 = vmul.f32 %v169_v37, %v91_v31 }
 0x115   :  { %v195_v42 = vmul.f32 %v189_v39, %v91_v31  ;;  %v215_v50 = vmul.f32 %v209_v47, %v91_v31  ;;  %v105_v0 = vmul.f32 %v98_v54, %v91_v31  ;;  %v345_v25 = vmov 0.0  }
 0x116   :  { %159 = vrot.lane.b32.xlu2 %v155_v32, %s339_s13  ;;  %139 = vrot.lane.b32.xlu0 %v135_v33, %s340_s14 }
 0x117   :  { %119 = vrot.lane.b32.xlu1 %v115_v34, %s341_s15 }
 0x119   :  { %v92_v36 = vpop.f32.mrf.mxu1 }
 0x11a   :  { %v93_v38 = vadd.f32 %v329_v27, %v92_v36 }
 0x11c   :  { %v116_v40 = vmul.f32 %v113_v28, %v93_v38  ;;  %v176_v44 = vmul.f32 %v173_v43, %v93_v38  ;;  %v156_v45 = vmul.f32 %v153_v30, %v93_v38  ;;  %v136_v46 = vmul.f32 %v133_v35, %v93_v38  ;;  %v330_v28 = vld [vmem:[%s459_s6] ss:$0 sm:$0xff] }
 0x11d   :  { %v216_v51 = vmul.f32 %v213_v48, %v93_v38  ;;  %v196_v52 = vmul.f32 %v193_v49, %v93_v38  ;;  %v106_v6 = vmul.f32 %v103_v53, %v93_v38 }
 0x11e   :  { %121 = vrot.lane.b32.xlu2 %v116_v40, %s341_s15  ;;  %199 = vrot.lane.b32.xlu0 %v195_v42, %s342_s4 }
 0x11f   :  { %179 = vrot.lane.b32.xlu1 %v175_v41, %s343_s16 }
 0x126   :  { %181 = vrot.lane.b32.xlu2 %v176_v44, %s343_s16  ;;  %161 = vrot.lane.b32.xlu0 %v156_v45, %s339_s13 }
 0x127   :  { %141 = vrot.lane.b32.xlu1 %v136_v46, %s340_s14 }
 0x12e   :  { %219 = vrot.lane.b32.xlu2 %v215_v50, %s344_s17  ;;  %221 = vrot.lane.b32.xlu0 %v216_v51, %s344_s17 }
 0x12f   :  { %201 = vrot.lane.b32.xlu1 %v196_v52, %s342_s4 }
 0x157   :  { %268 = vadd.xlane.f32.xlu2 %v267_v61 }
 0x159   :  { %265 = vadd.xlane.f32.xlu1 %v264_v62 }
 0x170   :  { %v160_v56 = vpop.permute.xlu2 %159 }
 0x178   :  { %v122_v63 = vpop.permute.xlu2 %121 }
 0x179   :  { %v126_v8 = vadd.f32 %v122_v63, %v106_v6 }
 0x180   :  { %v182_v9 = vpop.permute.xlu2 %181 }
 0x188   :  { %v140_v59 = vpop.permute.xlu0 %139  ;;  %v220_v18 = vpop.permute.xlu2 %219 }
 0x189   :  { %v120_v60 = vpop.permute.xlu1 %119 }
 0x18a   :  { %v125_v5 = vadd.f32 %v120_v60, %v105_v0 }
 0x18c   :  { %v145_v7 = vadd.f32 %v140_v59, %v125_v5 }
 0x18e   :  { %v165_v3 = vadd.f32 %v160_v56, %v145_v7 }
 0x190   :  { %v200_v1 = vpop.permute.xlu0 %199 }
 0x191   :  { %v180_v2 = vpop.permute.xlu1 %179 }
 0x192   :  { %v185_v12 = vadd.f32 %v180_v2, %v165_v3 }
 0x194   :  { %v205_v14 = vadd.f32 %v200_v1, %v185_v12 }
 0x196   :  { %v225_v20 = vadd.f32 %v220_v18, %v205_v14 }
 0x198   :  { %v162_v4 = vpop.permute.xlu0 %161 }
 0x199   :  { %v142_v10 = vpop.permute.xlu1 %141 }
 0x19a   :  { %v146_v11 = vadd.f32 %v142_v10, %v126_v8 }
 0x19c   :  { %v166_v13 = vadd.f32 %v162_v4, %v146_v11 }
 0x19e   :  { %v186_v15 = vadd.f32 %v182_v9, %v166_v13 }
 0x1a0   :  { %v222_v19 = vpop.permute.xlu0 %221 }
 0x1a1   :  { %v202_v16 = vpop.permute.xlu1 %201 }
 0x1a2   :  { %v206_v17 = vadd.f32 %v202_v16, %v186_v15 }
 0x1a4   :  { %v226_v21 = vadd.f32 %v222_v19, %v206_v17 }
 0x1a6   :  { %v227_v22 = vpack.c.bf16 %v226_v21, %v225_v20 }
 0x1a8   :  { %297 = vmatmul.msk.bf16.vlgmr.msra.gmra.mxu2 %vm77_vm3, %v227_v22 }
 0x1ca   :  { %v269_v23 = vpop.xlane.xlu2 %268 }
 0x1cb   :  { %vm271_vm4 = vcmp.ne.f32.partialorder %v269_v23, 0.0 }
 0x1cc   :  { %v266_v24 = vpop.xlane.xlu1 %265  ;;  %v299_v26 = vsel %vm271_vm4, 1.0, %v345_v25 }
 0x1cd   :  { %vm270_vm5 = vcmp.ne.f32.partialorder %v266_v24, 0.0  ;;  %278 = vst.msk [vmem:[%s461_s8 + $0x8] sm:$0xff] %vm276_vm6, %v299_v26 }
 0x1ce   :  { %v298_v27 = vsel %vm270_vm5, 1.0, %v345_v25 }
 0x1cf   :  { %277 = vst.msk [vmem:[%s461_s8] sm:$0xff] %vm276_vm6, %v298_v27 }
 0x22b   :  { %v252_v29 = vpop.f32.mrf.mxu2 }
 0x22c   :  { %v253_v30 = vadd.f32 %v330_v28, %v252_v29 }
 0x22e   :  { %v257_v31 = vpack.c.bf16 %v253_v30, %v253_v30 }
 0x230   :  { %260 = vst.msk [vmem:[%s462_s7] sm:$0xf] %vm259_vm7, %v257_v31 }
 0x233   :  { %v254_v32 = vpop.f32.mrf.mxu2 }
 0x234   :  { %v255_v33 = vadd.f32 %v330_v28, %v254_v32 }
 0x236   :  { %v258_v34 = vpack.c.bf16 %v255_v33, %v255_v33 }
 0x238   :  { %261 = vst.msk [vmem:[%s462_s7 + $0x4] sm:$0xf] %vm259_vm7, %v258_v34 }

// kernel: _lambda_.7
= control target key start
LH: loop header
LB: loop body
LE: loop exit
PB: predicated region body
PF: predicated region fallthrough
CT: control target
= control target key end

     0   :  { %v41_v0 = vlaneseq  ;;  %vm1776_vm0 = vcmask 59392   ;;  %s1133_s8 = smov 120   ;;  %vm1775_vm8 = vcmask 1041409   ;;  %vm1774_vm10 = vcmask 1042434   ;;  %s1135_s20 = smov 104   ;;  %s1766_s1 = inlined_call_operand.vmem [shape: f32[4,2,8], index: 1, kind: input, shape index: {}]   ;;  %s1767_s2 = inlined_call_operand.vmem [shape: bf16[4,3,32], index: 2, kind: input, shape index: {}]   ;;  %s1768_s3 = inlined_call_operand.vmem [shape: f32[4,2,3], index: 3, kind: input, shape index: {}]   ;;  %s1769_s5 = inlined_call_operand.vmem [shape: f32[2,1,8], index: 5, kind: input, shape index: {}]   ;;  %s1770_s4 = inlined_call_operand.vmem [shape: bf16[2,8,8], index: 4, kind: input, shape index: {}]   ;;  %s1771_s0 = inlined_call_operand.vmem [shape: f32[4,8], index: 0, kind: input, shape index: {}]   ;;  %s1772_s6 = inlined_call_operand.vmem [shape: f32[4,8], index: 6, kind: output, shape index: {}]  }
   0x1   :  { %v1174_v1 = vld [vmem:[%s1766_s1 + $0x2] sm:$0x3]  ;;  %v33_v3 = vld [vmem:[%s1767_s2] sm:$0x3]  ;;  %v35_v8 = vld [vmem:[%s1767_s2 + $0x4] sm:$0x3] }
   0x2   :  { %v34_v2 = vld [vmem:[%s1767_s2 + $0x2] sm:$0x3]  ;;  %v1183_v4 = vand.u32 127, %v41_v0  ;;  %v52_v6 = vperm.slane %v1174_v1, 0  ;;  %v47_v7 = vunpack.c.l.bf16 %v33_v3  ;;  %v49_v9 = vunpack.c.l.bf16 %v35_v8  ;;  %v36_v10 = vld [vmem:[%s1767_s2 + $0x6] sm:$0x3] }
   0x3   :  { %v48_v5 = vunpack.c.l.bf16 %v34_v2  ;;  %v50_v12 = vunpack.c.l.bf16 %v36_v10  ;;  %v1205_v16 = vld [vmem:[%s1766_s1 + $0x4] sm:$0x3]  ;;  %v25_v31 = vld [vmem:[%s1766_s1] sm:$0x3]  ;;  %v28_v36 = vld [vmem:[%s1766_s1 + $0x6] sm:$0x3] }
   0x4   :  { %vm60_vm1 = vcmp.lt.s32.totalorder %v1183_v4, 4  ;;  %vm257_vm2 = vcmp.ge.s32.totalorder %v1183_v4, 4  ;;  %vm258_vm3 = vcmp.lt.s32.totalorder %v1183_v4, 8  ;;  %454 = vst [vmem:[#allocation1] ss:$2 sm:$0xff] %v47_v7  ;;  %v53_v18 = vperm.slane %v1205_v16, 0 }
   0x5   :  { %v56_v11 = vmul.f32 %v52_v6, %v48_v5  ;;  %457 = vst [vmem:[#allocation1 + $0x10] ss:$2 sm:$0xff] %v48_v5  ;;  %vm1198_vm4 = vmand %vm257_vm2, %vm258_vm3  ;;  %v51_v33 = vperm.slane %v25_v31, 0  ;;  %v54_v38 = vperm.slane %v28_v36, 0  ;;  %v551_v49 = vperm.slane %v1174_v1, 1 }
   0x6   :  { %460 = vst [vmem:[#allocation1 + $0x20] ss:$2 sm:$0xff] %v49_v9  ;;  %v57_v23 = vmul.f32 %v53_v18, %v49_v9  ;;  %v550_v50 = vperm.slane %v25_v31, 1  ;;  %v552_v60 = vperm.slane %v1205_v16, 1  ;;  %v553_v61 = vperm.slane %v28_v36, 1 }
   0x7   :  { %v65_v13 = vsel %vm60_vm1, %v56_v11, 0.0  ;;  %463 = vst [vmem:[#allocation1 + $0x30] ss:$2 sm:$0xff] %v50_v12  ;;  %v263_v17 = vsel %vm1198_vm4, %v56_v11, 0.0  ;;  %v55_v35 = vmul.f32 %v51_v33, %v47_v7  ;;  %v58_v40 = vmul.f32 %v54_v38, %v50_v12  ;;  %v1275_v18 = vld [vmem:[%s1768_s3 + $0x4] sm:$0x3] }
   0x8   :  { %v72_v14 = vsel %vm1776_vm0, %v65_v13, 0.0  ;;  %v269_v21 = vsel %vm1776_vm0, %v263_v17, 0.0  ;;  %v66_v25 = vsel %vm60_vm1, %v57_v23, 0.0  ;;  %v264_v32 = vsel %vm1198_vm4, %v57_v23, 0.0  ;;  %v1267_v13 = vld [vmem:[%s1768_s3 + $0x2] sm:$0x3] }
   0x9   :  { %73 = vadd.xlane.f32.xlu2 %v72_v14  ;;  %v75_v28 = vsel %vm1776_vm0, %v66_v25, 0.0  ;;  %v272_v34 = vsel %vm1776_vm0, %v264_v32, 0.0  ;;  %v64_v37 = vsel %vm60_vm1, %v55_v35, 0.0  ;;  %v67_v41 = vsel %vm60_vm1, %v58_v40, 0.0  ;;  %v1280_v23 = vld [vmem:[%s1768_s3] sm:$0x3] }
   0xa   :  { %v69_v39 = vsel %vm1776_vm0, %v64_v37, 0.0  ;;  %v78_v42 = vsel %vm1776_vm0, %v67_v41, 0.0  ;;  %v262_v43 = vsel %vm1198_vm4, %v55_v35, 0.0  ;;  %v265_v44 = vsel %vm1198_vm4, %v58_v40, 0.0 }
   0xb   :  { %v1212_v20 = vld.sshfl [vmem:[#allocation1] sm:$0xff pattern:$0x75316420]  ;;  %v266_v45 = vsel %vm1776_vm0, %v262_v43, 0.0  ;;  %v275_v46 = vsel %vm1776_vm0, %v265_v44, 0.0  ;;  %vm44_vm5 = vcmp.gt.f32.partialorder %v1267_v13, 0.0 }
   0xc   :  { %v1210_v19 = vld.sshfl [vmem:[#allocation1 + $0x10] sm:$0xff pattern:$0x75316420]  ;;  %554 = vst [vmem:[#allocation1] ss:$2 sm:$0xff] %v47_v7  ;;  %vm45_vm6 = vcmp.gt.f32.partialorder %v1275_v18, 0.0 }
   0xd   :  { %557 = vst [vmem:[#allocation1 + $0x10] ss:$2 sm:$0xff] %v48_v5  ;;  %v1215_v22 = vld.sshfl [vmem:[#allocation1 + $0x20] sm:$0xff pattern:$0x75316420]  ;;  %vm43_vm7 = vcmp.gt.f32.partialorder %v1280_v23, 0.0 }
   0xe   :  { %560 = vst [vmem:[#allocation1 + $0x20] ss:$2 sm:$0xff] %v49_v9  ;;  %v1217_v24 = vld.sshfl [vmem:[#allocation1 + $0x30] sm:$0xff pattern:$0x75316420]  ;;  %vm1773_vm11 = vcmask 1043459  }
   0xf   :  { %563 = vst [vmem:[#allocation1 + $0x30] ss:$2 sm:$0xff] %v50_v12  ;;  %vm115_vm12 = vcmask 19456   ;;  %vm626_vm13 = vcmask 1044484   ;;  %vm629_vm14 = vcmask 20481  }
  0x11   :  { %270 = vadd.xlane.f32.xlu2 %v269_v21 }
  0x13   :  { %v555_v27 = vld.sshfl [vmem:[#allocation1] sm:$0xff pattern:$0x75316420] }
  0x14   :  { %v558_v26 = vld.sshfl [vmem:[#allocation1 + $0x10] sm:$0xff pattern:$0x75316420]  ;;  %565 = vrot.lane.b32.xlu1 %v555_v27, %s1133_s8  ;;  %959 = vst [vmem:[#allocation1] ss:$2 sm:$0xff] %v47_v7 }
  0x15   :  { %567 = vrot.lane.b32.xlu0 %v558_v26, %s1133_s8  ;;  %962 = vst [vmem:[#allocation1 + $0x10] ss:$2 sm:$0xff] %v48_v5  ;;  %v561_v29 = vld.sshfl [vmem:[#allocation1 + $0x20] sm:$0xff pattern:$0x75316420] }
  0x16   :  { %965 = vst [vmem:[#allocation1 + $0x20] ss:$2 sm:$0xff] %v49_v9  ;;  %v564_v30 = vld.sshfl [vmem:[#allocation1 + $0x30] sm:$0xff pattern:$0x75316420] }
  0x17   :  { %968 = vst [vmem:[#allocation1 + $0x30] ss:$2 sm:$0xff] %v50_v12 }
  0x19   :  { %76 = vadd.xlane.f32.xlu2 %v75_v28 }
  0x1c   :  { %571 = vrot.lane.b32.xlu1 %v564_v30, %s1133_s8 }
  0x1d   :  { %569 = vrot.lane.b32.xlu0 %v561_v29, %s1133_s8 }
  0x21   :  { %273 = vadd.xlane.f32.xlu2 %v272_v34  ;;  %v1305_v34 = vld [vmem:[%s1768_s3 + $0x6] sm:$0x3]  ;;  %s1134_s3 = smov 112  }
  0x22   :  { %vm46_vm9 = vcmp.gt.f32.partialorder %v1305_v34, 0.0 }
  0x29   :  { %70 = vadd.xlane.f32.xlu2 %v69_v39 }
  0x31   :  { %79 = vadd.xlane.f32.xlu2 %v78_v42 }
  0x46   :  { %276 = vadd.xlane.f32.xlu1 %v275_v46 }
  0x47   :  { %267 = vadd.xlane.f32.xlu0 %v266_v45 }
  0x7c   :  { %v74_v47 = vpop.xlane.xlu2 %73 }
  0x7d   :  { %v82_v11 = vmul.f32 0.5, %v74_v47 }
  0x7f   :  { %v90_v16 = vperm.slane %v82_v11, %v1183_v4 }
  0x81   :  { %v1285_v27 = vsel %vm44_vm5, %v90_v16, -1e+09 }
  0x82   :  { %v105_v30 = vrot.slane %v1285_v27, 7 }
  0x84   :  { %v1243_v48 = vpop.xlane.xlu2 %270 }
  0x85   :  { %v279_v47 = vmul.f32 0.5, %v1243_v48 }
  0x86   :  { %v566_v53 = vpop.permute.xlu1 %565 }
  0x87   :  { %v568_v51 = vpop.permute.xlu0 %567  ;;  %v577_v56 = vmul.f32 %v566_v53, %v550_v50  ;;  %v287_v50 = vperm.slane %v279_v47, %v1183_v4 }
  0x88   :  { %v578_v52 = vmul.f32 %v568_v51, %v551_v49 }
  0x89   :  { %v771_v62 = vsel %vm1198_vm4, %v577_v56, 0.0  ;;  %v581_v29 = vsel %vm60_vm1, %v577_v56, 0.0 }
  0x8a   :  { %v772_v54 = vsel %vm1198_vm4, %v578_v52, 0.0  ;;  %v582_v55 = vsel %vm60_vm1, %v578_v52, 0.0  ;;  %v775_v3 = vsel %vm1776_vm0, %v771_v62, 0.0  ;;  %v585_v33 = vsel %vm1776_vm0, %v581_v29, 0.0 }
  0x8b   :  { %v778_v57 = vsel %vm1776_vm0, %v772_v54, 0.0  ;;  %v588_v58 = vsel %vm1776_vm0, %v582_v55, 0.0  ;;  %v1328_v52 = vsel %vm44_vm5, %v287_v50, -1e+09 }
  0x8c   :  { %779 = vadd.xlane.f32.xlu1 %v778_v57  ;;  %v77_v59 = vpop.xlane.xlu2 %76  ;;  %589 = vadd.xlane.f32.xlu0 %v588_v58  ;;  %v302_v57 = vrot.slane %v1328_v52, 7 }
  0x8d   :  { %v83_v14 = vmul.f32 0.5, %v77_v59 }
  0x8e   :  { %v572_v2 = vpop.permute.xlu1 %571 }
  0x8f   :  { %v570_v63 = vpop.permute.xlu0 %569  ;;  %v580_v5 = vmul.f32 %v572_v2, %v553_v61  ;;  %v91_v26 = vperm.slane %v83_v14, %v1183_v4 }
  0x90   :  { %v579_v1 = vmul.f32 %v570_v63, %v552_v60 }
  0x91   :  { %v584_v8 = vsel %vm60_vm1, %v580_v5, 0.0  ;;  %v1295_v31 = vsel %vm45_vm6, %v91_v26, -1e+09  ;;  %v774_v40 = vsel %vm1198_vm4, %v580_v5, 0.0 }
  0x92   :  { %v583_v6 = vsel %vm60_vm1, %v579_v1, 0.0  ;;  %v594_v10 = vsel %vm1776_vm0, %v584_v8, 0.0  ;;  %v773_v12 = vsel %vm1198_vm4, %v579_v1, 0.0  ;;  %v108_v36 = vrot.slane %v1295_v31, 6 }
  0x93   :  { %v591_v7 = vsel %vm1776_vm0, %v583_v6, 0.0  ;;  %v781_v17 = vsel %vm1776_vm0, %v773_v12, 0.0  ;;  %v784_v44 = vsel %vm1776_vm0, %v774_v40, 0.0  ;;  %v960_v6 = vld.sshfl [vmem:[#allocation1] sm:$0xff pattern:$0x75316420] }
  0x94   :  { %v274_v9 = vpop.xlane.xlu2 %273  ;;  %776 = vadd.xlane.f32.xlu1 %v775_v3  ;;  %592 = vadd.xlane.f32.xlu2 %v591_v7 }
  0x95   :  { %595 = vadd.xlane.f32.xlu0 %v594_v10  ;;  %v280_v49 = vmul.f32 0.5, %v274_v9 }
  0x97   :  { %v288_v51 = vperm.slane %v280_v49, %v1183_v4 }
  0x99   :  { %v1332_v53 = vsel %vm45_vm6, %v288_v51, -1e+09 }
  0x9a   :  { %v304_v48 = vrot.slane %v1332_v53, 6 }
  0x9c   :  { %782 = vadd.xlane.f32.xlu2 %v781_v17  ;;  %v71_v21 = vpop.xlane.xlu2 %70 }
  0x9d   :  { %v81_v25 = vmul.f32 0.5, %v71_v21 }
  0x9f   :  { %v89_v28 = vperm.slane %v81_v25, %v1183_v4 }
  0xa1   :  { %v1299_v32 = vsel %vm43_vm7, %v89_v28, -1e+09 }
  0xa2   :  { %v107_v38 = vsel %vm1775_vm8, %v105_v30, %v1299_v32 }
  0xa3   :  { %v110_v42 = vsel %vm1774_vm10, %v108_v36, %v107_v38 }
  0xa4   :  { %586 = vadd.xlane.f32.xlu2 %v585_v33  ;;  %v80_v35 = vpop.xlane.xlu2 %79 }
  0xa5   :  { %v84_v37 = vmul.f32 0.5, %v80_v35 }
  0xa7   :  { %v92_v39 = vperm.slane %v84_v37, %v1183_v4 }
  0xa9   :  { %v1316_v41 = vsel %vm46_vm9, %v92_v39, -1e+09 }
  0xaa   :  { %v111_v43 = vrot.slane %v1316_v41, 5 }
  0xac   :  { %785 = vadd.xlane.f32.xlu2 %v784_v44  ;;  %v113_v45 = vsel %vm1773_vm11, %v111_v43, %v110_v42 }
  0xad   :  { %v116_v46 = vsel %vm115_vm12, %v113_v45, -inf }
  0xae   :  { %117 = vmax.xlane.f32.xlu0 %v116_v46 }
  0xb9   :  { %v277_v55 = vpop.xlane.xlu1 %276 }
  0xba   :  { %v268_v54 = vpop.xlane.xlu0 %267  ;;  %v281_v58 = vmul.f32 0.5, %v277_v55 }
  0xbb   :  { %v278_v56 = vmul.f32 0.5, %v268_v54 }
  0xbc   :  { %v289_v60 = vperm.slane %v281_v58, %v1183_v4 }
  0xbd   :  { %v286_v59 = vperm.slane %v278_v56, %v1183_v4 }
  0xbe   :  { %v1344_v62 = vsel %vm46_vm9, %v289_v60, -1e+09 }
  0xbf   :  { %v1340_v61 = vsel %vm43_vm7, %v286_v59, -1e+09  ;;  %v306_v1 = vrot.slane %v1344_v62, 5 }
  0xc0   :  { %v303_v63 = vsel %vm1775_vm8, %v302_v57, %v1340_v61 }
  0xc1   :  { %v305_v2 = vsel %vm1774_vm10, %v304_v48, %v303_v63 }
  0xc2   :  { %467 = vrot.lane.b32.xlu0 %v1210_v19, %s1134_s3  ;;  %v307_v3 = vsel %vm1773_vm11, %v306_v1, %v305_v2 }
  0xc3   :  { %v309_v5 = vsel %vm115_vm12, %v307_v3, -inf }
  0xc4   :  { %465 = vrot.lane.b32.xlu2 %v1212_v20, %s1134_s3  ;;  %310 = vmax.xlane.f32.xlu1 %v309_v5 }
  0xdd   :  { %970 = vrot.lane.b32.xlu1 %v960_v6, %s1135_s20 }
  0xff   :  { %v590_v7 = vpop.xlane.xlu0 %589  ;;  %v780_v9 = vpop.xlane.xlu1 %779 }
 0x100   :  { %v598_v12 = vmul.f32 0.5, %v590_v7  ;;  %v788_v28 = vmul.f32 0.5, %v780_v9 }
 0x102   :  { %v606_v16 = vperm.slane %v598_v12, %v1183_v4  ;;  %v796_v42 = vperm.slane %v788_v28, %v1183_v4  ;;  %v963_v28 = vld.sshfl [vmem:[#allocation1 + $0x10] sm:$0xff pattern:$0x75316420] }
 0x104   :  { %v1362_v29 = vsel %vm44_vm5, %v606_v16, -1e+09  ;;  %v1393_v54 = vsel %vm44_vm5, %v796_v42, -1e+09 }
 0x105   :  { %v621_v39 = vrot.slane %v1362_v29, 7  ;;  %v811_v13 = vrot.slane %v1393_v54, 7 }
 0x107   :  { %v593_v8 = vpop.xlane.xlu2 %592  ;;  %v777_v20 = vpop.xlane.xlu1 %776 }
 0x108   :  { %v596_v10 = vpop.xlane.xlu0 %595  ;;  %v599_v19 = vmul.f32 0.5, %v593_v8  ;;  %v787_v35 = vmul.f32 0.5, %v777_v20 }
 0x109   :  { %v600_v14 = vmul.f32 0.5, %v596_v10 }
 0x10a   :  { %v607_v21 = vperm.slane %v599_v19, %v1183_v4  ;;  %v795_v45 = vperm.slane %v787_v35, %v1183_v4 }
 0x10b   :  { %v608_v17 = vperm.slane %v600_v14, %v1183_v4 }
 0x10c   :  { %v1370_v36 = vsel %vm45_vm6, %v607_v21, -1e+09  ;;  %v1398_v57 = vsel %vm43_vm7, %v795_v45, -1e+09 }
 0x10d   :  { %v1366_v30 = vsel %vm46_vm9, %v608_v17, -1e+09  ;;  %v623_v43 = vrot.slane %v1370_v36, 6  ;;  %v812_v8 = vsel %vm1774_vm10, %v811_v13, %v1398_v57 }
 0x10e   :  { %v625_v40 = vrot.slane %v1366_v30, 5 }
 0x10f   :  { %v783_v11 = vpop.xlane.xlu2 %782 }
 0x110   :  { %v789_v25 = vmul.f32 0.5, %v783_v11 }
 0x112   :  { %v797_v37 = vperm.slane %v789_v25, %v1183_v4 }
 0x114   :  { %v1387_v47 = vsel %vm45_vm6, %v797_v37, -1e+09 }
 0x115   :  { %v813_v18 = vrot.slane %v1387_v47, 6 }
 0x117   :  { %v587_v26 = vpop.xlane.xlu2 %586 }
 0x118   :  { %v597_v33 = vmul.f32 0.5, %v587_v26 }
 0x11a   :  { %v605_v38 = vperm.slane %v597_v33, %v1183_v4 }
 0x11c   :  { %v1380_v44 = vsel %vm43_vm7, %v605_v38, -1e+09 }
 0x11d   :  { %v622_v46 = vsel %vm1774_vm10, %v621_v39, %v1380_v44 }
 0x11e   :  { %v624_v49 = vsel %vm1773_vm11, %v623_v43, %v622_v46 }
 0x11f   :  { %v786_v50 = vpop.xlane.xlu2 %785  ;;  %v627_v51 = vsel %vm626_vm13, %v625_v40, %v624_v49 }
 0x120   :  { %v790_v55 = vmul.f32 0.5, %v786_v50  ;;  %v630_v56 = vsel %vm629_vm14, %v627_v51, -inf }
 0x121   :  { %v118_v58 = vpop.xlane.xlu0 %117  ;;  %631 = vmax.xlane.f32.xlu2 %v630_v56 }
 0x122   :  { %v798_v48 = vperm.slane %v790_v55, %v1183_v4  ;;  %v120_v59 = vrot.slane %v118_v58, 1  ;;  %v121_v60 = vrot.slane %v118_v58, 2  ;;  %v122_v63 = vrot.slane %v118_v58, 3 }
 0x123   :  { %v127_v1 = vsub.f32 %v1299_v32, %v118_v58  ;;  %v814_v32 = vsel %vm1773_vm11, %v813_v18, %v812_v8 }
 0x124   :  { %v1406_v2 = vsel %vm46_vm9, %v798_v48, -1e+09  ;;  %v128_v23 = vsub.f32 %v1285_v27, %v120_v59  ;;  %v129_v3 = vsub.f32 %v1295_v31, %v121_v60  ;;  %v130_v5 = vsub.f32 %v1316_v41, %v122_v63 }
 0x125   :  { %v815_v6 = vrot.slane %v1406_v2, 5  ;;  %v131_v7 = vmul.f32 1.442695, %v127_v1  ;;  %v223_v60 = vshrl.u32 %v41_v0, 7 }
 0x126   :  { %v133_v9 = vmul.f32 1.442695, %v128_v23  ;;  %v135_v10 = vmul.f32 1.442695, %v129_v3  ;;  %v137_v11 = vmul.f32 1.442695, %v130_v5 }
 0x127   :  { %1069 = vpow2.f32 %v131_v7  ;;  %v816_v34 = vsel %vm626_vm13, %v815_v6, %v814_v32  ;;  %v1456_v59 = vpop.permute.xlu2 %465  ;;  %1064 = vset.pattern.permute.xlu2 %v223_v60  ;;  %1066 = vset.pattern.permute.xlu0 %v223_v60 }
 0x128   :  { %1071 = vpow2.f32 %v133_v9  ;;  %v818_v27 = vsel %vm629_vm14, %v816_v34, -inf  ;;  %1065 = vset.pattern.permute.xlu1 %v223_v60 }
 0x129   :  { %1073 = vpow2.f32 %v135_v10  ;;  %819 = vmax.xlane.f32.xlu0 %v818_v27 }
 0x12a   :  { %1075 = vpow2.f32 %v137_v11 }
 0x12d   :  { %v1417_v31 = vpop.eup %1069 }
 0x12e   :  { %v1419_v41 = vpop.eup %1071 }
 0x12f   :  { %v1421_v12 = vpop.eup %1073  ;;  %v143_v14 = vrot.slane %v1419_v41, 7 }
 0x130   :  { %v1424_v19 = vpop.eup %1075  ;;  %v145_v16 = vrot.slane %v1421_v12, 6 }
 0x131   :  { %v144_v17 = vsel %vm1775_vm8, %v143_v14, %v1417_v31  ;;  %v147_v21 = vrot.slane %v1424_v19, 5 }
 0x132   :  { %v146_v20 = vsel %vm1774_vm10, %v145_v16, %v144_v17 }
 0x133   :  { %v148_v25 = vsel %vm1773_vm11, %v147_v21, %v146_v20 }
 0x134   :  { %v150_v26 = vsel %vm115_vm12, %v148_v25, 0.0  ;;  %v1459_v63 = vpop.permute.xlu0 %467 }
 0x135   :  { %151 = vadd.xlane.f32.xlu1 %v150_v26 }
 0x137   :  { %v311_v33 = vpop.xlane.xlu1 %310 }
 0x138   :  { %v313_v35 = vrot.slane %v311_v33, 1  ;;  %v314_v37 = vrot.slane %v311_v33, 2  ;;  %v315_v40 = vrot.slane %v311_v33, 3  ;;  %v320_v43 = vsub.f32 %v1340_v61, %v311_v33 }
 0x139   :  { %972 = vrot.lane.b32.xlu2 %v963_v28, %s1135_s20 }
 0x13a   :  { %v321_v38 = vsub.f32 %v1328_v52, %v313_v35  ;;  %v322_v39 = vsub.f32 %v1332_v53, %v314_v37  ;;  %v323_v46 = vsub.f32 %v1344_v62, %v315_v40  ;;  %v324_v49 = vmul.f32 1.442695, %v320_v43 }
 0x13c   :  { %v326_v42 = vmul.f32 1.442695, %v321_v38  ;;  %v328_v45 = vmul.f32 1.442695, %v322_v39  ;;  %v330_v50 = vmul.f32 1.442695, %v323_v46 }
 0x13d   :  { %469 = vrot.lane.b32.xlu0 %v1215_v22, %s1134_s3 }
 0x13e   :  { %1077 = vpow2.f32 %v326_v42 }
 0x13f   :  { %1079 = vpow2.f32 %v328_v45 }
 0x140   :  { %1081 = vpow2.f32 %v324_v49 }
 0x141   :  { %1083 = vpow2.f32 %v330_v50 }
 0x144   :  { %v1440_v51 = vpop.eup %1077 }
 0x145   :  { %v1442_v22 = vpop.eup %1079  ;;  %v336_v52 = vrot.slane %v1440_v51, 7 }
 0x146   :  { %v1445_v53 = vpop.eup %1081  ;;  %v338_v55 = vrot.slane %v1442_v22, 6 }
 0x147   :  { %v337_v61 = vsel %vm1775_vm8, %v336_v52, %v1445_v53  ;;  %v1450_v62 = vpop.eup %1083 }
 0x148   :  { %v339_v56 = vsel %vm1774_vm10, %v338_v55, %v337_v61  ;;  %v340_v18 = vrot.slane %v1450_v62, 5 }
 0x14a   :  { %v341_v58 = vsel %vm1773_vm11, %v340_v18, %v339_v56 }
 0x14b   :  { %v343_v48 = vsel %vm115_vm12, %v341_v58, 0.0 }
 0x14f   :  { %v1466_v16 = vpop.permute.xlu1 %970 }
 0x162   :  { %344 = vadd.xlane.f32.xlu2 %v343_v48 }
 0x194   :  { %v632_v13 = vpop.xlane.xlu2 %631 }
 0x195   :  { %v634_v1 = vrot.slane %v632_v13, 1  ;;  %v635_v23 = vrot.slane %v632_v13, 2  ;;  %v636_v3 = vrot.slane %v632_v13, 3  ;;  %v641_v5 = vsub.f32 %v1380_v44, %v632_v13 }
 0x197   :  { %v642_v6 = vsub.f32 %v1362_v29, %v634_v1  ;;  %v643_v7 = vsub.f32 %v1370_v36, %v635_v23  ;;  %v644_v8 = vsub.f32 %v1366_v30, %v636_v3  ;;  %v645_v9 = vmul.f32 1.442695, %v641_v5 }
 0x199   :  { %v647_v10 = vmul.f32 1.442695, %v642_v6  ;;  %v649_v0 = vmul.f32 1.442695, %v643_v7  ;;  %v651_v11 = vmul.f32 1.442695, %v644_v8  ;;  %1085 = vpow2.f32 %v645_v9 }
 0x19b   :  { %1087 = vpow2.f32 %v647_v10 }
 0x19c   :  { %1089 = vpow2.f32 %v649_v0  ;;  %v820_v32 = vpop.xlane.xlu0 %819 }
 0x19d   :  { %1091 = vpow2.f32 %v651_v11  ;;  %v822_v34 = vrot.slane %v820_v32, 1  ;;  %v823_v27 = vrot.slane %v820_v32, 2  ;;  %v824_v14 = vrot.slane %v820_v32, 3 }
 0x19e   :  { %v829_v44 = vsub.f32 %v1398_v57, %v820_v32 }
 0x19f   :  { %v830_v29 = vsub.f32 %v1393_v54, %v822_v34  ;;  %v831_v30 = vsub.f32 %v1387_v47, %v823_v27  ;;  %v832_v36 = vsub.f32 %v1406_v2, %v824_v14  ;;  %v1471_v17 = vpop.eup %1085 }
 0x1a0   :  { %v833_v21 = vmul.f32 1.442695, %v829_v44 }
 0x1a1   :  { %v1473_v20 = vpop.eup %1087  ;;  %v835_v25 = vmul.f32 1.442695, %v830_v29  ;;  %v837_v26 = vmul.f32 1.442695, %v831_v30  ;;  %v839_v28 = vmul.f32 1.442695, %v832_v36 }
 0x1a2   :  { %v1475_v33 = vpop.eup %1089  ;;  %1093 = vpow2.f32 %v833_v21  ;;  %v657_v57 = vrot.slane %v1473_v20, 7 }
 0x1a3   :  { %v1478_v35 = vpop.eup %1091  ;;  %1095 = vpow2.f32 %v835_v25  ;;  %v659_v47 = vrot.slane %v1475_v33, 6 }
 0x1a4   :  { %1097 = vpow2.f32 %v837_v26  ;;  %v658_v54 = vsel %vm1774_vm10, %v657_v57, %v1471_v17  ;;  %v661_v2 = vrot.slane %v1478_v35, 5 }
 0x1a5   :  { %1099 = vpow2.f32 %v839_v28  ;;  %v660_v37 = vsel %vm1773_vm11, %v659_v47, %v658_v54 }
 0x1a6   :  { %v662_v38 = vsel %vm626_vm13, %v661_v2, %v660_v37 }
 0x1a7   :  { %v664_v39 = vsel %vm629_vm14, %v662_v38, 0.0 }
 0x1a8   :  { %v1487_v40 = vpop.eup %1093  ;;  %v1489_v42 = vpop.xlane.xlu1 %151  ;;  %665 = vadd.xlane.f32.xlu0 %v664_v39 }
 0x1a9   :  { %v1491_v43 = vpop.eup %1095  ;;  %v154_v45 = vrot.slane %v1489_v42, 1  ;;  %v155_v46 = vrot.slane %v1489_v42, 2  ;;  %1101 = vrcp.f32 %v1489_v42  ;;  %v170_v6 = vand.u32 2147483647, %v1489_v42 }
 0x1aa   :  { %v1496_v49 = vpop.eup %1097  ;;  %v845_v50 = vrot.slane %v1491_v43, 7  ;;  %v172_v7 = vand.u32 2147483648, %v1489_v42  ;;  %vm166_vm2 = vweird.f32 %v1489_v42 }
 0x1ab   :  { %v1499_v52 = vpop.eup %1099  ;;  %1103 = vrcp.f32 %v154_v45  ;;  %v847_v55 = vrot.slane %v1496_v49, 6  ;;  %v185_v0 = vand.u32 2147483647, %v154_v45  ;;  %v187_v11 = vand.u32 2147483648, %v154_v45 }
 0x1ac   :  { %1105 = vrcp.f32 %v155_v46  ;;  %v846_v61 = vsel %vm1774_vm10, %v845_v50, %v1487_v40  ;;  %v849_v56 = vrot.slane %v1499_v52, 5  ;;  %vm171_vm6 = vcmp.eq.f32.partialorder %v170_v6, 8.507059e+37 }
 0x1ad   :  { %v848_v18 = vsel %vm1773_vm11, %v847_v55, %v846_v61  ;;  %v173_v14 = vor.u32 1.1754944e-38, %v172_v7  ;;  %vm181_vm7 = vweird.f32 %v154_v45  ;;  %vm186_vm9 = vcmp.eq.f32.partialorder %v185_v0, 8.507059e+37 }
 0x1ae   :  { %v850_v58 = vsel %vm626_vm13, %v849_v56, %v848_v18  ;;  %v188_v21 = vor.u32 1.1754944e-38, %v187_v11  ;;  %v202_v26 = vand.u32 2147483648, %v155_v46  ;;  %v200_v47 = vand.u32 2147483647, %v155_v46 }
 0x1af   :  { %v1102_v48 = vpop.eup %1101  ;;  %v852_v60 = vsel %vm629_vm14, %v850_v58, 0.0  ;;  %vm196_vm14 = vweird.f32 %v155_v46 }
 0x1b0   :  { %853 = vadd.xlane.f32.xlu1 %v852_v60  ;;  %v162_v13 = vmul.f32 %v1102_v48, %v1489_v42  ;;  %vm167_vm15 = vweird.f32 %v1102_v48  ;;  %v203_v39 = vor.u32 1.1754944e-38, %v202_v26 }
 0x1b1   :  { %v1104_v1 = vpop.eup %1103  ;;  %vm168_vm5 = vmor %vm166_vm2, %vm167_vm15  ;;  %vm201_vm2 = vcmp.eq.f32.partialorder %v200_v47, 8.507059e+37 }
 0x1b2   :  { %v1106_v23 = vpop.eup %1105  ;;  %v163_v3 = vsub.f32 1.0, %v162_v13  ;;  %v177_v5 = vmul.f32 %v1104_v1, %v154_v45  ;;  %vm182_vm3 = vweird.f32 %v1104_v1 }
 0x1b3   :  { %v192_v8 = vmul.f32 %v1106_v23, %v155_v46  ;;  %vm197_vm12 = vweird.f32 %v1106_v23  ;;  %vm183_vm13 = vmor %vm181_vm7, %vm182_vm3  ;;  %v1518_v46 = vpop.permute.xlu2 %972 }
 0x1b4   :  { %v164_v9 = vmul.f32 %v1102_v48, %v163_v3  ;;  %v178_v10 = vsub.f32 1.0, %v177_v5  ;;  %vm198_vm15 = vmor %vm196_vm14, %vm197_vm12 }
 0x1b5   :  { %v193_v32 = vsub.f32 1.0, %v192_v8 }
 0x1b6   :  { %v165_v34 = vadd.f32 %v1102_v48, %v164_v9  ;;  %v179_v27 = vmul.f32 %v1104_v1, %v178_v10 }
 0x1b7   :  { %v194_v44 = vmul.f32 %v1106_v23, %v193_v32 }
 0x1b8   :  { %v169_v29 = vsel %vm168_vm5, %v1102_v48, %v165_v34  ;;  %v180_v30 = vadd.f32 %v1104_v1, %v179_v27 }
 0x1b9   :  { %v174_v36 = vsel %vm171_vm6, %v173_v14, %v169_v29  ;;  %v195_v25 = vadd.f32 %v1106_v23, %v194_v44 }
 0x1ba   :  { %v175_v28 = vmul.f32 %v1417_v31, %v174_v36  ;;  %v184_v57 = vsel %vm183_vm13, %v1104_v1, %v180_v30  ;;  %v1516_v31 = vrot.slane %v1489_v42, 3 }
 0x1bb   :  { %v189_v54 = vsel %vm186_vm9, %v188_v21, %v184_v57  ;;  %v199_v38 = vsel %vm198_vm15, %v1106_v23, %v195_v25 }
 0x1bc   :  { %v221_v2 = vperm.slane %v175_v28, 0  ;;  %v190_v37 = vmul.f32 %v1419_v41, %v189_v54  ;;  %v204_v50 = vsel %vm201_vm2, %v203_v39, %v199_v38  ;;  %1107 = vrcp.f32 %v1516_v31 }
 0x1bd   :  { %v205_v55 = vmul.f32 %v1421_v12, %v204_v50 }
 0x1be   :  { %226 = vperm.xlu2 %1064, %v221_v2   ;;  %v228_v45 = vperm.slane %v190_v37, 0 }
 0x1bf   :  { %v235_v61 = vperm.slane %v205_v55, 0 }
 0x1c0   :  { %233 = vperm.xlu0 %1066, %v228_v45  }
 0x1c2   :  { %v1521_v56 = vpop.eup %1107 }
 0x1c3   :  { %v207_v12 = vmul.f32 %v1521_v56, %v1516_v31 }
 0x1c5   :  { %v208_v42 = vsub.f32 1.0, %v207_v12 }
 0x1c7   :  { %v209_v10 = vmul.f32 %v1521_v56, %v208_v42 }
 0x1c8   :  { %240 = vperm.xlu0 %1066, %v235_v61  }
 0x1d5   :  { %v345_v41 = vpop.xlane.xlu2 %344 }
 0x1d6   :  { %v347_v18 = vrot.slane %v345_v41, 1  ;;  %v348_v58 = vrot.slane %v345_v41, 2  ;;  %v1523_v48 = vrot.slane %v345_v41, 3  ;;  %1109 = vrcp.f32 %v345_v41 }
 0x1d7   :  { %v363_v13 = vand.u32 2147483647, %v345_v41  ;;  %v365_v1 = vand.u32 2147483648, %v345_v41  ;;  %vm359_vm3 = vweird.f32 %v345_v41 }
 0x1d8   :  { %1111 = vrcp.f32 %v347_v18  ;;  %v378_v5 = vand.u32 2147483647, %v347_v18  ;;  %v380_v6 = vand.u32 2147483648, %v347_v18  ;;  %vm374_vm6 = vweird.f32 %v347_v18 }
 0x1d9   :  { %1113 = vrcp.f32 %v348_v58  ;;  %vm1529_vm5 = vcmp.eq.f32.partialorder %v363_v13, 8.507059e+37  ;;  %v366_v32 = vor.u32 1.1754944e-38, %v365_v1  ;;  %vm389_vm12 = vweird.f32 %v348_v58 }
 0x1da   :  { %1115 = vrcp.f32 %v1523_v48  ;;  %vm1534_vm9 = vcmp.eq.f32.partialorder %v378_v5, 8.507059e+37  ;;  %v381_v30 = vor.u32 1.1754944e-38, %v380_v6  ;;  %v393_v57 = vand.u32 2147483647, %v348_v58 }
 0x1db   :  { %v395_v47 = vand.u32 2147483648, %v348_v58  ;;  %vm404_vm10 = vweird.f32 %v1523_v48  ;;  %v410_v45 = vand.u32 2147483648, %v1523_v48 }
 0x1dc   :  { %v1110_v60 = vpop.eup %1109 }
 0x1dd   :  { %v355_v23 = vmul.f32 %v1110_v60, %v345_v41  ;;  %vm360_vm7 = vweird.f32 %v1110_v60  ;;  %v408_v41 = vand.u32 2147483647, %v1523_v48  ;;  %v411_v5 = vor.u32 1.1754944e-38, %v410_v45 }
 0x1de   :  { %v1112_v3 = vpop.eup %1111  ;;  %vm361_vm14 = vmor %vm359_vm3, %vm360_vm7  ;;  %vm212_vm7 = vweird.f32 %v1521_v56 }
 0x1df   :  { %v1114_v7 = vpop.eup %1113  ;;  %v356_v8 = vsub.f32 1.0, %v355_v23  ;;  %v370_v9 = vmul.f32 %v1112_v3, %v347_v18  ;;  %vm375_vm13 = vweird.f32 %v1112_v3 }
 0x1e0   :  { %v1116_v0 = vpop.eup %1115  ;;  %v385_v34 = vmul.f32 %v1114_v7, %v348_v58  ;;  %vm390_vm15 = vweird.f32 %v1114_v7  ;;  %vm376_vm11 = vmor %vm374_vm6, %vm375_vm13  ;;  %vm394_vm6 = vcmp.eq.f32.partialorder %v393_v57, 8.507059e+37  ;;  %v210_v58 = vadd.f32 %v1521_v56, %v209_v10 }
 0x1e1   :  { %v357_v27 = vmul.f32 %v1110_v60, %v356_v8  ;;  %v371_v14 = vsub.f32 1.0, %v370_v9  ;;  %v400_v44 = vmul.f32 %v1116_v0, %v1523_v48  ;;  %vm405_vm2 = vweird.f32 %v1116_v0  ;;  %vm391_vm3 = vmor %vm389_vm12, %vm390_vm15 }
 0x1e2   :  { %v386_v36 = vsub.f32 1.0, %v385_v34 }
 0x1e3   :  { %v358_v21 = vadd.f32 %v1110_v60, %v357_v27  ;;  %v372_v25 = vmul.f32 %v1112_v3, %v371_v14  ;;  %v401_v26 = vsub.f32 1.0, %v400_v44 }
 0x1e4   :  { %v387_v28 = vmul.f32 %v1114_v7, %v386_v36 }
 0x1e5   :  { %v362_v54 = vsel %vm361_vm14, %v1110_v60, %v358_v21  ;;  %v373_v2 = vadd.f32 %v1112_v3, %v372_v25  ;;  %v402_v37 = vmul.f32 %v1116_v0, %v401_v26  ;;  %v396_v60 = vor.u32 1.1754944e-38, %v395_v47 }
 0x1e6   :  { %v367_v38 = vsel %vm1529_vm5, %v366_v32, %v362_v54  ;;  %v388_v39 = vadd.f32 %v1114_v7, %v387_v28  ;;  %vm406_vm5 = vmor %vm404_vm10, %vm405_vm2  ;;  %vm211_vm10 = vweird.f32 %v1516_v31 }
 0x1e7   :  { %v368_v50 = vmul.f32 %v1445_v53, %v367_v38  ;;  %v377_v55 = vsel %vm376_vm11, %v1112_v3, %v373_v2  ;;  %v403_v61 = vadd.f32 %v1116_v0, %v402_v37  ;;  %vm409_vm11 = vcmp.eq.f32.partialorder %v408_v41, 8.507059e+37 }
 0x1e8   :  { %v382_v12 = vsel %vm1534_vm9, %v381_v30, %v377_v55  ;;  %v392_v42 = vsel %vm391_vm3, %v1114_v7, %v388_v39  ;;  %v217_v3 = vand.u32 2147483648, %v1516_v31  ;;  %vm213_vm9 = vmor %vm211_vm10, %vm212_vm7 }
 0x1e9   :  { %v414_v18 = vperm.slane %v368_v50, 0  ;;  %v383_v13 = vmul.f32 %v1440_v51, %v382_v12  ;;  %v407_v1 = vsel %vm406_vm5, %v1116_v0, %v403_v61  ;;  %v397_v23 = vsel %vm394_vm6, %v396_v60, %v392_v42 }
 0x1ea   :  { %v412_v48 = vsel %vm409_vm11, %v411_v5, %v407_v1  ;;  %v398_v6 = vmul.f32 %v1442_v22, %v397_v23  ;;  %v215_v51 = vand.u32 2147483647, %v1516_v31  ;;  %v214_v8 = vsel %vm213_vm9, %v1521_v56, %v210_v58  ;;  %v1559_v22 = vpop.permute.xlu0 %469 }
 0x1eb   :  { %419 = vperm.xlu1 %1065, %v414_v18   ;;  %v421_v53 = vperm.slane %v383_v13, 0  ;;  %v413_v7 = vmul.f32 %v1450_v62, %v412_v48  ;;  %v218_v9 = vor.u32 1.1754944e-38, %v217_v3 }
 0x1ec   :  { %v428_v0 = vperm.slane %v398_v6, 0  ;;  %vm216_vm12 = vcmp.eq.f32.partialorder %v215_v51, 8.507059e+37 }
 0x1ed   :  { %426 = vperm.xlu2 %1064, %v421_v53   ;;  %v219_v10 = vsel %vm216_vm12, %v218_v9, %v214_v8  ;;  %v435_v11 = vperm.slane %v413_v7, 0 }
 0x1ee   :  { %v220_v32 = vmul.f32 %v1424_v19, %v219_v10 }
 0x1f0   :  { %v242_v34 = vperm.slane %v220_v32, 0 }
 0x1f3   :  { %433 = vperm.xlu1 %1065, %v428_v0  }
 0x1f5   :  { %440 = vperm.xlu2 %1064, %v435_v11  }
 0x1fb   :  { %247 = vperm.xlu1 %1065, %v242_v34  }
 0x21b   :  { %v666_v27 = vpop.xlane.xlu0 %665 }
 0x21c   :  { %v668_v31 = vrot.slane %v666_v27, 1  ;;  %1117 = vrcp.f32 %v666_v27  ;;  %v1561_v14 = vrot.slane %v666_v27, 2  ;;  %v1563_v62 = vrot.slane %v666_v27, 3 }
 0x21d   :  { %v684_v56 = vand.u32 2147483647, %v666_v27  ;;  %v686_v44 = vand.u32 2147483648, %v666_v27  ;;  %vm680_vm13 = vweird.f32 %v666_v27 }
 0x21e   :  { %1119 = vrcp.f32 %v668_v31  ;;  %v699_v29 = vand.u32 2147483647, %v668_v31  ;;  %v701_v30 = vand.u32 2147483648, %v668_v31  ;;  %vm695_vm15 = vweird.f32 %v668_v31 }
 0x21f   :  { %1121 = vrcp.f32 %v1561_v14  ;;  %vm1569_vm14 = vcmp.eq.f32.partialorder %v684_v56, 8.507059e+37  ;;  %v687_v26 = vor.u32 1.1754944e-38, %v686_v44  ;;  %v731_v45 = vand.u32 2147483648, %v1563_v62 }
 0x220   :  { %1123 = vrcp.f32 %v1563_v62  ;;  %vm1583_vm2 = vcmp.eq.f32.partialorder %v699_v29, 8.507059e+37  ;;  %v702_v39 = vor.u32 1.1754944e-38, %v701_v30  ;;  %v729_v55 = vand.u32 2147483647, %v1563_v62 }
 0x221   :  { %v714_v18 = vand.u32 2147483647, %v1561_v14  ;;  %v716_v13 = vand.u32 2147483648, %v1561_v14  ;;  %v1601_v53 = vor.u32 1.1754944e-38, %v731_v45 }
 0x222   :  { %v1118_v36 = vpop.eup %1117 }
 0x223   :  { %v1567_v19 = vpop.xlane.xlu1 %853  ;;  %v676_v21 = vmul.f32 %v1118_v36, %v666_v27  ;;  %vm681_vm3 = vweird.f32 %v1118_v36  ;;  %v717_v25 = vor.u32 1.1754944e-38, %v716_v13  ;;  %v969_v13 = vld.sshfl [vmem:[#allocation1 + $0x30] sm:$0xff pattern:$0x75316420] }
 0x224   :  { %v1120_v28 = vpop.eup %1119  ;;  %v1574_v57 = vrot.slane %v1567_v19, 1  ;;  %v1577_v47 = vrot.slane %v1567_v19, 2  ;;  %v1580_v54 = vrot.slane %v1567_v19, 3  ;;  %1125 = vrcp.f32 %v1567_v19  ;;  %vm682_vm6 = vmor %vm680_vm13, %vm681_vm3 }
 0x225   :  { %v677_v2 = vsub.f32 1.0, %v676_v21  ;;  %v691_v37 = vmul.f32 %v1120_v28, %v668_v31  ;;  %v872_v50 = vand.u32 2147483647, %v1567_v19  ;;  %v874_v12 = vand.u32 2147483648, %v1567_v19  ;;  %v1593_v42 = vpop.eup %1121 }
 0x226   :  { %1127 = vrcp.f32 %v1574_v57  ;;  %v904_v60 = vand.u32 2147483648, %v1577_v47  ;;  %v1599_v1 = vpop.eup %1123  ;;  %vm696_vm5 = vweird.f32 %v1120_v28  ;;  %vm868_vm11 = vweird.f32 %v1567_v19 }
 0x227   :  { %1129 = vrcp.f32 %v1577_v47  ;;  %v678_v61 = vmul.f32 %v1118_v36, %v677_v2  ;;  %v692_v41 = vsub.f32 1.0, %v691_v37  ;;  %v902_v48 = vand.u32 2147483647, %v1577_v47  ;;  %vm697_vm10 = vmor %vm695_vm15, %vm696_vm5 }
 0x228   :  { %1131 = vrcp.f32 %v1580_v54  ;;  %v887_v3 = vand.u32 2147483647, %v1574_v57  ;;  %v889_v6 = vand.u32 2147483648, %v1574_v57  ;;  %vm1610_vm7 = vcmp.eq.f32.partialorder %v872_v50, 8.507059e+37 }
 0x229   :  { %v679_v23 = vadd.f32 %v1118_v36, %v678_v61  ;;  %v693_v5 = vmul.f32 %v1120_v28, %v692_v41  ;;  %v875_v0 = vor.u32 1.1754944e-38, %v874_v12  ;;  %vm898_vm12 = vweird.f32 %v1577_v47 }
 0x22a   :  { %v1126_v58 = vpop.eup %1125  ;;  %v905_v32 = vor.u32 1.1754944e-38, %v904_v60  ;;  %vm883_vm13 = vweird.f32 %v1574_v57  ;;  %vm1629_vm15 = vcmp.eq.f32.partialorder %v887_v3, 8.507059e+37  ;;  %vm913_vm3 = vweird.f32 %v1580_v54 }
 0x22b   :  { %v683_v51 = vsel %vm682_vm6, %v1118_v36, %v679_v23  ;;  %v694_v7 = vadd.f32 %v1120_v28, %v693_v5  ;;  %v864_v8 = vmul.f32 %v1126_v58, %v1567_v19  ;;  %vm869_vm9 = vweird.f32 %v1126_v58 }
 0x22c   :  { %v1128_v10 = vpop.eup %1127  ;;  %v688_v11 = vsel %vm1569_vm14, %v687_v26, %v683_v51  ;;  %vm1625_vm14 = vcmp.eq.f32.partialorder %v902_v48, 8.507059e+37  ;;  %v890_v26 = vor.u32 1.1754944e-38, %v889_v6  ;;  %v917_v45 = vand.u32 2147483647, %v1580_v54  ;;  %vm870_vm6 = vmor %vm868_vm11, %vm869_vm9 }
 0x22d   :  { %v1130_v34 = vpop.eup %1129  ;;  %v689_v27 = vmul.f32 %v1471_v17, %v688_v11  ;;  %v698_v56 = vsel %vm697_vm10, %v1120_v28, %v694_v7  ;;  %v865_v44 = vsub.f32 1.0, %v864_v8  ;;  %v879_v29 = vmul.f32 %v1128_v10, %v1574_v57 }
 0x22e   :  { %v1132_v30 = vpop.eup %1131  ;;  %v703_v36 = vsel %vm1583_vm2, %v702_v39, %v698_v56  ;;  %v894_v31 = vmul.f32 %v1130_v34, %v1577_v47  ;;  %vm884_vm2 = vweird.f32 %v1128_v10  ;;  %vm725_vm5 = vweird.f32 %v1563_v62 }
 0x22f   :  { %v735_v17 = vperm.slane %v689_v27, 1  ;;  %v704_v28 = vmul.f32 %v1473_v20, %v703_v36  ;;  %v866_v2 = vmul.f32 %v1126_v58, %v865_v44  ;;  %v880_v37 = vsub.f32 1.0, %v879_v29  ;;  %vm885_vm11 = vmor %vm883_vm13, %vm884_vm2 }
 0x230   :  { %v895_v38 = vsub.f32 1.0, %v894_v31  ;;  %v909_v39 = vmul.f32 %v1132_v30, %v1580_v54  ;;  %v919_v12 = vand.u32 2147483648, %v1580_v54  ;;  %vm899_vm10 = vweird.f32 %v1130_v34 }
 0x231   :  { %740 = vperm.xlu1 %1065, %v735_v17   ;;  %v742_v50 = vperm.slane %v704_v28, 1  ;;  %v867_v61 = vadd.f32 %v1126_v58, %v866_v2  ;;  %v881_v41 = vmul.f32 %v1128_v10, %v880_v37  ;;  %v721_v23 = vmul.f32 %v1599_v1, %v1563_v62  ;;  %vm900_vm9 = vmor %vm898_vm12, %vm899_vm10  ;;  %v966_v28 = vld.sshfl [vmem:[#allocation1 + $0x20] sm:$0xff pattern:$0x75316420] }
 0x232   :  { %v896_v20 = vmul.f32 %v1130_v34, %v895_v38  ;;  %v910_v60 = vsub.f32 1.0, %v909_v39  ;;  %vm914_vm8 = vweird.f32 %v1132_v30  ;;  %vm726_vm0 = vweird.f32 %v1599_v1 }
 0x233   :  { %747 = vperm.xlu2 %1064, %v742_v50   ;;  %v871_v5 = vsel %vm870_vm6, %v1126_v58, %v867_v61  ;;  %v882_v48 = vadd.f32 %v1128_v10, %v881_v41  ;;  %v722_v51 = vsub.f32 1.0, %v721_v23  ;;  %v920_v8 = vor.u32 1.1754944e-38, %v919_v12  ;;  %vm727_vm13 = vmor %vm725_vm5, %vm726_vm0 }
 0x234   :  { %v876_v3 = vsel %vm1610_vm7, %v875_v0, %v871_v5  ;;  %v897_v6 = vadd.f32 %v1130_v34, %v896_v20  ;;  %v911_v19 = vmul.f32 %v1132_v30, %v910_v60  ;;  %v706_v11 = vmul.f32 %v1593_v42, %v1561_v14  ;;  %vm915_vm7 = vmor %vm913_vm3, %vm914_vm8 }
 0x235   :  { %v877_v7 = vmul.f32 %v1487_v40, %v876_v3  ;;  %v886_v58 = vsel %vm885_vm11, %v1128_v10, %v882_v48  ;;  %v723_v57 = vmul.f32 %v1599_v1, %v722_v51  ;;  %vm918_vm12 = vcmp.eq.f32.partialorder %v917_v45, 8.507059e+37 }
 0x236   :  { %v901_v27 = vsel %vm900_vm9, %v1130_v34, %v897_v6  ;;  %v891_v9 = vsel %vm1629_vm15, %v890_v26, %v886_v58  ;;  %v912_v0 = vadd.f32 %v1132_v30, %v911_v19  ;;  %v707_v47 = vsub.f32 1.0, %v706_v11 }
 0x237   :  { %v923_v56 = vperm.slane %v877_v7, 1  ;;  %v906_v44 = vsel %vm1625_vm14, %v905_v32, %v901_v27  ;;  %v892_v40 = vmul.f32 %v1491_v43, %v891_v9  ;;  %v724_v29 = vadd.f32 %v1599_v1, %v723_v57 }
 0x238   :  { %v907_v10 = vmul.f32 %v1496_v49, %v906_v44  ;;  %v916_v34 = vsel %vm915_vm7, %v1132_v30, %v912_v0  ;;  %v708_v43 = vmul.f32 %v1593_v42, %v707_v47  ;;  %vm711_vm14 = vweird.f32 %v1593_v42 }
 0x239   :  { %928 = vperm.xlu1 %1065, %v923_v56   ;;  %v930_v36 = vperm.slane %v892_v40, 1  ;;  %v921_v31 = vsel %vm918_vm12, %v920_v8, %v916_v34  ;;  %v728_v32 = vsel %vm727_vm13, %v1599_v1, %v724_v29  ;;  %vm730_vm8 = vcmp.eq.f32.partialorder %v729_v55, 8.507059e+37 }
 0x23a   :  { %v937_v54 = vperm.slane %v907_v10, 1  ;;  %v922_v49 = vmul.f32 %v1499_v52, %v921_v31  ;;  %v733_v30 = vsel %vm730_vm8, %v1601_v53, %v728_v32  ;;  %v709_v21 = vadd.f32 %v1593_v42, %v708_v43 }
 0x23b   :  { %935 = vperm.xlu2 %1064, %v930_v36   ;;  %vm710_vm15 = vweird.f32 %v1561_v14  ;;  %vm715_vm3 = vcmp.eq.f32.partialorder %v714_v18, 8.507059e+37  ;;  %v734_v62 = vmul.f32 %v1478_v35, %v733_v30  ;;  %v227_v14 = vpop.permute.xlu2 %226  ;;  %v234_v18 = vpop.permute.xlu0 %233  ;;  %vm1793_vm2 = vcmask 59392  }
 0x23c   :  { %942 = vperm.xlu0 %1066, %v937_v54   ;;  %vm712_vm0 = vmor %vm710_vm15, %vm711_vm14  ;;  %v944_v52 = vperm.slane %v922_v49, 1  ;;  %v249_v45 = vsel %vm60_vm1, %v227_v14, 0.0  ;;  %v250_v41 = vsel %vm60_vm1, %v234_v18, 0.0  ;;  %vm532_vm10 = vcmask 1043456  }
 0x23d   :  { %v713_v26 = vsel %vm712_vm0, %v1593_v42, %v709_v21  ;;  %v756_v17 = vperm.slane %v734_v62, 1  ;;  %vm1794_vm5 = vmmov %vm1793_vm2  ;;  %vm1799_vm12 = vcmask 1041409   ;;  %vm1800_vm13 = vcmask 1042434  }
 0x23e   :  { %v718_v55 = vsel %vm715_vm3, %v717_v25, %v713_v26  ;;  %vm1795_vm6 = vmmov %vm1793_vm2  ;;  %vm1801_vm14 = vcmask 1043459   ;;  %vm528_vm8 = vcmask 64512  }
 0x23f   :  { %v719_v1 = vmul.f32 %v1475_v33, %v718_v55  ;;  %vm1796_vm11 = vmmov %vm1793_vm2 }
 0x240   :  { %vm1797_vm9 = vmmov %vm1793_vm2 }
 0x241   :  { %949 = vperm.xlu1 %1065, %v944_v52   ;;  %v749_v53 = vperm.slane %v719_v1, 1  ;;  %vm1798_vm7 = vmmov %vm1793_vm2 }
 0x242   :  { %vm1802_vm15 = vmmov %vm1793_vm2 }
 0x243   :  { %754 = vperm.xlu2 %1064, %v749_v53   ;;  %v241_v37 = vpop.permute.xlu0 %240  ;;  %vm1803_vm0 = vmmov %vm1793_vm2 }
 0x244   :  { %761 = vperm.xlu0 %1066, %v756_v17   ;;  %v251_v50 = vsel %vm60_vm1, %v241_v37, 0.0  ;;  %vm1806_vm3 = vmmov %vm1801_vm14 }
 0x247   :  { %v427_v35 = vpop.permute.xlu2 %426 }
 0x249   :  { %974 = vrot.lane.b32.xlu1 %v966_v28, %s1135_s20 }
 0x24b   :  { %471 = vrot.lane.b32.xlu2 %v1217_v24, %s1134_s3  ;;  %v443_v24 = vsel %vm1198_vm4, %v427_v35, 0.0 }
 0x24c   :  { %976 = vrot.lane.b32.xlu0 %v969_v13, %s1135_s20  ;;  %v447_v60 = vadd.f32 %v443_v24, %v250_v41  ;;  %v38_v24 = vld [vmem:[%s1770_s4 + $0x4] sm:$0xf] }
 0x24e   :  { %v478_v48 = vmul.f32 %v1459_v63, %v447_v60  ;;  %v37_v63 = vld [vmem:[%s1770_s4] sm:$0xf] }
 0x24f   :  { %v441_v2 = vpop.permute.xlu2 %440  ;;  %v534_v40 = vsel %vm532_vm10, %v37_v63, 0 }
 0x250   :  { %v488_v51 = vsel %vm1795_vm6, %v478_v48, 0.0  ;;  %543 = vmatpush.bf16.msra.mxu0 %v534_v40  ;;  %v445_v10 = vsel %vm1198_vm4, %v441_v2, 0.0 }
 0x251   :  { %v489_v8 = vrot.slane %v488_v51, 4 }
 0x253   :  { %v490_v0 = vadd.f32 %v489_v8, %v488_v51 }
 0x255   :  { %v491_v56 = vrot.slane %v490_v0, 2 }
 0x257   :  { %v492_v54 = vadd.f32 %v491_v56, %v490_v0 }
 0x259   :  { %v493_v62 = vrot.slane %v492_v54, 1 }
 0x25b   :  { %v494_v35 = vadd.f32 %v493_v62, %v492_v54 }
 0x25d   :  { %v420_v42 = vpop.permute.xlu1 %419 }
 0x25e   :  { %v442_v38 = vsel %vm1198_vm4, %v420_v42, 0.0 }
 0x25f   :  { %v446_v61 = vadd.f32 %v442_v38, %v249_v45 }
 0x261   :  { %v477_v23 = vmul.f32 %v1456_v59, %v446_v61 }
 0x263   :  { %v481_v3 = vsel %vm1793_vm2, %v477_v23, 0.0  ;;  %vm1053_vm2 = vcmask 60416  }
 0x264   :  { %v482_v7 = vrot.slane %v481_v3, 4 }
 0x265   :  { %v434_v33 = vpop.permute.xlu1 %433 }
 0x266   :  { %v444_v39 = vsel %vm1198_vm4, %v434_v33, 0.0  ;;  %v483_v11 = vadd.f32 %v482_v7, %v481_v3 }
 0x267   :  { %v448_v12 = vadd.f32 %v444_v39, %v251_v50  ;;  %v510_v50 = vpack.c.bf16 %v494_v35, %v494_v35 }
 0x268   :  { %v484_v59 = vrot.slane %v483_v11, 2 }
 0x269   :  { %v479_v5 = vmul.f32 %v1559_v22, %v448_v12  ;;  %v1037_v12 = vsel %vm532_vm10, %v38_v24, 0 }
 0x26a   :  { %v485_v34 = vadd.f32 %v484_v59, %v483_v11  ;;  %1046 = vmatpush.bf16.msra.mxu1 %v1037_v12  ;;  %v1068_v12 = vld [vmem:[%s1769_s5 + $0x1] ss:$0 sm:$0xff] }
 0x26b   :  { %v495_v6 = vsel %vm1794_vm5, %v479_v5, 0.0 }
 0x26c   :  { %v496_v58 = vrot.slane %v495_v6, 4  ;;  %v486_v21 = vrot.slane %v485_v34, 1 }
 0x26d   :  { %v248_v27 = vpop.permute.xlu1 %247 }
 0x26e   :  { %v497_v9 = vadd.f32 %v496_v58, %v495_v6  ;;  %v252_v44 = vsel %vm60_vm1, %v248_v27, 0.0  ;;  %v487_v1 = vadd.f32 %v486_v21, %v485_v34  ;;  %v521_v6 = vunpack.c.l.b16 %v510_v50 }
 0x26f   :  { %v449_v31 = vadd.f32 %v445_v10, %v252_v44 }
 0x270   :  { %v498_v22 = vrot.slane %v497_v9, 2  ;;  %v509_v37 = vpack.c.bf16 %v487_v1, %v487_v1 }
 0x272   :  { %v499_v36 = vadd.f32 %v498_v22, %v497_v9  ;;  %v520_v60 = vunpack.c.l.b16 %v509_v37 }
 0x274   :  { %v500_v25 = vrot.slane %v499_v36, 1  ;;  %v524_v11 = vsel %vm1799_vm12, %v521_v6, %v520_v60 }
 0x276   :  { %v501_v28 = vadd.f32 %v500_v25, %v499_v36 }
 0x278   :  { %v511_v39 = vpack.c.bf16 %v501_v28, %v501_v28 }
 0x28d   :  { %v748_v20 = vpop.permute.xlu2 %747 }
 0x28e   :  { %v764_v43 = vsel %vm60_vm1, %v748_v20, 0.0 }
 0x295   :  { %v936_v19 = vpop.permute.xlu2 %935 }
 0x296   :  { %v952_v47 = vsel %vm1198_vm4, %v936_v19, 0.0 }
 0x297   :  { %v956_v32 = vadd.f32 %v952_v47, %v764_v43 }
 0x299   :  { %v983_v55 = vmul.f32 %v1518_v46, %v956_v32 }
 0x29b   :  { %v993_v42 = vsel %vm1797_vm9, %v983_v55, 0.0 }
 0x29c   :  { %v994_v45 = vrot.slane %v993_v42, 4 }
 0x29d   :  { %v1708_v57 = vpop.permute.xlu2 %754 }
 0x29e   :  { %v995_v48 = vadd.f32 %v994_v45, %v993_v42  ;;  %v765_v0 = vsel %vm60_vm1, %v1708_v57, 0.0 }
 0x2a0   :  { %v996_v27 = vrot.slane %v995_v48, 2 }
 0x2a2   :  { %v997_v47 = vadd.f32 %v996_v27, %v995_v48 }
 0x2a3   :  { %v741_v29 = vpop.permute.xlu1 %740 }
 0x2a4   :  { %v763_v13 = vsel %vm60_vm1, %v741_v29, 0.0  ;;  %v998_v32 = vrot.slane %v997_v47, 1 }
 0x2a5   :  { %v472_v49 = vpop.permute.xlu2 %471 }
 0x2a6   :  { %v480_v30 = vmul.f32 %v472_v49, %v449_v31 }
 0x2a8   :  { %v502_v26 = vsel %vm1796_vm11, %v480_v30, 0.0 }
 0x2a9   :  { %v503_v52 = vrot.slane %v502_v26, 4 }
 0x2ab   :  { %v504_v53 = vadd.f32 %v503_v52, %v502_v26  ;;  %v929_v17 = vpop.permute.xlu1 %928  ;;  %v999_v26 = vadd.f32 %v998_v32, %v997_v47 }
 0x2ac   :  { %v951_v14 = vsel %vm1198_vm4, %v929_v17, 0.0 }
 0x2ad   :  { %v505_v18 = vrot.slane %v504_v53, 2  ;;  %v955_v2 = vadd.f32 %v951_v14, %v763_v13 }
 0x2ae   :  { %v943_v33 = vpop.permute.xlu0 %942 }
 0x2af   :  { %v506_v38 = vadd.f32 %v505_v18, %v504_v53  ;;  %v982_v46 = vmul.f32 %v1466_v16, %v955_v2  ;;  %v522_v16 = vunpack.c.l.b16 %v511_v39  ;;  %v953_v8 = vsel %vm1198_vm4, %v943_v33, 0.0 }
 0x2b0   :  { %v957_v63 = vadd.f32 %v953_v8, %v765_v0  ;;  %v1015_v53 = vpack.c.bf16 %v999_v26, %v999_v26 }
 0x2b1   :  { %v507_v61 = vrot.slane %v506_v38, 1  ;;  %v986_v41 = vsel %vm1798_vm7, %v982_v46, 0.0  ;;  %v525_v9 = vsel %vm1800_vm13, %v522_v16, %v524_v11 }
 0x2b2   :  { %v987_v20 = vrot.slane %v986_v41, 4  ;;  %v1026_v42 = vunpack.c.l.b16 %v1015_v53 }
 0x2b3   :  { %v508_v23 = vadd.f32 %v507_v61, %v506_v38  ;;  %v950_v5 = vpop.permute.xlu1 %949  ;;  %v1067_v61 = vld [vmem:[%s1769_s5] ss:$0 sm:$0xff] }
 0x2b4   :  { %v988_v3 = vadd.f32 %v987_v20, %v986_v41  ;;  %v954_v10 = vsel %vm1198_vm4, %v950_v5, 0.0  ;;  %vm1805_vm4 = vmmov %vm1800_vm13  ;;  %v24_v20 = vld [vmem:[%s1771_s0] sm:$0xf] }
 0x2b5   :  { %v512_v19 = vpack.c.bf16 %v508_v23, %v508_v23 }
 0x2b6   :  { %v989_v51 = vrot.slane %v988_v3, 2  ;;  %v762_v7 = vpop.permute.xlu0 %761 }
 0x2b7   :  { %v523_v58 = vunpack.c.l.b16 %v512_v19  ;;  %v766_v56 = vsel %vm60_vm1, %v762_v7, 0.0  ;;  %vm1804_vm1 = vmmov %vm1799_vm12 }
 0x2b8   :  { %v990_v22 = vadd.f32 %v989_v51, %v988_v3  ;;  %v958_v29 = vadd.f32 %v954_v10, %v766_v56 }
 0x2b9   :  { %v526_v59 = vsel %vm1801_vm14, %v523_v58, %v525_v9 }
 0x2ba   :  { %v527_v44 = vpack.c.b16 %v526_v59, %v526_v59  ;;  %v991_v36 = vrot.slane %v990_v22, 1 }
 0x2bb   :  { %v975_v40 = vpop.permute.xlu1 %974 }
 0x2bc   :  { %v984_v34 = vmul.f32 %v975_v40, %v957_v63  ;;  %1059 = vmatmul.msk.bf16.vlgmr.msra.gmra.mxu0 %vm528_vm8, %v527_v44  ;;  %v992_v30 = vadd.f32 %v991_v36, %v990_v22 }
 0x2be   :  { %v1000_v57 = vsel %vm1802_vm15, %v984_v34, 0.0  ;;  %v977_v31 = vpop.permute.xlu0 %976  ;;  %v1014_v55 = vpack.c.bf16 %v992_v30, %v992_v30 }
 0x2bf   :  { %v1001_v43 = vrot.slane %v1000_v57, 4  ;;  %v985_v54 = vmul.f32 %v977_v31, %v958_v29 }
 0x2c0   :  { %v1025_v13 = vunpack.c.l.b16 %v1014_v55 }
 0x2c1   :  { %v1002_v49 = vadd.f32 %v1001_v43, %v1000_v57  ;;  %v1007_v4 = vsel %vm1803_vm0, %v985_v54, 0.0 }
 0x2c2   :  { %v1008_v21 = vrot.slane %v1007_v4, 4  ;;  %v1029_v37 = vsel %vm1804_vm1, %v1026_v42, %v1025_v13 }
 0x2c3   :  { %v1003_v25 = vrot.slane %v1002_v49, 2 }
 0x2c4   :  { %v1009_v15 = vadd.f32 %v1008_v21, %v1007_v4 }
 0x2c5   :  { %v1004_v62 = vadd.f32 %v1003_v25, %v1002_v49 }
 0x2c6   :  { %v1010_v52 = vrot.slane %v1009_v15, 2 }
 0x2c7   :  { %v1005_v1 = vrot.slane %v1004_v62, 1 }
 0x2c8   :  { %v1011_v17 = vadd.f32 %v1010_v52, %v1009_v15 }
 0x2c9   :  { %v1006_v28 = vadd.f32 %v1005_v1, %v1004_v62 }
 0x2ca   :  { %v1012_v14 = vrot.slane %v1011_v17, 1 }
 0x2cb   :  { %v1016_v35 = vpack.c.bf16 %v1006_v28, %v1006_v28 }
 0x2cc   :  { %v1013_v18 = vadd.f32 %v1012_v14, %v1011_v17 }
 0x2cd   :  { %v1027_v2 = vunpack.c.l.b16 %v1016_v35 }
 0x2ce   :  { %v1017_v33 = vpack.c.bf16 %v1013_v18, %v1013_v18 }
 0x2cf   :  { %v1030_v38 = vsel %vm1805_vm4, %v1027_v2, %v1029_v37 }
 0x2d0   :  { %v1028_v46 = vunpack.c.l.b16 %v1017_v33 }
 0x2d2   :  { %v1031_v39 = vsel %vm1806_vm3, %v1028_v46, %v1030_v38 }
 0x2d3   :  { %v1032_v45 = vpack.c.b16 %v1031_v39, %v1031_v39 }
 0x2d5   :  { %1060 = vmatmul.msk.bf16.vlgmr.msra.gmra.mxu1 %vm528_vm8, %v1032_v45 }
 0x339   :  { %v545_v24 = vpop.f32.mrf.mxu0 }
 0x33a   :  { %v546_v41 = vadd.f32 %v1067_v61, %v545_v24 }
 0x33c   :  { %v549_v23 = vadd.f32 %v546_v41, %v24_v20 }
 0x341   :  { %v547_v50 = vpop.f32.mrf.mxu0 }
 0x352   :  { %v1048_v60 = vpop.f32.mrf.mxu1 }
 0x353   :  { %v1049_v5 = vadd.f32 %v1068_v12, %v1048_v60 }
 0x355   :  { %v1052_v48 = vadd.f32 %v1049_v5, %v549_v23 }
 0x357   :  { %1054 = vst.msk [vmem:[%s1772_s6] sm:$0xf] %vm1053_vm2, %v1052_v48 }
 0x35a   :  { %v1050_v3 = vpop.f32.mrf.mxu1 }

// kernel: _lambda_.9
= control target key start
LH: loop header
LB: loop body
LE: loop exit
PB: predicated region body
PF: predicated region fallthrough
CT: control target
= control target key end

     0   :  { %v42_v2 = vlaneseq  ;;  %vm1826_vm0 = vcmask 60416   ;;  %s1816_s0 = inlined_call_operand.vmem [shape: f32[4,8], index: 0, kind: input, shape index: {}]   ;;  %s1817_s1 = inlined_call_operand.vmem [shape: f32[4,2,8], index: 1, kind: input, shape index: {}]   ;;  %s1818_s2 = inlined_call_operand.vmem [shape: bf16[4,4,32], index: 2, kind: input, shape index: {}]   ;;  %s1819_s3 = inlined_call_operand.vmem [shape: f32[4,2,4], index: 3, kind: input, shape index: {}]   ;;  %s1820_s4 = inlined_call_operand.vmem [shape: bf16[2,8,8], index: 4, kind: input, shape index: {}]   ;;  %s1821_s5 = inlined_call_operand.vmem [shape: f32[2,1,8], index: 5, kind: input, shape index: {}]   ;;  %s1822_s6 = inlined_call_operand.hbm [shape: f32[4,8], index: 6, kind: output, shape index: {}]  }
   0x1   :  { %v1214_v0 = vld [vmem:[%s1817_s1 + $0x2] sm:$0x3]  ;;  %v34_v5 = vld [vmem:[%s1818_s2] sm:$0x3]  ;;  %v36_v8 = vld [vmem:[%s1818_s2 + $0x4] sm:$0x3] }
   0x2   :  { %v35_v1 = vld [vmem:[%s1818_s2 + $0x2] sm:$0x3]  ;;  %v53_v4 = vperm.slane %v1214_v0, 0  ;;  %v1224_v6 = vand.u32 127, %v42_v2  ;;  %v48_v7 = vunpack.c.l.bf16 %v34_v5  ;;  %v37_v9 = vld [vmem:[%s1818_s2 + $0x6] sm:$0x3]  ;;  %v50_v11 = vunpack.c.l.bf16 %v36_v8 }
   0x3   :  { %v49_v3 = vunpack.c.l.bf16 %v35_v1  ;;  %v51_v12 = vunpack.c.l.bf16 %v37_v9  ;;  %v1238_v13 = vld [vmem:[%s1817_s1 + $0x4] sm:$0x3] }
   0x4   :  { %vm61_vm1 = vcmp.lt.s32.totalorder %v1224_v6, 4  ;;  %vm258_vm2 = vcmp.ge.s32.totalorder %v1224_v6, 4  ;;  %vm259_vm3 = vcmp.lt.s32.totalorder %v1224_v6, 8  ;;  %455 = vst [vmem:[#allocation1] ss:$2 sm:$0xff] %v48_v7 }
   0x5   :  { %v57_v10 = vmul.f32 %v53_v4, %v49_v3  ;;  %458 = vst [vmem:[#allocation1 + $0x10] ss:$2 sm:$0xff] %v49_v3  ;;  %vm1242_vm4 = vmand %vm258_vm2, %vm259_vm3 }
   0x6   :  { %461 = vst [vmem:[#allocation1 + $0x20] ss:$2 sm:$0xff] %v50_v11 }
   0x7   :  { %v66_v14 = vsel %vm61_vm1, %v57_v10, 0.0  ;;  %464 = vst [vmem:[#allocation1 + $0x30] ss:$2 sm:$0xff] %v51_v12 }
   0x8   :  { %v73_v16 = vsel %vm1826_vm0, %v66_v14, 0.0 }
   0x9   :  { %11 = vsyncpa [#allocation3], 0  ;;  %74 = vadd.xlane.f32.xlu2 %v73_v16  ;;  %v264_v17 = vsel %vm1242_vm4, %v57_v10, 0.0  ;;  %v54_v18 = vperm.slane %v1238_v13, 0  ;;  %s1172_s2 = smov 120   ;;  %v552_v49 = vperm.slane %v1214_v0, 1 }
   0xa   :  { %v270_v21 = vsel %vm1826_vm0, %v264_v17, 0.0  ;;  %v26_v31 = vld [vmem:[%s1817_s1] sm:$0x3]  ;;  %v29_v36 = vld [vmem:[%s1817_s1 + $0x6] sm:$0x3]  ;;  %v553_v60 = vperm.slane %v1238_v13, 1 }
   0xb   :  { %v1252_v20 = vld.sshfl [vmem:[#allocation1] sm:$0xff pattern:$0x75316420]  ;;  %v58_v23 = vmul.f32 %v54_v18, %v50_v11  ;;  %v52_v33 = vperm.slane %v26_v31, 0  ;;  %v55_v38 = vperm.slane %v29_v36, 0  ;;  %v551_v50 = vperm.slane %v26_v31, 1 }
   0xc   :  { %v1250_v19 = vld.sshfl [vmem:[#allocation1 + $0x10] sm:$0xff pattern:$0x75316420]  ;;  %555 = vst [vmem:[#allocation1] ss:$2 sm:$0xff] %v48_v7  ;;  %v554_v61 = vperm.slane %v29_v36, 1 }
   0xd   :  { %558 = vst [vmem:[#allocation1 + $0x10] ss:$2 sm:$0xff] %v49_v3  ;;  %v1255_v22 = vld.sshfl [vmem:[#allocation1 + $0x20] sm:$0xff pattern:$0x75316420]  ;;  %v67_v25 = vsel %vm61_vm1, %v58_v23, 0.0  ;;  %v56_v35 = vmul.f32 %v52_v33, %v48_v7  ;;  %v59_v40 = vmul.f32 %v55_v38, %v51_v12 }
   0xe   :  { %561 = vst [vmem:[#allocation1 + $0x20] ss:$2 sm:$0xff] %v50_v11  ;;  %v1257_v24 = vld.sshfl [vmem:[#allocation1 + $0x30] sm:$0xff pattern:$0x75316420]  ;;  %v76_v28 = vsel %vm1826_vm0, %v67_v25, 0.0 }
   0xf   :  { %564 = vst [vmem:[#allocation1 + $0x30] ss:$2 sm:$0xff] %v51_v12  ;;  %v265_v32 = vsel %vm1242_vm4, %v58_v23, 0.0  ;;  %v65_v37 = vsel %vm61_vm1, %v56_v35, 0.0  ;;  %v68_v41 = vsel %vm61_vm1, %v59_v40, 0.0  ;;  %v263_v43 = vsel %vm1242_vm4, %v56_v35, 0.0 }
  0x10   :  { %v273_v34 = vsel %vm1826_vm0, %v265_v32, 0.0  ;;  %v70_v39 = vsel %vm1826_vm0, %v65_v37, 0.0  ;;  %v79_v42 = vsel %vm1826_vm0, %v68_v41, 0.0  ;;  %v266_v44 = vsel %vm1242_vm4, %v59_v40, 0.0  ;;  %v1307_v13 = vld [vmem:[%s1819_s3 + $0x2] sm:$0x3] }
  0x11   :  { %271 = vadd.xlane.f32.xlu2 %v270_v21  ;;  %v267_v45 = vsel %vm1826_vm0, %v263_v43, 0.0  ;;  %v276_v46 = vsel %vm1826_vm0, %v266_v44, 0.0  ;;  %vm45_vm5 = vcmp.gt.f32.partialorder %v1307_v13, 0.0  ;;  %v1315_v18 = vld [vmem:[%s1819_s3 + $0x4] sm:$0x3]  ;;  %vm1825_vm8 = vcmask 1041409  }
  0x12   :  { %v1320_v23 = vld [vmem:[%s1819_s3] sm:$0x3]  ;;  %vm46_vm6 = vcmp.gt.f32.partialorder %v1315_v18, 0.0  ;;  %vm1824_vm10 = vcmask 1042434   ;;  %vm1823_vm11 = vcmask 1043459   ;;  %vm116_vm12 = vcmask 27648  }
  0x13   :  { %v556_v27 = vld.sshfl [vmem:[#allocation1] sm:$0xff pattern:$0x75316420]  ;;  %vm44_vm7 = vcmp.gt.f32.partialorder %v1320_v23, 0.0  ;;  %s1174_s20 = smov 104   ;;  %vm627_vm13 = vcmask 1044484  }
  0x14   :  { %v559_v26 = vld.sshfl [vmem:[#allocation1 + $0x10] sm:$0xff pattern:$0x75316420]  ;;  %566 = vrot.lane.b32.xlu1 %v556_v27, %s1172_s2  ;;  %960 = vst [vmem:[#allocation1] ss:$2 sm:$0xff] %v48_v7  ;;  %vm630_vm14 = vcmask 28673  }
  0x15   :  { %568 = vrot.lane.b32.xlu0 %v559_v26, %s1172_s2  ;;  %963 = vst [vmem:[#allocation1 + $0x10] ss:$2 sm:$0xff] %v49_v3  ;;  %v562_v29 = vld.sshfl [vmem:[#allocation1 + $0x20] sm:$0xff pattern:$0x75316420]  ;;  %s1175_s30 = smov [#allocation2]  }
  0x16   :  { %966 = vst [vmem:[#allocation1 + $0x20] ss:$2 sm:$0xff] %v50_v11  ;;  %v565_v30 = vld.sshfl [vmem:[#allocation1 + $0x30] sm:$0xff pattern:$0x75316420]  ;;  %s1060_s7 = sshll.u32 %s1175_s30, 4  ;;  %s1061_s7 = int_to_ptr.vmem [resolvable:$true] %s1060_s7 }
  0x17   :  { %969 = vst [vmem:[#allocation1 + $0x30] ss:$2 sm:$0xff] %v51_v12  ;;  %s1062_s9 = sshll.u32 %s1822_s6, 4  ;;  %s1063_s9 = int_to_ptr.hbm [resolvable:$true] %s1062_s9 }
  0x19   :  { %77 = vadd.xlane.f32.xlu2 %v76_v28 }
  0x1c   :  { %572 = vrot.lane.b32.xlu1 %v565_v30, %s1172_s2 }
  0x1d   :  { %570 = vrot.lane.b32.xlu0 %v562_v29, %s1172_s2 }
  0x21   :  { %274 = vadd.xlane.f32.xlu2 %v273_v34  ;;  %v1345_v34 = vld [vmem:[%s1819_s3 + $0x6] sm:$0x3]  ;;  %s1173_s3 = smov 112  }
  0x22   :  { %vm47_vm9 = vcmp.gt.f32.partialorder %v1345_v34, 0.0 }
  0x29   :  { %71 = vadd.xlane.f32.xlu2 %v70_v39 }
  0x31   :  { %80 = vadd.xlane.f32.xlu2 %v79_v42 }
  0x46   :  { %277 = vadd.xlane.f32.xlu1 %v276_v46 }
  0x47   :  { %268 = vadd.xlane.f32.xlu0 %v267_v45 }
  0x7c   :  { %v75_v47 = vpop.xlane.xlu2 %74 }
  0x7d   :  { %v83_v11 = vmul.f32 0.5, %v75_v47 }
  0x7f   :  { %v91_v16 = vperm.slane %v83_v11, %v1224_v6 }
  0x81   :  { %v1325_v27 = vsel %vm45_vm5, %v91_v16, -1e+09 }
  0x82   :  { %v106_v30 = vrot.slane %v1325_v27, 7 }
  0x84   :  { %v1283_v48 = vpop.xlane.xlu2 %271 }
  0x85   :  { %v280_v47 = vmul.f32 0.5, %v1283_v48 }
  0x86   :  { %v567_v53 = vpop.permute.xlu1 %566 }
  0x87   :  { %v569_v51 = vpop.permute.xlu0 %568  ;;  %v578_v56 = vmul.f32 %v567_v53, %v551_v50  ;;  %v288_v50 = vperm.slane %v280_v47, %v1224_v6 }
  0x88   :  { %v579_v52 = vmul.f32 %v569_v51, %v552_v49 }
  0x89   :  { %v772_v62 = vsel %vm1242_vm4, %v578_v56, 0.0  ;;  %v582_v29 = vsel %vm61_vm1, %v578_v56, 0.0 }
  0x8a   :  { %v773_v54 = vsel %vm1242_vm4, %v579_v52, 0.0  ;;  %v583_v55 = vsel %vm61_vm1, %v579_v52, 0.0  ;;  %v776_v3 = vsel %vm1826_vm0, %v772_v62, 0.0  ;;  %v586_v33 = vsel %vm1826_vm0, %v582_v29, 0.0 }
  0x8b   :  { %v779_v57 = vsel %vm1826_vm0, %v773_v54, 0.0  ;;  %v589_v58 = vsel %vm1826_vm0, %v583_v55, 0.0  ;;  %v1368_v52 = vsel %vm45_vm5, %v288_v50, -1e+09 }
  0x8c   :  { %780 = vadd.xlane.f32.xlu1 %v779_v57  ;;  %v78_v59 = vpop.xlane.xlu2 %77  ;;  %590 = vadd.xlane.f32.xlu0 %v589_v58  ;;  %v303_v57 = vrot.slane %v1368_v52, 7 }
  0x8d   :  { %v84_v14 = vmul.f32 0.5, %v78_v59 }
  0x8e   :  { %v573_v1 = vpop.permute.xlu1 %572 }
  0x8f   :  { %v571_v63 = vpop.permute.xlu0 %570  ;;  %v581_v4 = vmul.f32 %v573_v1, %v554_v61  ;;  %v92_v26 = vperm.slane %v84_v14, %v1224_v6 }
  0x90   :  { %v580_v0 = vmul.f32 %v571_v63, %v553_v60 }
  0x91   :  { %v585_v8 = vsel %vm61_vm1, %v581_v4, 0.0  ;;  %v1335_v31 = vsel %vm46_vm6, %v92_v26, -1e+09  ;;  %v775_v40 = vsel %vm1242_vm4, %v581_v4, 0.0 }
  0x92   :  { %v584_v5 = vsel %vm61_vm1, %v580_v0, 0.0  ;;  %v595_v10 = vsel %vm1826_vm0, %v585_v8, 0.0  ;;  %v774_v12 = vsel %vm1242_vm4, %v580_v0, 0.0  ;;  %v109_v36 = vrot.slane %v1335_v31, 6 }
  0x93   :  { %v592_v7 = vsel %vm1826_vm0, %v584_v5, 0.0  ;;  %v782_v17 = vsel %vm1826_vm0, %v774_v12, 0.0  ;;  %v785_v44 = vsel %vm1826_vm0, %v775_v40, 0.0  ;;  %v961_v5 = vld.sshfl [vmem:[#allocation1] sm:$0xff pattern:$0x75316420] }
  0x94   :  { %v275_v9 = vpop.xlane.xlu2 %274  ;;  %777 = vadd.xlane.f32.xlu1 %v776_v3  ;;  %593 = vadd.xlane.f32.xlu2 %v592_v7 }
  0x95   :  { %596 = vadd.xlane.f32.xlu0 %v595_v10  ;;  %v281_v49 = vmul.f32 0.5, %v275_v9 }
  0x97   :  { %v289_v51 = vperm.slane %v281_v49, %v1224_v6 }
  0x99   :  { %v1372_v53 = vsel %vm46_vm6, %v289_v51, -1e+09 }
  0x9a   :  { %v305_v48 = vrot.slane %v1372_v53, 6 }
  0x9c   :  { %783 = vadd.xlane.f32.xlu2 %v782_v17  ;;  %v72_v21 = vpop.xlane.xlu2 %71 }
  0x9d   :  { %v82_v25 = vmul.f32 0.5, %v72_v21 }
  0x9f   :  { %v90_v28 = vperm.slane %v82_v25, %v1224_v6 }
  0xa1   :  { %v1339_v32 = vsel %vm44_vm7, %v90_v28, -1e+09 }
  0xa2   :  { %v108_v38 = vsel %vm1825_vm8, %v106_v30, %v1339_v32 }
  0xa3   :  { %v111_v42 = vsel %vm1824_vm10, %v109_v36, %v108_v38 }
  0xa4   :  { %587 = vadd.xlane.f32.xlu2 %v586_v33  ;;  %v81_v35 = vpop.xlane.xlu2 %80 }
  0xa5   :  { %v85_v37 = vmul.f32 0.5, %v81_v35 }
  0xa7   :  { %v93_v39 = vperm.slane %v85_v37, %v1224_v6 }
  0xa9   :  { %v1356_v41 = vsel %vm47_vm9, %v93_v39, -1e+09 }
  0xaa   :  { %v112_v43 = vrot.slane %v1356_v41, 5 }
  0xac   :  { %786 = vadd.xlane.f32.xlu2 %v785_v44  ;;  %v114_v45 = vsel %vm1823_vm11, %v112_v43, %v111_v42 }
  0xad   :  { %v117_v46 = vsel %vm116_vm12, %v114_v45, -inf }
  0xae   :  { %118 = vmax.xlane.f32.xlu0 %v117_v46 }
  0xb9   :  { %v278_v55 = vpop.xlane.xlu1 %277 }
  0xba   :  { %v269_v54 = vpop.xlane.xlu0 %268  ;;  %v282_v58 = vmul.f32 0.5, %v278_v55 }
  0xbb   :  { %v279_v56 = vmul.f32 0.5, %v269_v54 }
  0xbc   :  { %v290_v60 = vperm.slane %v282_v58, %v1224_v6 }
  0xbd   :  { %v287_v59 = vperm.slane %v279_v56, %v1224_v6 }
  0xbe   :  { %v1384_v62 = vsel %vm47_vm9, %v290_v60, -1e+09 }
  0xbf   :  { %v1380_v61 = vsel %vm44_vm7, %v287_v59, -1e+09  ;;  %v307_v0 = vrot.slane %v1384_v62, 5 }
  0xc0   :  { %v304_v63 = vsel %vm1825_vm8, %v303_v57, %v1380_v61 }
  0xc1   :  { %v306_v1 = vsel %vm1824_vm10, %v305_v48, %v304_v63 }
  0xc2   :  { %468 = vrot.lane.b32.xlu0 %v1250_v19, %s1173_s3  ;;  %v308_v3 = vsel %vm1823_vm11, %v307_v0, %v306_v1 }
  0xc3   :  { %v310_v4 = vsel %vm116_vm12, %v308_v3, -inf }
  0xc4   :  { %466 = vrot.lane.b32.xlu2 %v1252_v20, %s1173_s3  ;;  %311 = vmax.xlane.f32.xlu1 %v310_v4 }
  0xdd   :  { %971 = vrot.lane.b32.xlu1 %v961_v5, %s1174_s20 }
  0xff   :  { %v591_v7 = vpop.xlane.xlu0 %590  ;;  %v781_v9 = vpop.xlane.xlu1 %780 }
 0x100   :  { %v599_v12 = vmul.f32 0.5, %v591_v7  ;;  %v789_v28 = vmul.f32 0.5, %v781_v9 }
 0x102   :  { %v607_v16 = vperm.slane %v599_v12, %v1224_v6  ;;  %v797_v42 = vperm.slane %v789_v28, %v1224_v6  ;;  %v964_v28 = vld.sshfl [vmem:[#allocation1 + $0x10] sm:$0xff pattern:$0x75316420] }
 0x104   :  { %v1402_v29 = vsel %vm45_vm5, %v607_v16, -1e+09  ;;  %v1433_v54 = vsel %vm45_vm5, %v797_v42, -1e+09 }
 0x105   :  { %v622_v39 = vrot.slane %v1402_v29, 7  ;;  %v812_v13 = vrot.slane %v1433_v54, 7 }
 0x107   :  { %v594_v8 = vpop.xlane.xlu2 %593  ;;  %v778_v20 = vpop.xlane.xlu1 %777 }
 0x108   :  { %v597_v10 = vpop.xlane.xlu0 %596  ;;  %v600_v19 = vmul.f32 0.5, %v594_v8  ;;  %v788_v35 = vmul.f32 0.5, %v778_v20 }
 0x109   :  { %v601_v14 = vmul.f32 0.5, %v597_v10 }
 0x10a   :  { %v608_v21 = vperm.slane %v600_v19, %v1224_v6  ;;  %v796_v45 = vperm.slane %v788_v35, %v1224_v6 }
 0x10b   :  { %v609_v17 = vperm.slane %v601_v14, %v1224_v6 }
 0x10c   :  { %v1410_v36 = vsel %vm46_vm6, %v608_v21, -1e+09  ;;  %v1438_v57 = vsel %vm44_vm7, %v796_v45, -1e+09 }
 0x10d   :  { %v1406_v30 = vsel %vm47_vm9, %v609_v17, -1e+09  ;;  %v624_v43 = vrot.slane %v1410_v36, 6  ;;  %v813_v8 = vsel %vm1824_vm10, %v812_v13, %v1438_v57 }
 0x10e   :  { %v626_v40 = vrot.slane %v1406_v30, 5 }
 0x10f   :  { %v784_v11 = vpop.xlane.xlu2 %783 }
 0x110   :  { %v790_v25 = vmul.f32 0.5, %v784_v11 }
 0x112   :  { %v798_v37 = vperm.slane %v790_v25, %v1224_v6 }
 0x114   :  { %v1427_v47 = vsel %vm46_vm6, %v798_v37, -1e+09 }
 0x115   :  { %v814_v18 = vrot.slane %v1427_v47, 6 }
 0x117   :  { %v588_v26 = vpop.xlane.xlu2 %587 }
 0x118   :  { %v598_v33 = vmul.f32 0.5, %v588_v26 }
 0x11a   :  { %v606_v38 = vperm.slane %v598_v33, %v1224_v6 }
 0x11c   :  { %v1420_v44 = vsel %vm44_vm7, %v606_v38, -1e+09 }
 0x11d   :  { %v623_v46 = vsel %vm1824_vm10, %v622_v39, %v1420_v44 }
 0x11e   :  { %v625_v49 = vsel %vm1823_vm11, %v624_v43, %v623_v46 }
 0x11f   :  { %v787_v50 = vpop.xlane.xlu2 %786  ;;  %v628_v51 = vsel %vm627_vm13, %v626_v40, %v625_v49 }
 0x120   :  { %v791_v55 = vmul.f32 0.5, %v787_v50  ;;  %v631_v56 = vsel %vm630_vm14, %v628_v51, -inf }
 0x121   :  { %v119_v58 = vpop.xlane.xlu0 %118  ;;  %632 = vmax.xlane.f32.xlu2 %v631_v56 }
 0x122   :  { %v799_v48 = vperm.slane %v791_v55, %v1224_v6  ;;  %v121_v59 = vrot.slane %v119_v58, 1  ;;  %v122_v60 = vrot.slane %v119_v58, 2  ;;  %v123_v63 = vrot.slane %v119_v58, 3 }
 0x123   :  { %v128_v0 = vsub.f32 %v1339_v32, %v119_v58  ;;  %v815_v32 = vsel %vm1823_vm11, %v814_v18, %v813_v8 }
 0x124   :  { %v1446_v1 = vsel %vm47_vm9, %v799_v48, -1e+09  ;;  %v129_v23 = vsub.f32 %v1325_v27, %v121_v59  ;;  %v130_v3 = vsub.f32 %v1335_v31, %v122_v60  ;;  %v131_v4 = vsub.f32 %v1356_v41, %v123_v63 }
 0x125   :  { %v816_v5 = vrot.slane %v1446_v1, 5  ;;  %v132_v7 = vmul.f32 1.442695, %v128_v0  ;;  %v224_v60 = vshrl.u32 %v42_v2, 7 }
 0x126   :  { %v134_v9 = vmul.f32 1.442695, %v129_v23  ;;  %v136_v10 = vmul.f32 1.442695, %v130_v3  ;;  %v138_v11 = vmul.f32 1.442695, %v131_v4 }
 0x127   :  { %1082 = vpow2.f32 %v132_v7  ;;  %v817_v34 = vsel %vm627_vm13, %v816_v5, %v815_v32  ;;  %v1496_v59 = vpop.permute.xlu2 %466  ;;  %1077 = vset.pattern.permute.xlu2 %v224_v60  ;;  %1079 = vset.pattern.permute.xlu0 %v224_v60 }
 0x128   :  { %1084 = vpow2.f32 %v134_v9  ;;  %v819_v27 = vsel %vm630_vm14, %v817_v34, -inf  ;;  %1078 = vset.pattern.permute.xlu1 %v224_v60 }
 0x129   :  { %1086 = vpow2.f32 %v136_v10  ;;  %820 = vmax.xlane.f32.xlu0 %v819_v27 }
 0x12a   :  { %1088 = vpow2.f32 %v138_v11 }
 0x12d   :  { %v1457_v31 = vpop.eup %1082 }
 0x12e   :  { %v1459_v41 = vpop.eup %1084 }
 0x12f   :  { %v1461_v12 = vpop.eup %1086  ;;  %v144_v14 = vrot.slane %v1459_v41, 7 }
 0x130   :  { %v1464_v19 = vpop.eup %1088  ;;  %v146_v16 = vrot.slane %v1461_v12, 6 }
 0x131   :  { %v145_v17 = vsel %vm1825_vm8, %v144_v14, %v1457_v31  ;;  %v148_v21 = vrot.slane %v1464_v19, 5 }
 0x132   :  { %v147_v20 = vsel %vm1824_vm10, %v146_v16, %v145_v17 }
 0x133   :  { %v149_v25 = vsel %vm1823_vm11, %v148_v21, %v147_v20 }
 0x134   :  { %v151_v26 = vsel %vm116_vm12, %v149_v25, 0.0  ;;  %v1499_v63 = vpop.permute.xlu0 %468 }
 0x135   :  { %152 = vadd.xlane.f32.xlu1 %v151_v26 }
 0x137   :  { %v312_v33 = vpop.xlane.xlu1 %311 }
 0x138   :  { %v314_v35 = vrot.slane %v312_v33, 1  ;;  %v315_v37 = vrot.slane %v312_v33, 2  ;;  %v316_v40 = vrot.slane %v312_v33, 3  ;;  %v321_v43 = vsub.f32 %v1380_v61, %v312_v33 }
 0x139   :  { %973 = vrot.lane.b32.xlu2 %v964_v28, %s1174_s20 }
 0x13a   :  { %v322_v38 = vsub.f32 %v1368_v52, %v314_v35  ;;  %v323_v39 = vsub.f32 %v1372_v53, %v315_v37  ;;  %v324_v46 = vsub.f32 %v1384_v62, %v316_v40  ;;  %v325_v49 = vmul.f32 1.442695, %v321_v43 }
 0x13c   :  { %v327_v42 = vmul.f32 1.442695, %v322_v38  ;;  %v329_v45 = vmul.f32 1.442695, %v323_v39  ;;  %v331_v50 = vmul.f32 1.442695, %v324_v46 }
 0x13d   :  { %470 = vrot.lane.b32.xlu0 %v1255_v22, %s1173_s3 }
 0x13e   :  { %1090 = vpow2.f32 %v327_v42 }
 0x13f   :  { %1092 = vpow2.f32 %v329_v45 }
 0x140   :  { %1094 = vpow2.f32 %v325_v49 }
 0x141   :  { %1096 = vpow2.f32 %v331_v50 }
 0x144   :  { %v1480_v51 = vpop.eup %1090 }
 0x145   :  { %v1482_v22 = vpop.eup %1092  ;;  %v337_v52 = vrot.slane %v1480_v51, 7 }
 0x146   :  { %v1485_v53 = vpop.eup %1094  ;;  %v339_v55 = vrot.slane %v1482_v22, 6 }
 0x147   :  { %v338_v61 = vsel %vm1825_vm8, %v337_v52, %v1485_v53  ;;  %v1490_v62 = vpop.eup %1096 }
 0x148   :  { %v340_v56 = vsel %vm1824_vm10, %v339_v55, %v338_v61  ;;  %v341_v18 = vrot.slane %v1490_v62, 5 }
 0x14a   :  { %v342_v58 = vsel %vm1823_vm11, %v341_v18, %v340_v56 }
 0x14b   :  { %v344_v48 = vsel %vm116_vm12, %v342_v58, 0.0 }
 0x14f   :  { %v1506_v16 = vpop.permute.xlu1 %971 }
 0x162   :  { %345 = vadd.xlane.f32.xlu2 %v344_v48 }
 0x194   :  { %v633_v13 = vpop.xlane.xlu2 %632 }
 0x195   :  { %v635_v0 = vrot.slane %v633_v13, 1  ;;  %v636_v23 = vrot.slane %v633_v13, 2  ;;  %v637_v3 = vrot.slane %v633_v13, 3  ;;  %v642_v4 = vsub.f32 %v1420_v44, %v633_v13 }
 0x197   :  { %v643_v5 = vsub.f32 %v1402_v29, %v635_v0  ;;  %v644_v7 = vsub.f32 %v1410_v36, %v636_v23  ;;  %v645_v8 = vsub.f32 %v1406_v30, %v637_v3  ;;  %v646_v9 = vmul.f32 1.442695, %v642_v4 }
 0x199   :  { %v648_v10 = vmul.f32 1.442695, %v643_v5  ;;  %v650_v2 = vmul.f32 1.442695, %v644_v7  ;;  %v652_v11 = vmul.f32 1.442695, %v645_v8  ;;  %1098 = vpow2.f32 %v646_v9 }
 0x19b   :  { %1100 = vpow2.f32 %v648_v10 }
 0x19c   :  { %1102 = vpow2.f32 %v650_v2  ;;  %v821_v32 = vpop.xlane.xlu0 %820 }
 0x19d   :  { %1104 = vpow2.f32 %v652_v11  ;;  %v823_v34 = vrot.slane %v821_v32, 1  ;;  %v824_v27 = vrot.slane %v821_v32, 2  ;;  %v825_v14 = vrot.slane %v821_v32, 3 }
 0x19e   :  { %v830_v44 = vsub.f32 %v1438_v57, %v821_v32 }
 0x19f   :  { %v831_v29 = vsub.f32 %v1433_v54, %v823_v34  ;;  %v832_v30 = vsub.f32 %v1427_v47, %v824_v27  ;;  %v833_v36 = vsub.f32 %v1446_v1, %v825_v14  ;;  %v1511_v17 = vpop.eup %1098 }
 0x1a0   :  { %v834_v21 = vmul.f32 1.442695, %v830_v44 }
 0x1a1   :  { %v1513_v20 = vpop.eup %1100  ;;  %v836_v25 = vmul.f32 1.442695, %v831_v29  ;;  %v838_v26 = vmul.f32 1.442695, %v832_v30  ;;  %v840_v28 = vmul.f32 1.442695, %v833_v36 }
 0x1a2   :  { %v1515_v33 = vpop.eup %1102  ;;  %1106 = vpow2.f32 %v834_v21  ;;  %v658_v57 = vrot.slane %v1513_v20, 7 }
 0x1a3   :  { %v1518_v35 = vpop.eup %1104  ;;  %1108 = vpow2.f32 %v836_v25  ;;  %v660_v47 = vrot.slane %v1515_v33, 6 }
 0x1a4   :  { %1110 = vpow2.f32 %v838_v26  ;;  %v659_v54 = vsel %vm1824_vm10, %v658_v57, %v1511_v17  ;;  %v662_v1 = vrot.slane %v1518_v35, 5 }
 0x1a5   :  { %1112 = vpow2.f32 %v840_v28  ;;  %v661_v37 = vsel %vm1823_vm11, %v660_v47, %v659_v54 }
 0x1a6   :  { %v663_v38 = vsel %vm627_vm13, %v662_v1, %v661_v37 }
 0x1a7   :  { %v665_v39 = vsel %vm630_vm14, %v663_v38, 0.0 }
 0x1a8   :  { %v1527_v40 = vpop.eup %1106  ;;  %v1529_v42 = vpop.xlane.xlu1 %152  ;;  %666 = vadd.xlane.f32.xlu0 %v665_v39 }
 0x1a9   :  { %v1531_v43 = vpop.eup %1108  ;;  %v155_v45 = vrot.slane %v1529_v42, 1  ;;  %v156_v46 = vrot.slane %v1529_v42, 2  ;;  %1114 = vrcp.f32 %v1529_v42  ;;  %v171_v5 = vand.u32 2147483647, %v1529_v42 }
 0x1aa   :  { %v1536_v49 = vpop.eup %1110  ;;  %v846_v50 = vrot.slane %v1531_v43, 7  ;;  %v173_v7 = vand.u32 2147483648, %v1529_v42  ;;  %vm167_vm2 = vweird.f32 %v1529_v42 }
 0x1ab   :  { %v1539_v52 = vpop.eup %1112  ;;  %1116 = vrcp.f32 %v155_v45  ;;  %v848_v55 = vrot.slane %v1536_v49, 6  ;;  %v186_v2 = vand.u32 2147483647, %v155_v45  ;;  %v188_v11 = vand.u32 2147483648, %v155_v45 }
 0x1ac   :  { %1118 = vrcp.f32 %v156_v46  ;;  %v847_v61 = vsel %vm1824_vm10, %v846_v50, %v1527_v40  ;;  %v850_v56 = vrot.slane %v1539_v52, 5  ;;  %vm172_vm6 = vcmp.eq.f32.partialorder %v171_v5, 8.507059e+37 }
 0x1ad   :  { %v849_v18 = vsel %vm1823_vm11, %v848_v55, %v847_v61  ;;  %v174_v14 = vor.u32 1.1754944e-38, %v173_v7  ;;  %vm182_vm7 = vweird.f32 %v155_v45  ;;  %vm187_vm9 = vcmp.eq.f32.partialorder %v186_v2, 8.507059e+37 }
 0x1ae   :  { %v851_v58 = vsel %vm627_vm13, %v850_v56, %v849_v18  ;;  %v189_v21 = vor.u32 1.1754944e-38, %v188_v11  ;;  %v203_v26 = vand.u32 2147483648, %v156_v46  ;;  %v201_v47 = vand.u32 2147483647, %v156_v46  ;;  %v1561_v56 = vpop.permute.xlu2 %973 }
 0x1af   :  { %v1115_v48 = vpop.eup %1114  ;;  %v853_v60 = vsel %vm630_vm14, %v851_v58, 0.0  ;;  %vm197_vm14 = vweird.f32 %v156_v46  ;;  %v1555_v55 = vrot.slane %v1529_v42, 3 }
 0x1b0   :  { %854 = vadd.xlane.f32.xlu1 %v853_v60  ;;  %v163_v13 = vmul.f32 %v1115_v48, %v1529_v42  ;;  %vm168_vm15 = vweird.f32 %v1115_v48  ;;  %v204_v39 = vor.u32 1.1754944e-38, %v203_v26 }
 0x1b1   :  { %v1117_v0 = vpop.eup %1116  ;;  %vm169_vm5 = vmor %vm167_vm2, %vm168_vm15  ;;  %vm202_vm2 = vcmp.eq.f32.partialorder %v201_v47, 8.507059e+37  ;;  %1120 = vrcp.f32 %v1555_v55  ;;  %v216_v5 = vand.u32 2147483647, %v1555_v55  ;;  %v218_v2 = vand.u32 2147483648, %v1555_v55 }
 0x1b2   :  { %v1119_v23 = vpop.eup %1118  ;;  %v164_v3 = vsub.f32 1.0, %v163_v13  ;;  %v178_v4 = vmul.f32 %v1117_v0, %v155_v45  ;;  %vm183_vm3 = vweird.f32 %v1117_v0 }
 0x1b3   :  { %v193_v8 = vmul.f32 %v1119_v23, %v156_v46  ;;  %vm198_vm12 = vweird.f32 %v1119_v23  ;;  %vm184_vm13 = vmor %vm182_vm7, %vm183_vm3 }
 0x1b4   :  { %v165_v9 = vmul.f32 %v1115_v48, %v164_v3  ;;  %v179_v10 = vsub.f32 1.0, %v178_v4  ;;  %vm199_vm15 = vmor %vm197_vm14, %vm198_vm12 }
 0x1b5   :  { %v194_v32 = vsub.f32 1.0, %v193_v8 }
 0x1b6   :  { %v166_v34 = vadd.f32 %v1115_v48, %v165_v9  ;;  %v180_v27 = vmul.f32 %v1117_v0, %v179_v10 }
 0x1b7   :  { %v195_v44 = vmul.f32 %v1119_v23, %v194_v32  ;;  %v1559_v61 = vpop.eup %1120 }
 0x1b8   :  { %v170_v29 = vsel %vm169_vm5, %v1115_v48, %v166_v34  ;;  %v181_v30 = vadd.f32 %v1117_v0, %v180_v27  ;;  %vm213_vm3 = vweird.f32 %v1559_v61  ;;  %vm212_vm5 = vweird.f32 %v1555_v55 }
 0x1b9   :  { %v175_v36 = vsel %vm172_vm6, %v174_v14, %v170_v29  ;;  %v196_v25 = vadd.f32 %v1119_v23, %v195_v44  ;;  %vm1575_vm6 = vmor %vm212_vm5, %vm213_vm3 }
 0x1ba   :  { %v176_v28 = vmul.f32 %v1457_v31, %v175_v36  ;;  %v185_v57 = vsel %vm184_vm13, %v1117_v0, %v181_v30 }
 0x1bb   :  { %v190_v54 = vsel %vm187_vm9, %v189_v21, %v185_v57  ;;  %v200_v38 = vsel %vm199_vm15, %v1119_v23, %v196_v25 }
 0x1bc   :  { %v222_v1 = vperm.slane %v176_v28, 0  ;;  %v191_v37 = vmul.f32 %v1459_v41, %v190_v54  ;;  %v205_v50 = vsel %vm202_vm2, %v204_v39, %v200_v38  ;;  %v208_v41 = vmul.f32 %v1559_v61, %v1555_v55 }
 0x1bd   :  { %v206_v31 = vmul.f32 %v1461_v12, %v205_v50 }
 0x1be   :  { %227 = vperm.xlu2 %1077, %v222_v1   ;;  %v229_v45 = vperm.slane %v191_v37, 0  ;;  %v209_v18 = vsub.f32 1.0, %v208_v41  ;;  %v219_v41 = vor.u32 1.1754944e-38, %v218_v2 }
 0x1bf   :  { %v236_v46 = vperm.slane %v206_v31, 0 }
 0x1c0   :  { %234 = vperm.xlu0 %1079, %v229_v45   ;;  %v210_v12 = vmul.f32 %v1559_v61, %v209_v18 }
 0x1c2   :  { %v211_v13 = vadd.f32 %v1559_v61, %v210_v12 }
 0x1c4   :  { %v215_v10 = vsel %vm1575_vm6, %v1559_v61, %v211_v13 }
 0x1c8   :  { %241 = vperm.xlu0 %1079, %v236_v46  }
 0x1d5   :  { %v346_v58 = vpop.xlane.xlu2 %345 }
 0x1d6   :  { %v348_v48 = vrot.slane %v346_v58, 1  ;;  %v1565_v60 = vrot.slane %v346_v58, 2  ;;  %v1567_v42 = vrot.slane %v346_v58, 3  ;;  %1122 = vrcp.f32 %v346_v58 }
 0x1d7   :  { %v364_v32 = vand.u32 2147483647, %v346_v58  ;;  %v366_v34 = vand.u32 2147483648, %v346_v58  ;;  %vm360_vm9 = vweird.f32 %v346_v58 }
 0x1d8   :  { %1124 = vrcp.f32 %v348_v48  ;;  %v379_v27 = vand.u32 2147483647, %v348_v48  ;;  %vm375_vm12 = vweird.f32 %v348_v48  ;;  %v381_v36 = vand.u32 2147483648, %v348_v48 }
 0x1d9   :  { %1126 = vrcp.f32 %v1565_v60  ;;  %vm365_vm15 = vcmp.eq.f32.partialorder %v364_v32, 8.507059e+37  ;;  %v367_v57 = vor.u32 1.1754944e-38, %v366_v34  ;;  %vm405_vm3 = vweird.f32 %v1567_v42 }
 0x1da   :  { %1128 = vrcp.f32 %v1567_v42  ;;  %vm380_vm2 = vcmp.eq.f32.partialorder %v379_v27, 8.507059e+37  ;;  %v382_v38 = vor.u32 1.1754944e-38, %v381_v36  ;;  %v409_v39 = vand.u32 2147483647, %v1567_v42 }
 0x1db   :  { %v411_v45 = vand.u32 2147483648, %v1567_v42 }
 0x1dc   :  { %v1123_v0 = vpop.eup %1122 }
 0x1dd   :  { %v356_v23 = vmul.f32 %v1123_v0, %v346_v58  ;;  %vm361_vm7 = vweird.f32 %v1123_v0  ;;  %v412_v13 = vor.u32 1.1754944e-38, %v411_v45 }
 0x1de   :  { %v1125_v3 = vpop.eup %1124  ;;  %vm362_vm14 = vmor %vm360_vm9, %vm361_vm7  ;;  %vm217_vm9 = vcmp.eq.f32.partialorder %v216_v5, 8.507059e+37 }
 0x1df   :  { %v1580_v7 = vpop.eup %1126  ;;  %v357_v8 = vsub.f32 1.0, %v356_v23  ;;  %v371_v9 = vmul.f32 %v1125_v3, %v348_v48  ;;  %vm376_vm13 = vweird.f32 %v1125_v3  ;;  %v220_v12 = vsel %vm217_vm9, %v219_v41, %v215_v10 }
 0x1e0   :  { %v1129_v11 = vpop.eup %1128  ;;  %v386_v14 = vmul.f32 %v1580_v7, %v1565_v60  ;;  %vm377_vm6 = vmor %vm375_vm12, %vm376_vm13  ;;  %vm410_vm12 = vcmp.eq.f32.partialorder %v409_v39, 8.507059e+37  ;;  %vm391_vm13 = vweird.f32 %v1580_v7 }
 0x1e1   :  { %v358_v44 = vmul.f32 %v1123_v0, %v357_v8  ;;  %v372_v29 = vsub.f32 1.0, %v371_v9  ;;  %v401_v30 = vmul.f32 %v1129_v11, %v1567_v42  ;;  %vm406_vm5 = vweird.f32 %v1129_v11 }
 0x1e2   :  { %v387_v28 = vsub.f32 1.0, %v386_v14  ;;  %vm407_vm7 = vmor %vm405_vm3, %vm406_vm5  ;;  %v221_v42 = vmul.f32 %v1464_v19, %v220_v12  ;;  %v1608_v19 = vpop.permute.xlu0 %470 }
 0x1e3   :  { %v359_v21 = vadd.f32 %v1123_v0, %v358_v44  ;;  %v373_v25 = vmul.f32 %v1125_v3, %v372_v29  ;;  %v402_v26 = vsub.f32 1.0, %v401_v30 }
 0x1e4   :  { %v388_v46 = vmul.f32 %v1580_v7, %v387_v28  ;;  %v243_v9 = vperm.slane %v221_v42, 0 }
 0x1e5   :  { %v363_v47 = vsel %vm362_vm14, %v1123_v0, %v359_v21  ;;  %v374_v54 = vadd.f32 %v1125_v3, %v373_v25  ;;  %v403_v1 = vmul.f32 %v1129_v11, %v402_v26  ;;  %vm390_vm14 = vweird.f32 %v1565_v60 }
 0x1e6   :  { %v368_v37 = vsel %vm365_vm15, %v367_v57, %v363_v47  ;;  %vm392_vm15 = vmor %vm390_vm14, %vm391_vm13 }
 0x1e7   :  { %v369_v50 = vmul.f32 %v1485_v53, %v368_v37  ;;  %v378_v55 = vsel %vm377_vm6, %v1125_v3, %v374_v54  ;;  %v404_v31 = vadd.f32 %v1129_v11, %v403_v1  ;;  %v389_v53 = vadd.f32 %v1580_v7, %v388_v46 }
 0x1e8   :  { %v383_v61 = vsel %vm380_vm2, %v382_v38, %v378_v55  ;;  %v396_v3 = vand.u32 2147483648, %v1565_v60 }
 0x1e9   :  { %v415_v18 = vperm.slane %v369_v50, 0  ;;  %v384_v58 = vmul.f32 %v1480_v51, %v383_v61  ;;  %v408_v48 = vsel %vm407_vm7, %v1129_v11, %v404_v31  ;;  %v394_v51 = vand.u32 2147483647, %v1565_v60 }
 0x1ea   :  { %v413_v23 = vsel %vm410_vm12, %v412_v13, %v408_v48  ;;  %v393_v5 = vsel %vm392_vm15, %v1580_v7, %v389_v53  ;;  %v397_v8 = vor.u32 1.1754944e-38, %v396_v3 }
 0x1eb   :  { %420 = vperm.xlu1 %1078, %v415_v18   ;;  %v422_v0 = vperm.slane %v384_v58, 0  ;;  %v414_v4 = vmul.f32 %v1490_v62, %v413_v23  ;;  %vm395_vm2 = vcmp.eq.f32.partialorder %v394_v51, 8.507059e+37 }
 0x1ec   :  { %v398_v10 = vsel %vm395_vm2, %v397_v8, %v393_v5 }
 0x1ed   :  { %427 = vperm.xlu2 %1077, %v422_v0   ;;  %v436_v2 = vperm.slane %v414_v4, 0  ;;  %v399_v11 = vmul.f32 %v1482_v22, %v398_v10 }
 0x1ef   :  { %v429_v32 = vperm.slane %v399_v11, 0 }
 0x1f3   :  { %248 = vperm.xlu1 %1078, %v243_v9  }
 0x1f5   :  { %441 = vperm.xlu2 %1077, %v436_v2  }
 0x1fb   :  { %434 = vperm.xlu1 %1078, %v429_v32  }
 0x21b   :  { %v667_v34 = vpop.xlane.xlu0 %666 }
 0x21c   :  { %v669_v60 = vrot.slane %v667_v34, 1  ;;  %1130 = vrcp.f32 %v667_v34  ;;  %v1610_v27 = vrot.slane %v667_v34, 2  ;;  %v1612_v62 = vrot.slane %v667_v34, 3 }
 0x21d   :  { %v685_v7 = vand.u32 2147483647, %v667_v34  ;;  %v687_v14 = vand.u32 2147483648, %v667_v34  ;;  %vm681_vm3 = vweird.f32 %v667_v34 }
 0x21e   :  { %1132 = vrcp.f32 %v669_v60  ;;  %v700_v44 = vand.u32 2147483647, %v669_v60  ;;  %v702_v29 = vand.u32 2147483648, %v669_v60  ;;  %vm696_vm6 = vweird.f32 %v669_v60 }
 0x21f   :  { %1134 = vrcp.f32 %v1610_v27  ;;  %vm1618_vm5 = vcmp.eq.f32.partialorder %v685_v7, 8.507059e+37  ;;  %v688_v25 = vor.u32 1.1754944e-38, %v687_v14  ;;  %v732_v39 = vand.u32 2147483648, %v1612_v62 }
 0x220   :  { %1136 = vrcp.f32 %v1612_v62  ;;  %vm1632_vm7 = vcmp.eq.f32.partialorder %v700_v44, 8.507059e+37  ;;  %v703_v38 = vor.u32 1.1754944e-38, %v702_v29  ;;  %v730_v50 = vand.u32 2147483647, %v1612_v62 }
 0x221   :  { %v715_v18 = vand.u32 2147483647, %v1610_v27  ;;  %v717_v58 = vand.u32 2147483648, %v1610_v27  ;;  %v1650_v0 = vor.u32 1.1754944e-38, %v732_v39 }
 0x222   :  { %v1131_v30 = vpop.eup %1130 }
 0x223   :  { %v1616_v22 = vpop.xlane.xlu1 %854  ;;  %v677_v36 = vmul.f32 %v1131_v30, %v667_v34  ;;  %vm682_vm9 = vweird.f32 %v1131_v30  ;;  %v718_v21 = vor.u32 1.1754944e-38, %v717_v58  ;;  %v970_v58 = vld.sshfl [vmem:[#allocation1 + $0x30] sm:$0xff pattern:$0x75316420] }
 0x224   :  { %v1133_v26 = vpop.eup %1132  ;;  %v1623_v28 = vrot.slane %v1616_v22, 1  ;;  %v1626_v57 = vrot.slane %v1616_v22, 2  ;;  %v1629_v47 = vrot.slane %v1616_v22, 3  ;;  %1138 = vrcp.f32 %v1616_v22  ;;  %vm683_vm13 = vmor %vm681_vm3, %vm682_vm9 }
 0x225   :  { %v678_v54 = vsub.f32 1.0, %v677_v36  ;;  %v692_v1 = vmul.f32 %v1133_v26, %v669_v60  ;;  %v873_v45 = vand.u32 2147483647, %v1616_v22  ;;  %v875_v46 = vand.u32 2147483648, %v1616_v22  ;;  %v1642_v61 = vpop.eup %1134 }
 0x226   :  { %1140 = vrcp.f32 %v1623_v28  ;;  %v905_v41 = vand.u32 2147483648, %v1626_v57  ;;  %v1648_v48 = vpop.eup %1136  ;;  %vm697_vm12 = vweird.f32 %v1133_v26  ;;  %vm869_vm14 = vweird.f32 %v1616_v22 }
 0x227   :  { %1142 = vrcp.f32 %v1626_v57  ;;  %v679_v55 = vmul.f32 %v1131_v30, %v678_v54  ;;  %v693_v31 = vsub.f32 1.0, %v692_v1  ;;  %v903_v23 = vand.u32 2147483647, %v1626_v57  ;;  %vm698_vm2 = vmor %vm696_vm6, %vm697_vm12 }
 0x228   :  { %1144 = vrcp.f32 %v1629_v47  ;;  %v888_v3 = vand.u32 2147483647, %v1623_v28  ;;  %v890_v42 = vand.u32 2147483648, %v1623_v28  ;;  %vm1659_vm15 = vcmp.eq.f32.partialorder %v873_v45, 8.507059e+37 }
 0x229   :  { %v680_v12 = vadd.f32 %v1131_v30, %v679_v55  ;;  %v694_v13 = vmul.f32 %v1133_v26, %v693_v31  ;;  %v876_v9 = vor.u32 1.1754944e-38, %v875_v46  ;;  %vm899_vm9 = vweird.f32 %v1626_v57 }
 0x22a   :  { %v1139_v53 = vpop.eup %1138  ;;  %v906_v11 = vor.u32 1.1754944e-38, %v905_v41  ;;  %vm1678_vm6 = vcmp.eq.f32.partialorder %v888_v3, 8.507059e+37  ;;  %vm914_vm12 = vweird.f32 %v1629_v47  ;;  %v918_v39 = vand.u32 2147483647, %v1629_v47 }
 0x22b   :  { %v684_v51 = vsel %vm683_vm13, %v1131_v30, %v680_v12  ;;  %v695_v4 = vadd.f32 %v1133_v26, %v694_v13  ;;  %v865_v5 = vmul.f32 %v1139_v53, %v1616_v22  ;;  %vm870_vm3 = vweird.f32 %v1139_v53 }
 0x22c   :  { %v1141_v10 = vpop.eup %1140  ;;  %v689_v2 = vsel %vm1618_vm5, %v688_v25, %v684_v51  ;;  %vm884_vm13 = vweird.f32 %v1623_v28  ;;  %vm1674_vm5 = vcmp.eq.f32.partialorder %v903_v23, 8.507059e+37  ;;  %v891_v25 = vor.u32 1.1754944e-38, %v890_v42  ;;  %vm871_vm11 = vmor %vm869_vm14, %vm870_vm3 }
 0x22d   :  { %v1143_v32 = vpop.eup %1142  ;;  %v690_v34 = vmul.f32 %v1511_v17, %v689_v2  ;;  %v699_v7 = vsel %vm698_vm2, %v1133_v26, %v695_v4  ;;  %v866_v14 = vsub.f32 1.0, %v865_v5  ;;  %v880_v44 = vmul.f32 %v1141_v10, %v1623_v28 }
 0x22e   :  { %v1145_v29 = vpop.eup %1144  ;;  %v704_v30 = vsel %vm1632_vm7, %v703_v38, %v699_v7  ;;  %v895_v60 = vmul.f32 %v1143_v32, %v1626_v57  ;;  %vm885_vm7 = vweird.f32 %v1141_v10  ;;  %vm726_vm2 = vweird.f32 %v1612_v62 }
 0x22f   :  { %v736_v17 = vperm.slane %v690_v34, 1  ;;  %v705_v26 = vmul.f32 %v1513_v20, %v704_v30  ;;  %v867_v54 = vmul.f32 %v1139_v53, %v866_v14  ;;  %v881_v1 = vsub.f32 1.0, %v880_v44  ;;  %vm886_vm14 = vmor %vm884_vm13, %vm885_vm7 }
 0x230   :  { %v896_v37 = vsub.f32 1.0, %v895_v60  ;;  %v910_v38 = vmul.f32 %v1145_v29, %v1629_v47  ;;  %v920_v46 = vand.u32 2147483648, %v1629_v47  ;;  %vm900_vm10 = vweird.f32 %v1143_v32 }
 0x231   :  { %741 = vperm.xlu1 %1078, %v736_v17   ;;  %v743_v45 = vperm.slane %v705_v26, 1  ;;  %v868_v55 = vadd.f32 %v1139_v53, %v867_v54  ;;  %v882_v31 = vmul.f32 %v1141_v10, %v881_v1  ;;  %v722_v12 = vmul.f32 %v1648_v48, %v1612_v62  ;;  %vm901_vm3 = vmor %vm899_vm9, %vm900_vm10  ;;  %v967_v26 = vld.sshfl [vmem:[#allocation1 + $0x20] sm:$0xff pattern:$0x75316420] }
 0x232   :  { %v897_v20 = vmul.f32 %v1143_v32, %v896_v37  ;;  %v911_v41 = vsub.f32 1.0, %v910_v38  ;;  %vm915_vm8 = vweird.f32 %v1145_v29  ;;  %vm727_vm0 = vweird.f32 %v1648_v48  ;;  %v235_v54 = vpop.permute.xlu0 %234 }
 0x233   :  { %748 = vperm.xlu2 %1077, %v743_v45   ;;  %v872_v13 = vsel %vm871_vm11, %v1139_v53, %v868_v55  ;;  %v883_v23 = vadd.f32 %v1141_v10, %v882_v31  ;;  %v723_v51 = vsub.f32 1.0, %v722_v12  ;;  %v921_v5 = vor.u32 1.1754944e-38, %v920_v46  ;;  %vm916_vm10 = vmor %vm914_vm12, %vm915_vm8 }
 0x234   :  { %v877_v3 = vsel %vm1659_vm15, %v876_v9, %v872_v13  ;;  %v898_v42 = vadd.f32 %v1143_v32, %v897_v20  ;;  %v912_v22 = vmul.f32 %v1145_v29, %v911_v41  ;;  %v707_v2 = vmul.f32 %v1642_v61, %v1610_v27  ;;  %vm728_vm15 = vmor %vm726_vm2, %vm727_vm0 }
 0x235   :  { %v878_v4 = vmul.f32 %v1527_v40, %v877_v3  ;;  %v887_v53 = vsel %vm886_vm14, %v1141_v10, %v883_v23  ;;  %v724_v28 = vmul.f32 %v1648_v48, %v723_v51  ;;  %vm919_vm11 = vcmp.eq.f32.partialorder %v918_v39, 8.507059e+37 }
 0x236   :  { %v902_v34 = vsel %vm901_vm3, %v1143_v32, %v898_v42  ;;  %v892_v8 = vsel %vm1678_vm6, %v891_v25, %v887_v53  ;;  %v913_v9 = vadd.f32 %v1145_v29, %v912_v22  ;;  %v708_v57 = vsub.f32 1.0, %v707_v2 }
 0x237   :  { %v924_v7 = vperm.slane %v878_v4, 1  ;;  %v907_v14 = vsel %vm1674_vm5, %v906_v11, %v902_v34  ;;  %v893_v40 = vmul.f32 %v1531_v43, %v892_v8  ;;  %v725_v44 = vadd.f32 %v1648_v48, %v724_v28 }
 0x238   :  { %v908_v10 = vmul.f32 %v1536_v49, %v907_v14  ;;  %v917_v32 = vsel %vm916_vm10, %v1145_v29, %v913_v9  ;;  %v709_v43 = vmul.f32 %v1642_v61, %v708_v57  ;;  %vm712_vm9 = vweird.f32 %v1642_v61 }
 0x239   :  { %929 = vperm.xlu1 %1078, %v924_v7   ;;  %v931_v30 = vperm.slane %v893_v40, 1  ;;  %v922_v60 = vsel %vm919_vm11, %v921_v5, %v917_v32  ;;  %v729_v11 = vsel %vm728_vm15, %v1648_v48, %v725_v44  ;;  %vm731_vm8 = vcmp.eq.f32.partialorder %v730_v50, 8.507059e+37 }
 0x23a   :  { %v938_v47 = vperm.slane %v908_v10, 1  ;;  %v923_v49 = vmul.f32 %v1539_v52, %v922_v60  ;;  %v734_v29 = vsel %vm731_vm8, %v1650_v0, %v729_v11  ;;  %v710_v36 = vadd.f32 %v1642_v61, %v709_v43  ;;  %v242_v37 = vpop.permute.xlu0 %241 }
 0x23b   :  { %936 = vperm.xlu2 %1077, %v931_v30   ;;  %vm711_vm13 = vweird.f32 %v1610_v27  ;;  %vm716_vm5 = vcmp.eq.f32.partialorder %v715_v18, 8.507059e+37  ;;  %v735_v62 = vmul.f32 %v1518_v35, %v734_v29  ;;  %v228_v27 = vpop.permute.xlu2 %227  ;;  %v252_v55 = vsel %vm61_vm1, %v242_v37, 0.0 }
 0x23c   :  { %943 = vperm.xlu0 %1079, %v938_v47   ;;  %vm713_vm0 = vmor %vm711_vm13, %vm712_vm9  ;;  %v945_v52 = vperm.slane %v923_v49, 1  ;;  %v250_v45 = vsel %vm61_vm1, %v228_v27, 0.0  ;;  %v251_v46 = vsel %vm61_vm1, %v235_v54, 0.0  ;;  %vm1841_vm6 = vcmask 60416  }
 0x23d   :  { %v714_v25 = vsel %vm713_vm0, %v1642_v61, %v710_v36  ;;  %v757_v17 = vperm.slane %v735_v62, 1  ;;  %vm1842_vm12 = vmmov %vm1841_vm6  ;;  %vm533_vm2 = vcmask 1043456   ;;  %vm1847_vm11 = vcmask 1041409  }
 0x23e   :  { %v719_v50 = vsel %vm716_vm5, %v718_v21, %v714_v25  ;;  %vm1843_vm7 = vmmov %vm1841_vm6  ;;  %vm1848_vm15 = vcmask 1042434   ;;  %vm1849_vm9 = vcmask 1043459   ;;  %vm529_vm8 = vcmask 64512  }
 0x23f   :  { %v720_v48 = vmul.f32 %v1515_v33, %v719_v50  ;;  %vm1844_vm14 = vmmov %vm1841_vm6 }
 0x240   :  { %vm1845_vm3 = vmmov %vm1841_vm6 }
 0x241   :  { %950 = vperm.xlu1 %1078, %v945_v52   ;;  %v750_v0 = vperm.slane %v720_v48, 1  ;;  %vm1846_vm10 = vmmov %vm1845_vm3 }
 0x242   :  { %vm1850_vm13 = vmmov %vm1845_vm3 }
 0x243   :  { %755 = vperm.xlu2 %1077, %v750_v0   ;;  %vm1851_vm0 = vmmov %vm1845_vm3 }
 0x244   :  { %762 = vperm.xlu0 %1079, %v757_v17   ;;  %vm1854_vm5 = vmmov %vm1849_vm9 }
 0x247   :  { %v428_v61 = vpop.permute.xlu2 %427 }
 0x249   :  { %975 = vrot.lane.b32.xlu1 %v967_v26, %s1174_s20 }
 0x24b   :  { %472 = vrot.lane.b32.xlu2 %v1257_v24, %s1173_s3  ;;  %v444_v24 = vsel %vm1242_vm4, %v428_v61, 0.0 }
 0x24c   :  { %977 = vrot.lane.b32.xlu0 %v970_v58, %s1174_s20  ;;  %v448_v12 = vadd.f32 %v444_v24, %v251_v46 }
 0x24e   :  { %v479_v3 = vmul.f32 %v1499_v63, %v448_v12  ;;  %v38_v63 = vld [vmem:[%s1820_s4] sm:$0xf] }
 0x24f   :  { %v442_v33 = vpop.permute.xlu2 %441  ;;  %v535_v40 = vsel %vm533_vm2, %v38_v63, 0 }
 0x250   :  { %v489_v4 = vsel %vm1843_vm7, %v479_v3, 0.0  ;;  %544 = vmatpush.bf16.msra.mxu0 %v535_v40  ;;  %v446_v10 = vsel %vm1242_vm4, %v442_v33, 0.0 }
 0x251   :  { %v490_v2 = vrot.slane %v489_v4, 4 }
 0x253   :  { %v491_v9 = vadd.f32 %v490_v2, %v489_v4 }
 0x25d   :  { %v421_v35 = vpop.permute.xlu1 %420 }
 0x25e   :  { %v443_v38 = vsel %vm1242_vm4, %v421_v35, 0.0 }
 0x25f   :  { %v447_v31 = vadd.f32 %v443_v38, %v250_v45  ;;  %v39_v45 = vld [vmem:[%s1820_s4 + $0x4] sm:$0xf] }
 0x260   :  { %v1038_v46 = vsel %vm533_vm2, %v39_v45, 0 }
 0x261   :  { %v478_v13 = vmul.f32 %v1496_v59, %v447_v31  ;;  %1047 = vmatpush.bf16.msra.mxu1 %v1038_v46  ;;  %v1081_v46 = vld [vmem:[%s1821_s5 + $0x1] ss:$0 sm:$0xff] }
 0x263   :  { %v482_v42 = vsel %vm1841_vm6, %v478_v13, 0.0  ;;  %vm1855_vm6 = vmmov %vm1851_vm0 }
 0x264   :  { %v483_v53 = vrot.slane %v482_v42, 4 }
 0x265   :  { %v249_v18 = vpop.permute.xlu1 %248 }
 0x266   :  { %v484_v34 = vadd.f32 %v483_v53, %v482_v42  ;;  %v253_v14 = vsel %vm61_vm1, %v249_v18, 0.0 }
 0x267   :  { %v450_v30 = vadd.f32 %v446_v10, %v253_v14 }
 0x268   :  { %v485_v59 = vrot.slane %v484_v34, 2 }
 0x26a   :  { %v486_v32 = vadd.f32 %v485_v59, %v484_v34 }
 0x26c   :  { %v487_v36 = vrot.slane %v486_v32, 1 }
 0x26d   :  { %v435_v1 = vpop.permute.xlu1 %434 }
 0x26e   :  { %v445_v39 = vsel %vm1242_vm4, %v435_v1, 0.0  ;;  %v488_v48 = vadd.f32 %v487_v36, %v486_v32 }
 0x26f   :  { %v449_v20 = vadd.f32 %v445_v39, %v252_v55 }
 0x270   :  { %v510_v1 = vpack.c.bf16 %v488_v48, %v488_v48 }
 0x271   :  { %v480_v23 = vmul.f32 %v1608_v19, %v449_v20  ;;  %v492_v19 = vrot.slane %v491_v9, 2 }
 0x273   :  { %v496_v22 = vsel %vm1842_vm12, %v480_v23, 0.0  ;;  %v493_v47 = vadd.f32 %v492_v19, %v491_v9 }
 0x274   :  { %v497_v5 = vrot.slane %v496_v22, 4 }
 0x275   :  { %v494_v62 = vrot.slane %v493_v47, 1 }
 0x276   :  { %v498_v8 = vadd.f32 %v497_v5, %v496_v22 }
 0x277   :  { %v495_v35 = vadd.f32 %v494_v62, %v493_v47 }
 0x278   :  { %v499_v7 = vrot.slane %v498_v8, 2 }
 0x279   :  { %v511_v24 = vpack.c.bf16 %v495_v35, %v495_v35 }
 0x27a   :  { %v500_v60 = vadd.f32 %v499_v7, %v498_v8 }
 0x27b   :  { %v522_v42 = vunpack.c.l.b16 %v511_v24 }
 0x27c   :  { %v501_v21 = vrot.slane %v500_v60, 1 }
 0x27e   :  { %v502_v26 = vadd.f32 %v501_v21, %v500_v60 }
 0x280   :  { %v512_v38 = vpack.c.bf16 %v502_v26, %v502_v26 }
 0x28d   :  { %v749_v41 = vpop.permute.xlu2 %748 }
 0x28e   :  { %v765_v43 = vsel %vm61_vm1, %v749_v41, 0.0  ;;  %v521_v41 = vunpack.c.l.b16 %v510_v1 }
 0x290   :  { %v525_v2 = vsel %vm1847_vm11, %v522_v42, %v521_v41 }
 0x295   :  { %v937_v51 = vpop.permute.xlu2 %936 }
 0x296   :  { %v953_v57 = vsel %vm1242_vm4, %v937_v51, 0.0 }
 0x297   :  { %v957_v11 = vadd.f32 %v953_v57, %v765_v43 }
 0x299   :  { %v984_v50 = vmul.f32 %v1561_v56, %v957_v11 }
 0x29b   :  { %v994_v61 = vsel %vm1845_vm3, %v984_v50, 0.0 }
 0x29c   :  { %v995_v39 = vrot.slane %v994_v61, 4 }
 0x29d   :  { %v1757_v28 = vpop.permute.xlu2 %755 }
 0x29e   :  { %v996_v23 = vadd.f32 %v995_v39, %v994_v61  ;;  %v766_v9 = vsel %vm61_vm1, %v1757_v28, 0.0 }
 0x2a0   :  { %v997_v34 = vrot.slane %v996_v23, 2 }
 0x2a2   :  { %v998_v57 = vadd.f32 %v997_v34, %v996_v23 }
 0x2a3   :  { %v742_v44 = vpop.permute.xlu1 %741 }
 0x2a4   :  { %v764_v58 = vsel %vm61_vm1, %v742_v44, 0.0  ;;  %v999_v11 = vrot.slane %v998_v57, 1 }
 0x2a5   :  { %v473_v49 = vpop.permute.xlu2 %472 }
 0x2a6   :  { %v481_v29 = vmul.f32 %v473_v49, %v450_v30 }
 0x2a8   :  { %v503_v25 = vsel %vm1844_vm14, %v481_v29, 0.0 }
 0x2a9   :  { %v504_v52 = vrot.slane %v503_v25, 4 }
 0x2ab   :  { %v505_v0 = vadd.f32 %v504_v52, %v503_v25  ;;  %v930_v17 = vpop.permute.xlu1 %929  ;;  %v1000_v25 = vadd.f32 %v999_v11, %v998_v57 }
 0x2ac   :  { %v952_v27 = vsel %vm1242_vm4, %v930_v17, 0.0 }
 0x2ad   :  { %v506_v18 = vrot.slane %v505_v0, 2  ;;  %v956_v54 = vadd.f32 %v952_v27, %v764_v58 }
 0x2ae   :  { %v944_v33 = vpop.permute.xlu0 %943 }
 0x2af   :  { %v507_v37 = vadd.f32 %v506_v18, %v505_v0  ;;  %v983_v56 = vmul.f32 %v1506_v16, %v956_v54  ;;  %v523_v16 = vunpack.c.l.b16 %v512_v38  ;;  %v954_v5 = vsel %vm1242_vm4, %v944_v33, 0.0 }
 0x2b0   :  { %v958_v63 = vadd.f32 %v954_v5, %v766_v9  ;;  %v1016_v0 = vpack.c.bf16 %v1000_v25, %v1000_v25 }
 0x2b1   :  { %v508_v55 = vrot.slane %v507_v37, 1  ;;  %v987_v31 = vsel %vm1846_vm10, %v983_v56, 0.0  ;;  %v526_v8 = vsel %vm1848_vm15, %v523_v16, %v525_v2 }
 0x2b2   :  { %v988_v20 = vrot.slane %v987_v31, 4  ;;  %v1027_v61 = vunpack.c.l.b16 %v1016_v0 }
 0x2b3   :  { %v509_v12 = vadd.f32 %v508_v55, %v507_v37  ;;  %v951_v13 = vpop.permute.xlu1 %950  ;;  %v1080_v55 = vld [vmem:[%s1821_s5] ss:$0 sm:$0xff] }
 0x2b4   :  { %v989_v3 = vadd.f32 %v988_v20, %v987_v31  ;;  %v955_v10 = vsel %vm1242_vm4, %v951_v13, 0.0  ;;  %vm1853_vm4 = vmmov %vm1848_vm15  ;;  %v25_v20 = vld [vmem:[%s1816_s0] sm:$0xf] }
 0x2b5   :  { %v513_v22 = vpack.c.bf16 %v509_v12, %v509_v12 }
 0x2b6   :  { %v990_v51 = vrot.slane %v989_v3, 2  ;;  %v763_v4 = vpop.permute.xlu0 %762 }
 0x2b7   :  { %v524_v53 = vunpack.c.l.b16 %v513_v22  ;;  %v767_v19 = vsel %vm61_vm1, %v763_v4, 0.0  ;;  %vm1852_vm1 = vmmov %vm1847_vm11 }
 0x2b8   :  { %v991_v7 = vadd.f32 %v990_v51, %v989_v3  ;;  %v959_v44 = vadd.f32 %v955_v10, %v767_v19 }
 0x2b9   :  { %v527_v59 = vsel %vm1849_vm9, %v524_v53, %v526_v8 }
 0x2ba   :  { %v528_v14 = vpack.c.b16 %v527_v59, %v527_v59  ;;  %v992_v30 = vrot.slane %v991_v7, 1 }
 0x2bb   :  { %v976_v40 = vpop.permute.xlu1 %975 }
 0x2bc   :  { %v985_v32 = vmul.f32 %v976_v40, %v958_v63  ;;  %1071 = vmatmul.msk.bf16.vlgmr.msra.gmra.mxu0 %vm529_vm8, %v528_v14  ;;  %v993_v29 = vadd.f32 %v992_v30, %v991_v7 }
 0x2be   :  { %v1001_v28 = vsel %vm1850_vm13, %v985_v32, 0.0  ;;  %v978_v60 = vpop.permute.xlu0 %977  ;;  %v1015_v50 = vpack.c.bf16 %v993_v29, %v993_v29 }
 0x2bf   :  { %v1002_v43 = vrot.slane %v1001_v28, 4  ;;  %v986_v47 = vmul.f32 %v978_v60, %v959_v44 }
 0x2c0   :  { %v1026_v58 = vunpack.c.l.b16 %v1015_v50 }
 0x2c1   :  { %v1003_v49 = vadd.f32 %v1002_v43, %v1001_v28  ;;  %v1008_v6 = vsel %vm1851_vm0, %v986_v47, 0.0 }
 0x2c2   :  { %v1009_v36 = vrot.slane %v1008_v6, 4  ;;  %v1030_v1 = vsel %vm1852_vm1, %v1027_v61, %v1026_v58 }
 0x2c3   :  { %v1004_v21 = vrot.slane %v1003_v49, 2 }
 0x2c4   :  { %v1010_v15 = vadd.f32 %v1009_v36, %v1008_v6 }
 0x2c5   :  { %v1005_v62 = vadd.f32 %v1004_v21, %v1003_v49 }
 0x2c6   :  { %v1011_v52 = vrot.slane %v1010_v15, 2 }
 0x2c7   :  { %v1006_v48 = vrot.slane %v1005_v62, 1 }
 0x2c8   :  { %v1012_v17 = vadd.f32 %v1011_v52, %v1010_v15 }
 0x2c9   :  { %v1007_v26 = vadd.f32 %v1006_v48, %v1005_v62 }
 0x2ca   :  { %v1013_v27 = vrot.slane %v1012_v17, 1 }
 0x2cb   :  { %v1017_v35 = vpack.c.bf16 %v1007_v26, %v1007_v26 }
 0x2cc   :  { %v1014_v18 = vadd.f32 %v1013_v27, %v1012_v17 }
 0x2cd   :  { %v1028_v54 = vunpack.c.l.b16 %v1017_v35 }
 0x2ce   :  { %v1018_v33 = vpack.c.bf16 %v1014_v18, %v1014_v18 }
 0x2cf   :  { %v1031_v37 = vsel %vm1853_vm4, %v1028_v54, %v1030_v1 }
 0x2d0   :  { %v1029_v56 = vunpack.c.l.b16 %v1018_v33 }
 0x2d2   :  { %v1032_v38 = vsel %vm1854_vm5, %v1029_v56, %v1031_v37 }
 0x2d3   :  { %v1033_v39 = vpack.c.b16 %v1032_v38, %v1032_v38 }
 0x2d5   :  { %1072 = vmatmul.msk.bf16.vlgmr.msra.gmra.mxu1 %vm529_vm8, %v1033_v39 }
 0x339   :  { %v546_v45 = vpop.f32.mrf.mxu0 }
 0x33a   :  { %v547_v31 = vadd.f32 %v1080_v55, %v546_v45 }
 0x33c   :  { %v550_v12 = vadd.f32 %v547_v31, %v25_v20 }
 0x341   :  { %v548_v24 = vpop.f32.mrf.mxu0 }
 0x352   :  { %v1049_v41 = vpop.f32.mrf.mxu1 }
 0x353   :  { %v1050_v13 = vadd.f32 %v1081_v46, %v1049_v41 }
 0x355   :  { %v1053_v23 = vadd.f32 %v1050_v13, %v550_v12 }
 0x357   :  { %1054 = vst.msk [vmem:[#allocation2] sm:$0xf] %vm1855_vm6, %v1053_v23 }
 0x358   :  { %1065 = dma.vmem_to_hbm [thread:$0]  %s1061_s7, 64, %s1063_s9, [#allocation3]  }
 0x35a   :  { %v1051_v3 = vpop.f32.mrf.mxu1 }
 0x35b   :  { %1170 = dma.done.wait [#allocation3], 64  }
 0x35c   :  { %1171 = vsyncadd [#allocation3], 4294967232 }
 0x35d   :  { %1070 = vsyncpa [#allocation3], 1 }

</bundles_post_ra>
